<compile_context>
chip_gen: v5e
topology: v5e:2x2
jax: 0.10.0
libtpu: 0.0.40
codegen_flags: <defaults>
</compile_context>

<pallas_src>
import math
import jax
import jax.numpy as jnp
from jax.experimental import pallas as pl
from jax.experimental.pallas import tpu as pltpu


def _discriminator_kernel(
    x_ref,                      # (TB, in)    bf16
    w1_ref, b1_ref,             # (in, 1024)  bf16 / (1, 1024) f32
    w2_ref, b2_ref,             # (1024, 512) bf16 / (1, 512)  f32
    w3_ref, b3_ref,             # (512, 256)  bf16 / (1, 256)  f32
    w4_ref, b4_ref,             # (256, 64)   bf16 / (1, 64)   f32
    w5_ref, b5_ref,             # (1, 64)     f32  / (1, 1)    f32
    o_ref,                      # (TB, 1)     f32
):
    # Layer 1: Linear(in, 1024) + ReLU   (bf16 operands, f32 MXU accumulation)
    h = jnp.dot(x_ref[...], w1_ref[...], preferred_element_type=jnp.float32)
    h = jnp.maximum(h + b1_ref[...], 0.0).astype(jnp.bfloat16)

    # Layer 2: Linear(1024, 512) + ReLU
    h = jnp.dot(h, w2_ref[...], preferred_element_type=jnp.float32)
    h = jnp.maximum(h + b2_ref[...], 0.0).astype(jnp.bfloat16)

    # Layer 3: Linear(512, 256) + ReLU
    h = jnp.dot(h, w3_ref[...], preferred_element_type=jnp.float32)
    h = jnp.maximum(h + b3_ref[...], 0.0).astype(jnp.bfloat16)

    # Layer 4: Linear(256, 64) + ReLU   (kept f32 for the VPU head below)
    h = jnp.dot(h, w4_ref[...], preferred_element_type=jnp.float32)
    h = jnp.maximum(h + b4_ref[...], 0.0)                        # (TB, 64) f32

    # Layer 5: Linear(64, 1) + Sigmoid.  An N=1 MXU matmul wastes a push/drain
    # so do it as a VPU multiply + XLU lane reduction; sigmoid = EUP exp + rcp.
    logits = jnp.sum(h * w5_ref[...], axis=-1, keepdims=True) + b5_ref[...]
    o_ref[...] = pl.reciprocal(1.0 + jnp.exp(-logits))           # exact 1/x


def discriminator_forward(x, params, *, max_batch_tile=256):
    """x: (B, 1, H, W) float32.  params: list of (W, b) with W shaped (in, out)."""
    B = x.shape[0]
    in_features = 1
    for d in x.shape[1:]:
        in_features *= d
    x_flat = x.reshape(B, in_features)  # matches torch x.view(x.size(0), -1)

    # Batch tile: multiple of 8 sublanes, up to an MXU-row-sized tile (256),
    # clamped so tiny batches (e.g. B=2) only pad to 8 rows.
    TB = min(max_batch_tile, max(8, ((B + 7) // 8) * 8))
    B_pad = ((B + TB - 1) // TB) * TB
    if B_pad != B:
        x_flat = jnp.pad(x_flat, ((0, B_pad - B), (0, 0)))
    x_bf16 = x_flat.astype(jnp.bfloat16)

    # Pack params: layers 1-4 weights bf16 (in, out); head is an f32 (1, 64) row.
    (w1, b1), (w2, b2), (w3, b3), (w4, b4), (w5, b5) = params
    flat_args = [
        x_bf16,
        w1.astype(jnp.bfloat16), b1.reshape(1, -1).astype(jnp.float32),
        w2.astype(jnp.bfloat16), b2.reshape(1, -1).astype(jnp.float32),
        w3.astype(jnp.bfloat16), b3.reshape(1, -1).astype(jnp.float32),
        w4.astype(jnp.bfloat16), b4.reshape(1, -1).astype(jnp.float32),
        w5.reshape(1, -1).astype(jnp.float32),
        b5.reshape(1, 1).astype(jnp.float32),
    ]

    # x / out are tiled over the batch grid; weights & biases use a constant
    # index_map so they are fetched once and stay resident across grid steps.
    in_specs = [pl.BlockSpec((TB, in_features), lambda i: (i, 0))]
    for a in flat_args[1:]:
        in_specs.append(pl.BlockSpec(a.shape, lambda i: (0, 0)))
    out_spec = pl.BlockSpec((TB, 1), lambda i: (i, 0))

    # VMEM budget: resident weights/biases + double-buffered x/out tiles +
    # generous slack for the f32 activation chain (largest is (TB, 1024) f32).
    resident = sum(int(a.size) * a.dtype.itemsize for a in flat_args[1:])
    streamed = 2 * (TB * in_features * 2 + TB * 4)     # double-buffered in/out
    act_scratch = 4 * TB * 1024 * 4
    vmem_limit = int(min(max(2 * resident + streamed + act_scratch, 32 * 2**20),
                         64 * 2**20))

    dims = [in_features, 1024, 512, 256, 64, 1]
    flops = 2 * B_pad * sum(a * b for a, b in zip(dims[:-1], dims[1:]))
    bytes_accessed = resident + int(x_bf16.size) * 2 + B_pad * 4

    out = pl.pallas_call(
        _discriminator_kernel,
        out_shape=jax.ShapeDtypeStruct((B_pad, 1), jnp.float32),
        grid=(B_pad // TB,),
        in_specs=in_specs,
        out_specs=out_spec,
        compiler_params=pltpu.CompilerParams(
            dimension_semantics=("parallel",),
            vmem_limit_bytes=vmem_limit,
        ),
        cost_estimate=pl.CostEstimate(
            flops=flops, transcendentals=B_pad, bytes_accessed=bytes_accessed),
    )(*flat_args)
    return out[:B]


def init_params(key, in_features):
    """Deterministic PyTorch-style uniform(-1/sqrt(fan_in), 1/sqrt(fan_in)) init."""
    dims = [in_features, 1024, 512, 256, 64, 1]
    params = []
    for i in range(len(dims) - 1):
        fan_in, fan_out = dims[i], dims[i + 1]
        key, kw, kb = jax.random.split(key, 3)
        bound = 1.0 / math.sqrt(fan_in)
        w = jax.random.uniform(kw, (fan_in, fan_out), jnp.float32, -bound, bound)
        b = jax.random.uniform(kb, (fan_out,), jnp.float32, -bound, bound)
        params.append((w, b))
    return params


if __name__ == "__main__":
    # Small shapes: image_size = (16, 16), single channel -> 256 input features.
    image_size = (16, 16)
    batch = 2
    in_features = image_size[0] * image_size[1] * 1

    key = jax.random.PRNGKey(0)
    key, kx = jax.random.split(key)
    x = jax.random.normal(kx, (batch, 1, image_size[0], image_size[1]), jnp.float32)

    params = init_params(key, in_features)

    out = discriminator_forward(x, params)
    out = jax.block_until_ready(out)

    assert out.shape == (batch, 1), out.shape
    assert bool(jnp.all((out >= 0.0) & (out <= 1.0))), "sigmoid output out of range"
    print("KERNEL_OK")
</pallas_src>

<mosaic_0001>
module attributes {stable_mosaic.version = 11 : i64} {
  func.func @_discriminator_kernel(%arg0: i32, %arg1: memref<8x256xbf16, #tpu.memory_space<vmem>>, %arg2: memref<256x1024xbf16, #tpu.memory_space<vmem>>, %arg3: memref<1x1024xf32, #tpu.memory_space<vmem>>, %arg4: memref<1024x512xbf16, #tpu.memory_space<vmem>>, %arg5: memref<1x512xf32, #tpu.memory_space<vmem>>, %arg6: memref<512x256xbf16, #tpu.memory_space<vmem>>, %arg7: memref<1x256xf32, #tpu.memory_space<vmem>>, %arg8: memref<256x64xbf16, #tpu.memory_space<vmem>>, %arg9: memref<1x64xf32, #tpu.memory_space<vmem>>, %arg10: memref<1x64xf32, #tpu.memory_space<vmem>>, %arg11: memref<1x1xf32, #tpu.memory_space<vmem>>, %arg12: memref<8x1xf32, #tpu.memory_space<vmem>>) attributes {dimension_semantics = [#tpu.dimension_semantics<parallel>], iteration_bounds = array<i64: 1>, scalar_prefetch = 0 : i64, scratch_operands = 0 : i64, tpu.core_type = #tpu.core_type<tc>, window_params = [{transform_indices = @transform_0, window_bounds = array<i64: 8, 256>}, {pipeline_mode = #tpu.pipeline_mode<synchronous>, transform_indices = @transform_1, window_bounds = array<i64: 256, 1024>}, {pipeline_mode = #tpu.pipeline_mode<synchronous>, transform_indices = @transform_2, window_bounds = array<i64: 1, 1024>}, {pipeline_mode = #tpu.pipeline_mode<synchronous>, transform_indices = @transform_3, window_bounds = array<i64: 1024, 512>}, {pipeline_mode = #tpu.pipeline_mode<synchronous>, transform_indices = @transform_4, window_bounds = array<i64: 1, 512>}, {pipeline_mode = #tpu.pipeline_mode<synchronous>, transform_indices = @transform_5, window_bounds = array<i64: 512, 256>}, {pipeline_mode = #tpu.pipeline_mode<synchronous>, transform_indices = @transform_6, window_bounds = array<i64: 1, 256>}, {pipeline_mode = #tpu.pipeline_mode<synchronous>, transform_indices = @transform_7, window_bounds = array<i64: 256, 64>}, {pipeline_mode = #tpu.pipeline_mode<synchronous>, transform_indices = @transform_8, window_bounds = array<i64: 1, 64>}, {pipeline_mode = #tpu.pipeline_mode<synchronous>, transform_indices = @transform_9, window_bounds = array<i64: 1, 64>}, {pipeline_mode = #tpu.pipeline_mode<synchronous>, transform_indices = @transform_10, window_bounds = array<i64: 1, 1>}, {transform_indices = @transform_11, window_bounds = array<i64: 8, 1>}]} {
    %c0 = arith.constant 0 : index
    %c0_0 = arith.constant 0 : index
    %0 = vector.load %arg1[%c0, %c0_0] : memref<8x256xbf16, #tpu.memory_space<vmem>>, vector<8x256xbf16>
    %c0_1 = arith.constant 0 : index
    %c0_2 = arith.constant 0 : index
    %1 = vector.load %arg2[%c0_1, %c0_2] : memref<256x1024xbf16, #tpu.memory_space<vmem>>, vector<256x1024xbf16>
    %cst = arith.constant dense<0.000000e+00> : vector<8x1024xf32>
    %2 = tpu.matmul %0, %1, %cst {dimension_numbers = #tpu.dot_dimension_numbers<[1], [0], [0], [1], [0, 0, 1, 1], [], []>} : vector<8x256xbf16>, vector<256x1024xbf16>, vector<8x1024xf32> -> vector<8x1024xf32>
    %c0_3 = arith.constant 0 : index
    %c0_4 = arith.constant 0 : index
    %3 = vector.load %arg3[%c0_3, %c0_4] : memref<1x1024xf32, #tpu.memory_space<vmem>>, vector<1x1024xf32>
    %4 = vector.broadcast %3 : vector<1x1024xf32> to vector<8x1024xf32>
    %5 = arith.addf %2, %4 : vector<8x1024xf32>
    %cst_5 = arith.constant 0.000000e+00 : f32
    %6 = vector.broadcast %cst_5 : f32 to vector<8x1024xf32>
    %7 = arith.maximumf %5, %6 : vector<8x1024xf32>
    %8 = arith.truncf %7 : vector<8x1024xf32> to vector<8x1024xbf16>
    %c0_6 = arith.constant 0 : index
    %c0_7 = arith.constant 0 : index
    %9 = vector.load %arg4[%c0_6, %c0_7] : memref<1024x512xbf16, #tpu.memory_space<vmem>>, vector<1024x512xbf16>
    %cst_8 = arith.constant dense<0.000000e+00> : vector<8x512xf32>
    %10 = tpu.matmul %8, %9, %cst_8 {dimension_numbers = #tpu.dot_dimension_numbers<[1], [0], [0], [1], [0, 0, 1, 1], [], []>} : vector<8x1024xbf16>, vector<1024x512xbf16>, vector<8x512xf32> -> vector<8x512xf32>
    %c0_9 = arith.constant 0 : index
    %c0_10 = arith.constant 0 : index
    %11 = vector.load %arg5[%c0_9, %c0_10] : memref<1x512xf32, #tpu.memory_space<vmem>>, vector<1x512xf32>
    %12 = vector.broadcast %11 : vector<1x512xf32> to vector<8x512xf32>
    %13 = arith.addf %10, %12 : vector<8x512xf32>
    %cst_11 = arith.constant 0.000000e+00 : f32
    %14 = vector.broadcast %cst_11 : f32 to vector<8x512xf32>
    %15 = arith.maximumf %13, %14 : vector<8x512xf32>
    %16 = arith.truncf %15 : vector<8x512xf32> to vector<8x512xbf16>
    %c0_12 = arith.constant 0 : index
    %c0_13 = arith.constant 0 : index
    %17 = vector.load %arg6[%c0_12, %c0_13] : memref<512x256xbf16, #tpu.memory_space<vmem>>, vector<512x256xbf16>
    %cst_14 = arith.constant dense<0.000000e+00> : vector<8x256xf32>
    %18 = tpu.matmul %16, %17, %cst_14 {dimension_numbers = #tpu.dot_dimension_numbers<[1], [0], [0], [1], [0, 0, 1, 1], [], []>} : vector<8x512xbf16>, vector<512x256xbf16>, vector<8x256xf32> -> vector<8x256xf32>
    %c0_15 = arith.constant 0 : index
    %c0_16 = arith.constant 0 : index
    %19 = vector.load %arg7[%c0_15, %c0_16] : memref<1x256xf32, #tpu.memory_space<vmem>>, vector<1x256xf32>
    %20 = vector.broadcast %19 : vector<1x256xf32> to vector<8x256xf32>
    %21 = arith.addf %18, %20 : vector<8x256xf32>
    %cst_17 = arith.constant 0.000000e+00 : f32
    %22 = vector.broadcast %cst_17 : f32 to vector<8x256xf32>
    %23 = arith.maximumf %21, %22 : vector<8x256xf32>
    %24 = arith.truncf %23 : vector<8x256xf32> to vector<8x256xbf16>
    %c0_18 = arith.constant 0 : index
    %c0_19 = arith.constant 0 : index
    %25 = vector.load %arg8[%c0_18, %c0_19] : memref<256x64xbf16, #tpu.memory_space<vmem>>, vector<256x64xbf16>
    %cst_20 = arith.constant dense<0.000000e+00> : vector<8x64xf32>
    %26 = tpu.matmul %24, %25, %cst_20 {dimension_numbers = #tpu.dot_dimension_numbers<[1], [0], [0], [1], [0, 0, 1, 1], [], []>} : vector<8x256xbf16>, vector<256x64xbf16>, vector<8x64xf32> -> vector<8x64xf32>
    %c0_21 = arith.constant 0 : index
    %c0_22 = arith.constant 0 : index
    %27 = vector.load %arg9[%c0_21, %c0_22] : memref<1x64xf32, #tpu.memory_space<vmem>>, vector<1x64xf32>
    %28 = vector.broadcast %27 : vector<1x64xf32> to vector<8x64xf32>
    %29 = arith.addf %26, %28 : vector<8x64xf32>
    %cst_23 = arith.constant 0.000000e+00 : f32
    %30 = vector.broadcast %cst_23 : f32 to vector<8x64xf32>
    %31 = arith.maximumf %29, %30 : vector<8x64xf32>
    %c0_24 = arith.constant 0 : index
    %c0_25 = arith.constant 0 : index
    %32 = vector.load %arg10[%c0_24, %c0_25] : memref<1x64xf32, #tpu.memory_space<vmem>>, vector<1x64xf32>
    %33 = vector.broadcast %32 : vector<1x64xf32> to vector<8x64xf32>
    %34 = arith.mulf %31, %33 : vector<8x64xf32>
    %cst_26 = arith.constant dense<0.000000e+00> : vector<8xf32>
    %35 = vector.multi_reduction <add>, %34, %cst_26 [1] : vector<8x64xf32> to vector<8xf32>
    %36 = vector.shape_cast %35 : vector<8xf32> to vector<8x1xf32>
    %c0_27 = arith.constant 0 : index
    %c0_28 = arith.constant 0 : index
    %37 = vector.load %arg11[%c0_27, %c0_28] : memref<1x1xf32, #tpu.memory_space<vmem>>, vector<1x1xf32>
    %38 = vector.broadcast %37 : vector<1x1xf32> to vector<8x1xf32>
    %39 = arith.addf %36, %38 : vector<8x1xf32>
    %cst_29 = arith.constant 0.000000e+00 : f32
    %40 = vector.broadcast %cst_29 : f32 to vector<8x1xf32>
    %41 = arith.subf %40, %39 : vector<8x1xf32>
    %42 = math.exp %41 : vector<8x1xf32>
    %cst_30 = arith.constant 1.000000e+00 : f32
    %43 = vector.broadcast %cst_30 : f32 to vector<8x1xf32>
    %44 = arith.addf %43, %42 : vector<8x1xf32>
    %45 = tpu.reciprocal %44 : vector<8x1xf32> -> vector<8x1xf32>
    %c0_31 = arith.constant 0 : index
    %c0_32 = arith.constant 0 : index
    %46 = vector.load %arg12[%c0_31, %c0_32] : memref<8x1xf32, #tpu.memory_space<vmem>>, vector<8x1xf32>
    tpu.vector_store %arg12[%c0_31, %c0_32], %45 {strides = array<i32>} : memref<8x1xf32, #tpu.memory_space<vmem>>, vector<8x1xf32>,
    return
  }
  func.func @transform_0(%arg0: i32) -> (i32, i32) {
    %c0_i32 = arith.constant 0 : i32
    %c0_i32_0 = arith.constant 0 : i32
    return %arg0, %c0_i32 : i32, i32
  }
  func.func @transform_1(%arg0: i32) -> (i32, i32) {
    %c0_i32 = arith.constant 0 : i32
    %c0_i32_0 = arith.constant 0 : i32
    %c0_i32_1 = arith.constant 0 : i32
    return %c0_i32, %c0_i32_0 : i32, i32
  }
  func.func @transform_2(%arg0: i32) -> (i32, i32) {
    %c0_i32 = arith.constant 0 : i32
    %c0_i32_0 = arith.constant 0 : i32
    %c0_i32_1 = arith.constant 0 : i32
    return %c0_i32, %c0_i32_0 : i32, i32
  }
  func.func @transform_3(%arg0: i32) -> (i32, i32) {
    %c0_i32 = arith.constant 0 : i32
    %c0_i32_0 = arith.constant 0 : i32
    %c0_i32_1 = arith.constant 0 : i32
    return %c0_i32, %c0_i32_0 : i32, i32
  }
  func.func @transform_4(%arg0: i32) -> (i32, i32) {
    %c0_i32 = arith.constant 0 : i32
    %c0_i32_0 = arith.constant 0 : i32
    %c0_i32_1 = arith.constant 0 : i32
    return %c0_i32, %c0_i32_0 : i32, i32
  }
  func.func @transform_5(%arg0: i32) -> (i32, i32) {
    %c0_i32 = arith.constant 0 : i32
    %c0_i32_0 = arith.constant 0 : i32
    %c0_i32_1 = arith.constant 0 : i32
    return %c0_i32, %c0_i32_0 : i32, i32
  }
  func.func @transform_6(%arg0: i32) -> (i32, i32) {
    %c0_i32 = arith.constant 0 : i32
    %c0_i32_0 = arith.constant 0 : i32
    %c0_i32_1 = arith.constant 0 : i32
    return %c0_i32, %c0_i32_0 : i32, i32
  }
  func.func @transform_7(%arg0: i32) -> (i32, i32) {
    %c0_i32 = arith.constant 0 : i32
    %c0_i32_0 = arith.constant 0 : i32
    %c0_i32_1 = arith.constant 0 : i32
    return %c0_i32, %c0_i32_0 : i32, i32
  }
  func.func @transform_8(%arg0: i32) -> (i32, i32) {
    %c0_i32 = arith.constant 0 : i32
    %c0_i32_0 = arith.constant 0 : i32
    %c0_i32_1 = arith.constant 0 : i32
    return %c0_i32, %c0_i32_0 : i32, i32
  }
  func.func @transform_9(%arg0: i32) -> (i32, i32) {
    %c0_i32 = arith.constant 0 : i32
    %c0_i32_0 = arith.constant 0 : i32
    %c0_i32_1 = arith.constant 0 : i32
    return %c0_i32, %c0_i32_0 : i32, i32
  }
  func.func @transform_10(%arg0: i32) -> (i32, i32) {
    %c0_i32 = arith.constant 0 : i32
    %c0_i32_0 = arith.constant 0 : i32
    %c0_i32_1 = arith.constant 0 : i32
    return %c0_i32, %c0_i32_0 : i32, i32
  }
  func.func @transform_11(%arg0: i32) -> (i32, i32) {
    %c0_i32 = arith.constant 0 : i32
    %c0_i32_0 = arith.constant 0 : i32
    return %arg0, %c0_i32 : i32, i32
  }
}

</mosaic_0001>

<bundles_post_ra>
// kernel: tpu_custom_call.1
= control target key start
LH: loop header
LB: loop body
LE: loop exit
PB: predicated region body
PF: predicated region fallthrough
CT: control target
= control target key end

     0   :  { %s6464_s0 = inlined_call_operand.vmem [shape: bf16[8,256], index: 0, kind: input, shape index: {}]   ;;  %s6465_s1 = inlined_call_operand.hbm [shape: bf16[256,1024], index: 1, kind: input, shape index: {}]   ;;  %s6466_s2 = inlined_call_operand.vmem [shape: f32[1,1024], index: 2, kind: input, shape index: {}]   ;;  %s6467_s3 = inlined_call_operand.hbm [shape: bf16[1024,512], index: 3, kind: input, shape index: {}]   ;;  %s6468_s4 = inlined_call_operand.vmem [shape: f32[1,512], index: 4, kind: input, shape index: {}]   ;;  %s6469_s5 = inlined_call_operand.hbm [shape: bf16[512,256], index: 5, kind: input, shape index: {}]   ;;  %s6470_s6 = inlined_call_operand.vmem [shape: f32[1,256], index: 6, kind: input, shape index: {}]   ;;  %s6471_s7 = inlined_call_operand.vmem [shape: bf16[256,64], index: 7, kind: input, shape index: {}]   ;;  %s6472_s8 = inlined_call_operand.vmem [shape: f32[1,64], index: 8, kind: input, shape index: {}]   ;;  %s6473_s9 = inlined_call_operand.vmem [shape: f32[1,64], index: 9, kind: input, shape index: {}]   ;;  %s6474_s10 = inlined_call_operand.<no memory space> [shape: f32[1,1], index: 10, kind: input, shape index: {}]   ;;  %s6475_s11 = inlined_call_operand.vmem [shape: f32[8,1], index: 11, kind: output, shape index: {}]  }
   0x1   :  { %v16_v0 = vstv %s6474_s10 }
   0x2   :  { %17 = vst [vmem:[#allocation2] sm:$0x1] %v16_v0 }
   0x3   :  { %18 = vsyncpa [#allocation4], 0 }
   0x4   :  { %19 = vsyncpa [#allocation6], 0  ;;  %s41_s21 = sshll.u32 %s6467_s3, 4  ;;  %s6185_s22 = smov [#allocation5]   ;;  %s42_s21 = int_to_ptr.hbm [resolvable:$true] %s41_s21 }
   0x5   :  { %s43_s23 = sshll.u32 %s6185_s22, 4  ;;  %s26_s26 = sshll.u32 %s6465_s1, 4  ;;  %s44_s23 = int_to_ptr.vmem [resolvable:$true] %s43_s23  ;;  %s27_s26 = int_to_ptr.hbm [resolvable:$true] %s26_s26 }
   0x6   :  { %s6186_s27 = smov 256   ;;  %s6187_s28 = smov 16  }
   0x7   :  { %49 = dma.hbm_to_vmem [thread:$0]  %s42_s21, 32768, %s44_s23, [#allocation6], %s6186_s27, %s6186_s27, %s6187_s28  }
   0x8   :  { %s6188_s10 = smov [#allocation3]   ;;  %s6189_s30 = smov 512  }
   0x9   :  { %s28_s29 = sshll.u32 %s6188_s10, 4  ;;  %s6190_s12 = smov 32   ;;  %s29_s29 = int_to_ptr.vmem [resolvable:$true] %s28_s29 }
   0xa   :  { %34 = dma.hbm_to_vmem [thread:$0]  %s27_s26, 16384, %s29_s29, [#allocation4], %s6189_s30, %s6189_s30, %s6190_s12  }
   0xb   :  { %s56_s14 = sshll.u32 %s6469_s5, 4  ;;  %s6191_s15 = smov [#allocation7]   ;;  %s57_s14 = int_to_ptr.hbm [resolvable:$true] %s56_s14 }
   0xc   :  { %s58_s16 = sshll.u32 %s6191_s15, 4  ;;  %s6192_s17 = smov 128   ;;  %s59_s16 = int_to_ptr.vmem [resolvable:$true] %s58_s16 }
   0xd   :  { %s6193_s1 = smov 8  }
   0xe   :  { %64 = dma.hbm_to_vmem [thread:$0]  %s57_s14, 8192, %s59_s16, [#allocation6], %s6192_s17, %s6192_s17, %s6193_s1  }
   0xf   :  { %6181 = dma.done.wait [#allocation4], 16384  }
  0x10   :  { %6182 = vsyncadd [#allocation4], 4294950912 }
  0x11   :  { %6183 = dma.done.wait [#allocation6], 40960  }
  0x12   :  { %6184 = vsyncadd [#allocation6], 4294926336  ;;  %v3998_v1 = vld [vmem:[#allocation3 + $0x1c0] sm:$0xf]  ;;  %v5684_v6 = vld [vmem:[#allocation3 + $0x1c4] sm:$0xf] }
  0x13   :  { %v5688_v2 = vld [vmem:[#allocation3 + $0x1dc] sm:$0xf0]  ;;  %v4000_v7 = vld [vmem:[#allocation3 + $0x1e0] sm:$0xf0]  ;;  %vm3737_vm0 = vcmask 523264   ;;  %vm3764_vm4 = vcmask 7168  }
  0x14   :  { %v4254_v3 = vld [vmem:[#allocation3 + $0x3c0] sm:$0xf]  ;;  %v3999_v4 = vor.u32 %v5688_v2, %v3998_v1  ;;  %v4003_v9 = vor.u32 %v5684_v6, %v4000_v7  ;;  %v5748_v10 = vld [vmem:[#allocation3 + $0x3c4] sm:$0xf] }
  0x15   :  { %v5752_v5 = vld [vmem:[#allocation3 + $0x3dc] sm:$0xf0]  ;;  %v4256_v11 = vld [vmem:[#allocation3 + $0x3e0] sm:$0xf0] }
  0x16   :  { %v4255_v8 = vor.u32 %v5752_v5, %v4254_v3  ;;  %v3966_v12 = vld [vmem:[#allocation3 + $0x180] sm:$0xf]  ;;  %881 = vmatpush.bf16.msra.mxu0 %v3999_v4  ;;  %v4259_v13 = vor.u32 %v5748_v10, %v4256_v11  ;;  %907 = vmatpush.bf16.msra.mxu2 %v4003_v9  ;;  %v5676_v19 = vld [vmem:[#allocation3 + $0x184] sm:$0xf] }
  0x17   :  { %v5680_v14 = vld [vmem:[#allocation3 + $0x19c] sm:$0xf0]  ;;  %v3968_v20 = vld [vmem:[#allocation3 + $0x1a0] sm:$0xf0] }
  0x18   :  { %v4222_v15 = vld [vmem:[#allocation3 + $0x380] sm:$0xf]  ;;  %894 = vmatpush.bf16.msra.mxu1 %v4255_v8  ;;  %v3967_v17 = vor.u32 %v5680_v14, %v3966_v12  ;;  %v5740_v21 = vld [vmem:[#allocation3 + $0x384] sm:$0xf]  ;;  %920 = vmatpush.bf16.msra.mxu3 %v4259_v13  ;;  %v3971_v22 = vor.u32 %v5676_v19, %v3968_v20 }
  0x19   :  { %v5744_v16 = vld [vmem:[#allocation3 + $0x39c] sm:$0xf0]  ;;  %v4224_v23 = vld [vmem:[#allocation3 + $0x3a0] sm:$0xf0] }
  0x1a   :  { %v4223_v18 = vor.u32 %v5744_v16, %v4222_v15  ;;  %v3934_v24 = vld [vmem:[#allocation3 + $0x140] sm:$0xf]  ;;  %v4227_v26 = vor.u32 %v5740_v21, %v4224_v23  ;;  %v5668_v29 = vld [vmem:[#allocation3 + $0x144] sm:$0xf]  ;;  %882 = vmatpush.bf16.msra.mxu0 %v3967_v17  ;;  %908 = vmatpush.bf16.msra.mxu2 %v3971_v22 }
  0x1b   :  { %v5672_v25 = vld [vmem:[#allocation3 + $0x15c] sm:$0xf0]  ;;  %v3936_v31 = vld [vmem:[#allocation3 + $0x160] sm:$0xf0] }
  0x1c   :  { %v4190_v27 = vld [vmem:[#allocation3 + $0x340] sm:$0xf]  ;;  %v3935_v30 = vor.u32 %v5672_v25, %v3934_v24  ;;  %v5732_v32 = vld [vmem:[#allocation3 + $0x344] sm:$0xf]  ;;  %895 = vmatpush.bf16.msra.mxu1 %v4223_v18  ;;  %v3939_v35 = vor.u32 %v5668_v29, %v3936_v31  ;;  %921 = vmatpush.bf16.msra.mxu3 %v4227_v26  ;;  %v4006_v29 = vld [vmem:[#allocation3 + $0x1c8] sm:$0xf] }
  0x1d   :  { %v5736_v28 = vld [vmem:[#allocation3 + $0x35c] sm:$0xf0]  ;;  %v4192_v33 = vld [vmem:[#allocation3 + $0x360] sm:$0xf0]  ;;  %v4262_v31 = vld [vmem:[#allocation3 + $0x3c8] sm:$0xf] }
  0x1e   :  { %v4191_v34 = vor.u32 %v5736_v28, %v4190_v27  ;;  %v3902_v36 = vld [vmem:[#allocation3 + $0x100] sm:$0xf]  ;;  %v4195_v39 = vor.u32 %v5732_v32, %v4192_v33  ;;  %v5660_v41 = vld [vmem:[#allocation3 + $0x104] sm:$0xf]  ;;  %883 = vmatpush.bf16.msra.mxu0 %v3935_v30  ;;  %909 = vmatpush.bf16.msra.mxu2 %v3939_v35  ;;  %v5689_v30 = vld [vmem:[#allocation3 + $0x1e4] sm:$0xf0] }
  0x1f   :  { %v5664_v37 = vld [vmem:[#allocation3 + $0x11c] sm:$0xf0]  ;;  %v3904_v42 = vld [vmem:[#allocation3 + $0x120] sm:$0xf0]  ;;  %v5753_v33 = vld [vmem:[#allocation3 + $0x3e4] sm:$0xf0] }
  0x20   :  { %v4158_v38 = vld [vmem:[#allocation3 + $0x300] sm:$0xf]  ;;  %v5724_v43 = vld [vmem:[#allocation3 + $0x304] sm:$0xf]  ;;  %v3903_v45 = vor.u32 %v5664_v37, %v3902_v36  ;;  %896 = vmatpush.bf16.msra.mxu1 %v4191_v34  ;;  %v3907_v47 = vor.u32 %v5660_v41, %v3904_v42  ;;  %922 = vmatpush.bf16.msra.mxu3 %v4195_v39  ;;  %v5685_v34 = vld [vmem:[#allocation3 + $0x1cc] sm:$0xf]  ;;  %v4007_v41 = vor.u32 %v5689_v30, %v4006_v29 }
  0x21   :  { %v5728_v40 = vld [vmem:[#allocation3 + $0x31c] sm:$0xf0]  ;;  %v4160_v44 = vld [vmem:[#allocation3 + $0x320] sm:$0xf0]  ;;  %v4008_v35 = vld [vmem:[#allocation3 + $0x1e8] sm:$0xf0]  ;;  %v4263_v42 = vor.u32 %v5753_v33, %v4262_v31 }
  0x22   :  { %v4159_v46 = vor.u32 %v5728_v40, %v4158_v38  ;;  %v3870_v48 = vld [vmem:[#allocation3 + $0xc0] sm:$0xf]  ;;  %v4163_v51 = vor.u32 %v5724_v43, %v4160_v44  ;;  %v5652_v53 = vld [vmem:[#allocation3 + $0xc4] sm:$0xf]  ;;  %884 = vmatpush.bf16.msra.mxu0 %v3903_v45  ;;  %910 = vmatpush.bf16.msra.mxu2 %v3907_v47  ;;  %v5749_v38 = vld [vmem:[#allocation3 + $0x3cc] sm:$0xf]  ;;  %v4011_v43 = vor.u32 %v5685_v34, %v4008_v35 }
  0x23   :  { %v5656_v49 = vld [vmem:[#allocation3 + $0xdc] sm:$0xf0]  ;;  %v3872_v54 = vld [vmem:[#allocation3 + $0xe0] sm:$0xf0]  ;;  %v4264_v39 = vld [vmem:[#allocation3 + $0x3e8] sm:$0xf0] }
  0x24   :  { %v4126_v50 = vld [vmem:[#allocation3 + $0x2c0] sm:$0xf]  ;;  %v5716_v55 = vld [vmem:[#allocation3 + $0x2c4] sm:$0xf]  ;;  %v3871_v57 = vor.u32 %v5656_v49, %v3870_v48  ;;  %897 = vmatpush.bf16.msra.mxu1 %v4159_v46  ;;  %v3875_v59 = vor.u32 %v5652_v53, %v3872_v54  ;;  %923 = vmatpush.bf16.msra.mxu3 %v4163_v51  ;;  %v3974_v44 = vld [vmem:[#allocation3 + $0x188] sm:$0xf]  ;;  %v4267_v47 = vor.u32 %v5749_v38, %v4264_v39 }
  0x25   :  { %v5720_v52 = vld [vmem:[#allocation3 + $0x2dc] sm:$0xf0]  ;;  %v4128_v56 = vld [vmem:[#allocation3 + $0x2e0] sm:$0xf0]  ;;  %v5681_v45 = vld [vmem:[#allocation3 + $0x1a4] sm:$0xf0] }
  0x26   :  { %v4127_v58 = vor.u32 %v5720_v52, %v4126_v50  ;;  %v3838_v60 = vld [vmem:[#allocation3 + $0x80] sm:$0xf]  ;;  %v4131_v63 = vor.u32 %v5716_v55, %v4128_v56  ;;  %v5644_v1 = vld [vmem:[#allocation3 + $0x84] sm:$0xf]  ;;  %885 = vmatpush.bf16.msra.mxu0 %v3871_v57  ;;  %911 = vmatpush.bf16.msra.mxu2 %v3875_v59  ;;  %v4230_v46 = vld [vmem:[#allocation3 + $0x388] sm:$0xf]  ;;  %v3975_v54 = vor.u32 %v5681_v45, %v3974_v44 }
  0x27   :  { %v5648_v61 = vld [vmem:[#allocation3 + $0x9c] sm:$0xf0]  ;;  %v3840_v2 = vld [vmem:[#allocation3 + $0xa0] sm:$0xf0]  ;;  %v5745_v48 = vld [vmem:[#allocation3 + $0x3a4] sm:$0xf0] }
  0x28   :  { %v4094_v62 = vld [vmem:[#allocation3 + $0x280] sm:$0xf]  ;;  %v5708_v3 = vld [vmem:[#allocation3 + $0x284] sm:$0xf]  ;;  %v3839_v5 = vor.u32 %v5648_v61, %v3838_v60  ;;  %898 = vmatpush.bf16.msra.mxu1 %v4127_v58  ;;  %v3843_v7 = vor.u32 %v5644_v1, %v3840_v2  ;;  %924 = vmatpush.bf16.msra.mxu3 %v4131_v63  ;;  %v5677_v49 = vld [vmem:[#allocation3 + $0x18c] sm:$0xf]  ;;  %v4231_v57 = vor.u32 %v5745_v48, %v4230_v46 }
  0x29   :  { %v5712_v0 = vld [vmem:[#allocation3 + $0x29c] sm:$0xf0]  ;;  %v4096_v4 = vld [vmem:[#allocation3 + $0x2a0] sm:$0xf0]  ;;  %v3976_v50 = vld [vmem:[#allocation3 + $0x1a8] sm:$0xf0] }
  0x2a   :  { %v4095_v6 = vor.u32 %v5712_v0, %v4094_v62  ;;  %v3806_v8 = vld [vmem:[#allocation3 + $0x40] sm:$0xf]  ;;  %v4099_v11 = vor.u32 %v5708_v3, %v4096_v4  ;;  %v5636_v13 = vld [vmem:[#allocation3 + $0x44] sm:$0xf]  ;;  %886 = vmatpush.bf16.msra.mxu0 %v3839_v5  ;;  %912 = vmatpush.bf16.msra.mxu2 %v3843_v7  ;;  %v5741_v51 = vld [vmem:[#allocation3 + $0x38c] sm:$0xf]  ;;  %v3979_v58 = vor.u32 %v5677_v49, %v3976_v50 }
  0x2b   :  { %v5640_v9 = vld [vmem:[#allocation3 + $0x5c] sm:$0xf0]  ;;  %v3808_v14 = vld [vmem:[#allocation3 + $0x60] sm:$0xf0]  ;;  %v4232_v52 = vld [vmem:[#allocation3 + $0x3a8] sm:$0xf0] }
  0x2c   :  { %v4062_v10 = vld [vmem:[#allocation3 + $0x240] sm:$0xf]  ;;  %v5700_v15 = vld [vmem:[#allocation3 + $0x244] sm:$0xf]  ;;  %v3807_v17 = vor.u32 %v5640_v9, %v3806_v8  ;;  %899 = vmatpush.bf16.msra.mxu1 %v4095_v6  ;;  %v3811_v21 = vor.u32 %v5636_v13, %v3808_v14  ;;  %925 = vmatpush.bf16.msra.mxu3 %v4099_v11  ;;  %v3942_v59 = vld [vmem:[#allocation3 + $0x148] sm:$0xf]  ;;  %v4235_v62 = vor.u32 %v5741_v51, %v4232_v52 }
  0x2d   :  { %v5704_v12 = vld [vmem:[#allocation3 + $0x25c] sm:$0xf0]  ;;  %v4064_v16 = vld [vmem:[#allocation3 + $0x260] sm:$0xf0]  ;;  %v5673_v60 = vld [vmem:[#allocation3 + $0x164] sm:$0xf0] }
  0x2e   :  { %v3774_v18 = vld [vmem:[#allocation3] sm:$0xf]  ;;  %v4063_v20 = vor.u32 %v5704_v12, %v4062_v10  ;;  %v5628_v24 = vld [vmem:[#allocation3 + $0x4] sm:$0xf]  ;;  %v4067_v25 = vor.u32 %v5700_v15, %v4064_v16  ;;  %887 = vmatpush.bf16.msra.mxu0 %v3807_v17  ;;  %913 = vmatpush.bf16.msra.mxu2 %v3811_v21  ;;  %v4198_v61 = vld [vmem:[#allocation3 + $0x348] sm:$0xf]  ;;  %v3943_v6 = vor.u32 %v5673_v60, %v3942_v59 }
  0x2f   :  { %v5632_v19 = vld [vmem:[#allocation3 + $0x1c] sm:$0xf0]  ;;  %v3776_v26 = vld [vmem:[#allocation3 + $0x20] sm:$0xf0]  ;;  %v5737_v63 = vld [vmem:[#allocation3 + $0x364] sm:$0xf0] }
  0x30   :  { %v4030_v22 = vld [vmem:[#allocation3 + $0x200] sm:$0xf]  ;;  %v5692_v27 = vld [vmem:[#allocation3 + $0x204] sm:$0xf]  ;;  %v3775_v32 = vor.u32 %v5632_v19, %v3774_v18  ;;  %900 = vmatpush.bf16.msra.mxu1 %v4063_v20  ;;  %v3779_v37 = vor.u32 %v5628_v24, %v3776_v26  ;;  %926 = vmatpush.bf16.msra.mxu3 %v4067_v25  ;;  %v5669_v0 = vld [vmem:[#allocation3 + $0x14c] sm:$0xf]  ;;  %v4199_v7 = vor.u32 %v5737_v63, %v4198_v61 }
  0x31   :  { %v5696_v23 = vld [vmem:[#allocation3 + $0x21c] sm:$0xf0]  ;;  %v4032_v28 = vld [vmem:[#allocation3 + $0x220] sm:$0xf0]  ;;  %v3944_v1 = vld [vmem:[#allocation3 + $0x168] sm:$0xf0] }
  0x32   :  { %v4031_v36 = vor.u32 %v5696_v23, %v4030_v22  ;;  %v4035_v40 = vor.u32 %v5692_v27, %v4032_v28  ;;  %888 = vmatpush.bf16.msra.mxu0 %v3775_v32  ;;  %914 = vmatpush.bf16.msra.mxu2 %v3779_v37  ;;  %v87_v53 = vld [vmem:[%s6464_s0] sm:$0xff]  ;;  %v5733_v3 = vld [vmem:[#allocation3 + $0x34c] sm:$0xf]  ;;  %v3947_v8 = vor.u32 %v5669_v0, %v3944_v1  ;;  %v3910_v9 = vld [vmem:[#allocation3 + $0x108] sm:$0xf] }
  0x33   :  { %v235_v55 = vunpack.c.l.b16 %v87_v53  ;;  %v236_v56 = vunpack.c.h.b16 %v87_v53  ;;  %v4200_v4 = vld [vmem:[#allocation3 + $0x368] sm:$0xf0]  ;;  %v5665_v10 = vld [vmem:[#allocation3 + $0x124] sm:$0xf0] }
  0x34   :  { %901 = vmatpush.bf16.msra.mxu1 %v4031_v36  ;;  %927 = vmatpush.bf16.msra.mxu3 %v4035_v40  ;;  %v4166_v11 = vld [vmem:[#allocation3 + $0x308] sm:$0xf]  ;;  %v4203_v12 = vor.u32 %v5733_v3, %v4200_v4  ;;  %v5661_v14 = vld [vmem:[#allocation3 + $0x10c] sm:$0xf]  ;;  %v3911_v18 = vor.u32 %v5665_v10, %v3910_v9  ;;  %v4014_v3 = vld [vmem:[#allocation3 + $0x1d0] sm:$0xf] }
  0x35   :  { %v6269_v2 = vpack.c.b16 %v235_v55, %v235_v55  ;;  %v6271_v5 = vpack.c.b16 %v236_v56, %v236_v56  ;;  %v5729_v13 = vld [vmem:[#allocation3 + $0x324] sm:$0xf0]  ;;  %v3912_v15 = vld [vmem:[#allocation3 + $0x128] sm:$0xf0]  ;;  %v5690_v4 = vld [vmem:[#allocation3 + $0x1ec] sm:$0xf0] }
  0x36   :  { %933 = vmatpush.bf16.msrb.mxu0 %v4007_v41  ;;  %959 = vmatpush.bf16.msrb.mxu2 %v4011_v43  ;;  %v5725_v16 = vld [vmem:[#allocation3 + $0x30c] sm:$0xf]  ;;  %v4167_v19 = vor.u32 %v5729_v13, %v4166_v11  ;;  %v3915_v20 = vor.u32 %v5661_v14, %v3912_v15  ;;  %v3878_v21 = vld [vmem:[#allocation3 + $0xc8] sm:$0xf]  ;;  %v5686_v9 = vld [vmem:[#allocation3 + $0x1d4] sm:$0xf] }
  0x37   :  { %915 = vmatmul.bf16.vlgmr.msra.gmra.mxu2 %v6269_v2  ;;  %889 = vmatmul.bf16.vlgmr.msra.gmra.mxu0 %v6269_v2  ;;  %v4168_v17 = vld [vmem:[#allocation3 + $0x328] sm:$0xf0]  ;;  %v5657_v22 = vld [vmem:[#allocation3 + $0xe4] sm:$0xf0]  ;;  %v4016_v10 = vld [vmem:[#allocation3 + $0x1f0] sm:$0xf0] }
  0x38   :  { %946 = vmatpush.bf16.msrb.mxu1 %v4263_v42  ;;  %972 = vmatpush.bf16.msrb.mxu3 %v4267_v47  ;;  %v4134_v23 = vld [vmem:[#allocation3 + $0x2c8] sm:$0xf]  ;;  %v4171_v24 = vor.u32 %v5725_v16, %v4168_v17  ;;  %v5653_v26 = vld [vmem:[#allocation3 + $0xcc] sm:$0xf]  ;;  %v3879_v30 = vor.u32 %v5657_v22, %v3878_v21  ;;  %v5750_v13 = vld [vmem:[#allocation3 + $0x3d4] sm:$0xf]  ;;  %v4015_v16 = vor.u32 %v5690_v4, %v4014_v3 }
  0x39   :  { %902 = vmatmul.bf16.vlgmr.msra.gmra.mxu1 %v6271_v5  ;;  %928 = vmatmul.bf16.vlgmr.msra.gmra.mxu3 %v6271_v5  ;;  %v5721_v25 = vld [vmem:[#allocation3 + $0x2e4] sm:$0xf0]  ;;  %v3880_v27 = vld [vmem:[#allocation3 + $0xe8] sm:$0xf0]  ;;  %v4272_v14 = vld [vmem:[#allocation3 + $0x3f0] sm:$0xf0] }
  0x3a   :  { %934 = vmatpush.bf16.msrb.mxu0 %v3975_v54  ;;  %960 = vmatpush.bf16.msrb.mxu2 %v3979_v58  ;;  %v5717_v28 = vld [vmem:[#allocation3 + $0x2cc] sm:$0xf]  ;;  %v4135_v31 = vor.u32 %v5721_v25, %v4134_v23  ;;  %v3883_v32 = vor.u32 %v5653_v26, %v3880_v27  ;;  %v3846_v33 = vld [vmem:[#allocation3 + $0x88] sm:$0xf]  ;;  %v4238_v21 = vld [vmem:[#allocation3 + $0x390] sm:$0xf]  ;;  %v4275_v22 = vor.u32 %v5750_v13, %v4272_v14 }
  0x3b   :  { %v4136_v29 = vld [vmem:[#allocation3 + $0x2e8] sm:$0xf0]  ;;  %v5649_v34 = vld [vmem:[#allocation3 + $0xa4] sm:$0xf0]  ;;  %v5746_v23 = vld [vmem:[#allocation3 + $0x3ac] sm:$0xf0] }
  0x3c   :  { %947 = vmatpush.bf16.msrb.mxu1 %v4231_v57  ;;  %973 = vmatpush.bf16.msrb.mxu3 %v4235_v62  ;;  %v4102_v35 = vld [vmem:[#allocation3 + $0x288] sm:$0xf]  ;;  %v4139_v36 = vor.u32 %v5717_v28, %v4136_v29  ;;  %v5645_v38 = vld [vmem:[#allocation3 + $0x8c] sm:$0xf]  ;;  %v3847_v42 = vor.u32 %v5649_v34, %v3846_v33  ;;  %v3984_v25 = vld [vmem:[#allocation3 + $0x1b0] sm:$0xf0]  ;;  %v4239_v29 = vor.u32 %v5746_v23, %v4238_v21 }
  0x3d   :  { %v5713_v37 = vld [vmem:[#allocation3 + $0x2a4] sm:$0xf0]  ;;  %v3848_v39 = vld [vmem:[#allocation3 + $0xa8] sm:$0xf0]  ;;  %v5742_v26 = vld [vmem:[#allocation3 + $0x394] sm:$0xf] }
  0x3e   :  { %935 = vmatpush.bf16.msrb.mxu0 %v3943_v6  ;;  %961 = vmatpush.bf16.msrb.mxu2 %v3947_v8  ;;  %v5709_v40 = vld [vmem:[#allocation3 + $0x28c] sm:$0xf]  ;;  %v4103_v43 = vor.u32 %v5713_v37, %v4102_v35  ;;  %v3851_v44 = vor.u32 %v5645_v38, %v3848_v39  ;;  %v3814_v45 = vld [vmem:[#allocation3 + $0x48] sm:$0xf]  ;;  %v4270_v6 = vld [vmem:[#allocation3 + $0x3d0] sm:$0xf] }
  0x3f   :  { %v4104_v41 = vld [vmem:[#allocation3 + $0x2a8] sm:$0xf0]  ;;  %v5641_v46 = vld [vmem:[#allocation3 + $0x64] sm:$0xf0]  ;;  %v5754_v8 = vld [vmem:[#allocation3 + $0x3ec] sm:$0xf0] }
  0x40   :  { %948 = vmatpush.bf16.msrb.mxu1 %v4199_v7  ;;  %974 = vmatpush.bf16.msrb.mxu3 %v4203_v12  ;;  %v4070_v47 = vld [vmem:[#allocation3 + $0x248] sm:$0xf]  ;;  %v4107_v48 = vor.u32 %v5709_v40, %v4104_v41  ;;  %v5637_v50 = vld [vmem:[#allocation3 + $0x4c] sm:$0xf]  ;;  %v3815_v54 = vor.u32 %v5641_v46, %v3814_v45  ;;  %v4271_v17 = vor.u32 %v5754_v8, %v4270_v6  ;;  %v4240_v27 = vld [vmem:[#allocation3 + $0x3b0] sm:$0xf0] }
  0x41   :  { %v5705_v49 = vld [vmem:[#allocation3 + $0x264] sm:$0xf0]  ;;  %v3816_v51 = vld [vmem:[#allocation3 + $0x68] sm:$0xf0]  ;;  %v4206_v33 = vld [vmem:[#allocation3 + $0x350] sm:$0xf]  ;;  %v4243_v34 = vor.u32 %v5742_v26, %v4240_v27 }
  0x42   :  { %936 = vmatpush.bf16.msrb.mxu0 %v3911_v18  ;;  %962 = vmatpush.bf16.msrb.mxu2 %v3915_v20  ;;  %v5701_v52 = vld [vmem:[#allocation3 + $0x24c] sm:$0xf]  ;;  %v3782_v55 = vld [vmem:[#allocation3 + $0x8] sm:$0xf]  ;;  %v4071_v57 = vor.u32 %v5705_v49, %v4070_v47  ;;  %v3819_v58 = vor.u32 %v5637_v50, %v3816_v51  ;;  %v4019_v18 = vor.u32 %v5686_v9, %v4016_v10  ;;  %v5682_v20 = vld [vmem:[#allocation3 + $0x1ac] sm:$0xf0] }
  0x43   :  { %v4072_v53 = vld [vmem:[#allocation3 + $0x268] sm:$0xf0]  ;;  %v5633_v56 = vld [vmem:[#allocation3 + $0x24] sm:$0xf0]  ;;  %v5738_v35 = vld [vmem:[#allocation3 + $0x36c] sm:$0xf0] }
  0x44   :  { %949 = vmatpush.bf16.msrb.mxu1 %v4167_v19  ;;  %975 = vmatpush.bf16.msrb.mxu3 %v4171_v24  ;;  %v4038_v59 = vld [vmem:[#allocation3 + $0x208] sm:$0xf]  ;;  %v5629_v61 = vld [vmem:[#allocation3 + $0xc] sm:$0xf]  ;;  %v4075_v62 = vor.u32 %v5701_v52, %v4072_v53  ;;  %v3783_v7 = vor.u32 %v5633_v56, %v3782_v55  ;;  %v3982_v19 = vld [vmem:[#allocation3 + $0x190] sm:$0xf]  ;;  %v4207_v41 = vor.u32 %v5738_v35, %v4206_v33 }
  0x45   :  { %v5697_v60 = vld [vmem:[#allocation3 + $0x224] sm:$0xf0]  ;;  %v3784_v63 = vld [vmem:[#allocation3 + $0x28] sm:$0xf0]  ;;  %v5678_v24 = vld [vmem:[#allocation3 + $0x194] sm:$0xf]  ;;  %v3983_v28 = vor.u32 %v5682_v20, %v3982_v19 }
  0x46   :  { %937 = vmatpush.bf16.msrb.mxu0 %v3879_v30  ;;  %963 = vmatpush.bf16.msrb.mxu2 %v3883_v32  ;;  %v5693_v0 = vld [vmem:[#allocation3 + $0x20c] sm:$0xf]  ;;  %v4039_v11 = vor.u32 %v5697_v60, %v4038_v59  ;;  %v3787_v12 = vor.u32 %v5629_v61, %v3784_v63  ;;  %v3987_v30 = vor.u32 %v5678_v24, %v3984_v25  ;;  %v5674_v32 = vld [vmem:[#allocation3 + $0x16c] sm:$0xf0]  ;;  %v3952_v37 = vld [vmem:[#allocation3 + $0x170] sm:$0xf0] }
  0x47   :  { %v4040_v1 = vld [vmem:[#allocation3 + $0x228] sm:$0xf0]  ;;  %v5734_v38 = vld [vmem:[#allocation3 + $0x354] sm:$0xf]  ;;  %v4174_v45 = vld [vmem:[#allocation3 + $0x310] sm:$0xf] }
  0x48   :  { %950 = vmatpush.bf16.msrb.mxu1 %v4135_v31  ;;  %976 = vmatpush.bf16.msrb.mxu3 %v4139_v36  ;;  %v4043_v15 = vor.u32 %v5693_v0, %v4040_v1  ;;  %v3950_v31 = vld [vmem:[#allocation3 + $0x150] sm:$0xf]  ;;  %v5670_v36 = vld [vmem:[#allocation3 + $0x154] sm:$0xf] }
  0x49   :  { %v4208_v39 = vld [vmem:[#allocation3 + $0x370] sm:$0xf0]  ;;  %v3951_v40 = vor.u32 %v5674_v32, %v3950_v31  ;;  %v5730_v47 = vld [vmem:[#allocation3 + $0x32c] sm:$0xf0] }
  0x4a   :  { %938 = vmatpush.bf16.msrb.mxu0 %v3847_v42  ;;  %964 = vmatpush.bf16.msrb.mxu2 %v3851_v44  ;;  %v3955_v42 = vor.u32 %v5670_v36, %v3952_v37  ;;  %v5666_v44 = vld [vmem:[#allocation3 + $0x12c] sm:$0xf0]  ;;  %v4211_v46 = vor.u32 %v5734_v38, %v4208_v39  ;;  %v3920_v49 = vld [vmem:[#allocation3 + $0x130] sm:$0xf0]  ;;  %v4175_v53 = vor.u32 %v5730_v47, %v4174_v45  ;;  %v4022_v38 = vld [vmem:[#allocation3 + $0x1d8] sm:$0xf] }
  0x4b   :  { %v5726_v50 = vld [vmem:[#allocation3 + $0x314] sm:$0xf]  ;;  %v3886_v55 = vld [vmem:[#allocation3 + $0xd0] sm:$0xf]  ;;  %v5691_v39 = vld [vmem:[#allocation3 + $0x1f4] sm:$0xf0] }
  0x4c   :  { %951 = vmatpush.bf16.msrb.mxu1 %v4103_v43  ;;  %977 = vmatpush.bf16.msrb.mxu3 %v4107_v48  ;;  %v3918_v43 = vld [vmem:[#allocation3 + $0x110] sm:$0xf]  ;;  %v5662_v48 = vld [vmem:[#allocation3 + $0x114] sm:$0xf]  ;;  %v5751_v47 = vld [vmem:[#allocation3 + $0x3dc] sm:$0xf] }
  0x4d   :  { %v4176_v51 = vld [vmem:[#allocation3 + $0x330] sm:$0xf0]  ;;  %v3919_v52 = vor.u32 %v5666_v44, %v3918_v43  ;;  %v5658_v56 = vld [vmem:[#allocation3 + $0xec] sm:$0xf0]  ;;  %v5687_v43 = vld [vmem:[#allocation3 + $0x1dc] sm:$0xf] }
  0x4e   :  { %939 = vmatpush.bf16.msrb.mxu0 %v3815_v54  ;;  %965 = vmatpush.bf16.msrb.mxu2 %v3819_v58  ;;  %v3923_v54 = vor.u32 %v5662_v48, %v3920_v49  ;;  %v4179_v58 = vor.u32 %v5726_v50, %v4176_v51  ;;  %v5722_v59 = vld [vmem:[#allocation3 + $0x2ec] sm:$0xf0]  ;;  %v5654_v60 = vld [vmem:[#allocation3 + $0xd4] sm:$0xf]  ;;  %v3887_v0 = vor.u32 %v5658_v56, %v3886_v55  ;;  %v4024_v44 = vld [vmem:[#allocation3 + $0x1f8] sm:$0xf0] }
  0x4f   :  { %v3888_v61 = vld [vmem:[#allocation3 + $0xf0] sm:$0xf0]  ;;  %v3854_v1 = vld [vmem:[#allocation3 + $0x90] sm:$0xf]  ;;  %v4280_v48 = vld [vmem:[#allocation3 + $0x3f8] sm:$0xf0]  ;;  %v4023_v50 = vor.u32 %v5691_v39, %v4022_v38 }
  0x50   :  { %952 = vmatpush.bf16.msrb.mxu1 %v4071_v57  ;;  %978 = vmatpush.bf16.msrb.mxu3 %v4075_v62  ;;  %v4142_v57 = vld [vmem:[#allocation3 + $0x2d0] sm:$0xf]  ;;  %v5718_v62 = vld [vmem:[#allocation3 + $0x2d4] sm:$0xf]  ;;  %v3891_v4 = vor.u32 %v5654_v60, %v3888_v61  ;;  %v4246_v55 = vld [vmem:[#allocation3 + $0x398] sm:$0xf]  ;;  %v4283_v56 = vor.u32 %v5751_v47, %v4280_v48 }
  0x51   :  { %v4144_v63 = vld [vmem:[#allocation3 + $0x2f0] sm:$0xf0]  ;;  %v4143_v3 = vor.u32 %v5722_v59, %v4142_v57  ;;  %v5650_v6 = vld [vmem:[#allocation3 + $0xac] sm:$0xf0]  ;;  %v5747_v57 = vld [vmem:[#allocation3 + $0x3b4] sm:$0xf0] }
  0x52   :  { %940 = vmatpush.bf16.msrb.mxu0 %v3783_v7  ;;  %966 = vmatpush.bf16.msrb.mxu2 %v3787_v12  ;;  %v4110_v7 = vld [vmem:[#allocation3 + $0x290] sm:$0xf]  ;;  %v4147_v9 = vor.u32 %v5718_v62, %v4144_v63  ;;  %v5646_v10 = vld [vmem:[#allocation3 + $0x94] sm:$0xf]  ;;  %v3855_v14 = vor.u32 %v5650_v6, %v3854_v1  ;;  %v3992_v59 = vld [vmem:[#allocation3 + $0x1b8] sm:$0xf0]  ;;  %v4247_v63 = vor.u32 %v5747_v57, %v4246_v55 }
  0x53   :  { %v5714_v8 = vld [vmem:[#allocation3 + $0x2ac] sm:$0xf0]  ;;  %v5710_v12 = vld [vmem:[#allocation3 + $0x294] sm:$0xf]  ;;  %v5743_v60 = vld [vmem:[#allocation3 + $0x39c] sm:$0xf] }
  0x54   :  { %953 = vmatpush.bf16.msrb.mxu1 %v4039_v11  ;;  %979 = vmatpush.bf16.msrb.mxu3 %v4043_v15  ;;  %v3856_v11 = vld [vmem:[#allocation3 + $0xb0] sm:$0xf0]  ;;  %v4111_v15 = vor.u32 %v5714_v8, %v4110_v7  ;;  %v4078_v19 = vld [vmem:[#allocation3 + $0x250] sm:$0xf]  ;;  %v4248_v61 = vld [vmem:[#allocation3 + $0x3b8] sm:$0xf0] }
  0x55   :  { %941 = vmatmul.bf16.vlgmr.msrb.gmra.mxu0 %v6269_v2  ;;  %967 = vmatmul.bf16.vlgmr.msrb.gmra.mxu2 %v6269_v2  ;;  %v4112_v13 = vld [vmem:[#allocation3 + $0x2b0] sm:$0xf0]  ;;  %v5706_v21 = vld [vmem:[#allocation3 + $0x26c] sm:$0xf0]  ;;  %v3958_v1 = vld [vmem:[#allocation3 + $0x158] sm:$0xf]  ;;  %v4251_v6 = vor.u32 %v5743_v60, %v4248_v61 }
  0x56   :  { %985 = vmatpush.bf16.msra.mxu0 %v4015_v16  ;;  %1011 = vmatpush.bf16.msra.mxu2 %v4019_v18  ;;  %v3859_v16 = vor.u32 %v5646_v10, %v3856_v11  ;;  %v5642_v18 = vld [vmem:[#allocation3 + $0x6c] sm:$0xf0]  ;;  %v4115_v20 = vor.u32 %v5710_v12, %v4112_v13  ;;  %v3824_v23 = vld [vmem:[#allocation3 + $0x70] sm:$0xf0]  ;;  %v5739_v7 = vld [vmem:[#allocation3 + $0x374] sm:$0xf0] }
  0x57   :  { %954 = vmatmul.bf16.vlgmr.msrb.gmra.mxu1 %v6271_v5  ;;  %980 = vmatmul.bf16.vlgmr.msrb.gmra.mxu3 %v6271_v5  ;;  %v5702_v24 = vld [vmem:[#allocation3 + $0x254] sm:$0xf]  ;;  %v3790_v27 = vld [vmem:[#allocation3 + $0x10] sm:$0xf]  ;;  %v5671_v8 = vld [vmem:[#allocation3 + $0x15c] sm:$0xf] }
  0x58   :  { %998 = vmatpush.bf16.msra.mxu1 %v4271_v17  ;;  %1024 = vmatpush.bf16.msra.mxu3 %v4275_v22  ;;  %v3822_v17 = vld [vmem:[#allocation3 + $0x50] sm:$0xf]  ;;  %v5638_v22 = vld [vmem:[#allocation3 + $0x54] sm:$0xf]  ;;  %v5735_v10 = vld [vmem:[#allocation3 + $0x35c] sm:$0xf] }
  0x59   :  { %v4080_v25 = vld [vmem:[#allocation3 + $0x270] sm:$0xf0]  ;;  %v3823_v26 = vor.u32 %v5642_v18, %v3822_v17  ;;  %v4046_v31 = vld [vmem:[#allocation3 + $0x210] sm:$0xf]  ;;  %v4216_v11 = vld [vmem:[#allocation3 + $0x378] sm:$0xf0] }
  0x5a   :  { %986 = vmatpush.bf16.msra.mxu0 %v3983_v28  ;;  %1012 = vmatpush.bf16.msra.mxu2 %v3987_v30  ;;  %v5634_v28 = vld [vmem:[#allocation3 + $0x2c] sm:$0xf0]  ;;  %v3827_v30 = vor.u32 %v5638_v22, %v3824_v23  ;;  %v5630_v33 = vld [vmem:[#allocation3 + $0x14] sm:$0xf]  ;;  %v4182_v17 = vld [vmem:[#allocation3 + $0x318] sm:$0xf]  ;;  %v4219_v18 = vor.u32 %v5735_v10, %v4216_v11 }
  0x5b   :  { %v5698_v32 = vld [vmem:[#allocation3 + $0x22c] sm:$0xf0]  ;;  %v3792_v35 = vld [vmem:[#allocation3 + $0x30] sm:$0xf0]  ;;  %v5727_v22 = vld [vmem:[#allocation3 + $0x31c] sm:$0xf] }
  0x5c   :  { %999 = vmatpush.bf16.msra.mxu1 %v4239_v29  ;;  %1025 = vmatpush.bf16.msra.mxu3 %v4243_v34  ;;  %v4079_v29 = vor.u32 %v5706_v21, %v4078_v19  ;;  %v4083_v34 = vor.u32 %v5702_v24, %v4080_v25  ;;  %v5694_v36 = vld [vmem:[#allocation3 + $0x214] sm:$0xf]  ;;  %v4047_v45 = vor.u32 %v5698_v32, %v4046_v31  ;;  %v5731_v19 = vld [vmem:[#allocation3 + $0x334] sm:$0xf0]  ;;  %v3928_v21 = vld [vmem:[#allocation3 + $0x138] sm:$0xf0] }
  0x5d   :  { %v4048_v37 = vld [vmem:[#allocation3 + $0x230] sm:$0xf0]  ;;  %v4184_v23 = vld [vmem:[#allocation3 + $0x338] sm:$0xf0]  ;;  %v4183_v25 = vor.u32 %v5731_v19, %v4182_v17  ;;  %v5723_v31 = vld [vmem:[#allocation3 + $0x2f4] sm:$0xf0] }
  0x5e   :  { %987 = vmatpush.bf16.msra.mxu0 %v3951_v40  ;;  %1013 = vmatpush.bf16.msra.mxu2 %v3955_v42  ;;  %v4278_v40 = vld [vmem:[#allocation3 + $0x3d8] sm:$0xf]  ;;  %v4051_v49 = vor.u32 %v5694_v36, %v4048_v37  ;;  %v5655_v32 = vld [vmem:[#allocation3 + $0xdc] sm:$0xf]  ;;  %v4398_v10 = vld [vmem:[#allocation5 + $0xe0] sm:$0xf] }
  0x5f   :  { %v5755_v42 = vld [vmem:[#allocation3 + $0x3f4] sm:$0xf0]  ;;  %v4120_v47 = vld [vmem:[#allocation3 + $0x2b8] sm:$0xf0]  ;;  %v5786_v11 = vld [vmem:[#allocation5 + $0xec] sm:$0xf0] }
  0x60   :  { %1000 = vmatpush.bf16.msra.mxu1 %v4207_v41  ;;  %1026 = vmatpush.bf16.msra.mxu3 %v4211_v46  ;;  %v3791_v41 = vor.u32 %v5634_v28, %v3790_v27  ;;  %v3795_v46 = vor.u32 %v5630_v33, %v3792_v35  ;;  %v4279_v51 = vor.u32 %v5755_v42, %v4278_v40  ;;  %v3894_v27 = vld [vmem:[#allocation3 + $0xd8] sm:$0xf]  ;;  %v3896_v33 = vld [vmem:[#allocation3 + $0xf8] sm:$0xf0]  ;;  %v4654_v19 = vld [vmem:[#allocation5 + $0x2e0] sm:$0xf] }
  0x61   :  { %v5659_v28 = vld [vmem:[#allocation3 + $0xf4] sm:$0xf0]  ;;  %v4152_v35 = vld [vmem:[#allocation3 + $0x2f8] sm:$0xf0]  ;;  %v3899_v38 = vor.u32 %v5655_v32, %v3896_v33  ;;  %v4494_v33 = vld [vmem:[#allocation5 + $0x1a0] sm:$0xf] }
  0x62   :  { %988 = vmatpush.bf16.msra.mxu0 %v3919_v52  ;;  %1014 = vmatpush.bf16.msra.mxu2 %v3923_v54  ;;  %v4027_v52 = vor.u32 %v5687_v43, %v4024_v44  ;;  %v5683_v54 = vld [vmem:[#allocation3 + $0x1b4] sm:$0xf0]  ;;  %v3895_v36 = vor.u32 %v5659_v28, %v3894_v27  ;;  %v5647_v44 = vld [vmem:[#allocation3 + $0x9c] sm:$0xf]  ;;  %v4638_v28 = vld [vmem:[#allocation5 + $0x2c0] sm:$0xf] }
  0x63   :  { %v3862_v39 = vld [vmem:[#allocation3 + $0x98] sm:$0xf]  ;;  %v3832_v57 = vld [vmem:[#allocation3 + $0x78] sm:$0xf0] }
  0x64   :  { %1001 = vmatpush.bf16.msra.mxu1 %v4175_v53  ;;  %1027 = vmatpush.bf16.msra.mxu3 %v4179_v58  ;;  %v3990_v53 = vld [vmem:[#allocation3 + $0x198] sm:$0xf]  ;;  %v5679_v58 = vld [vmem:[#allocation3 + $0x19c] sm:$0xf] }
  0x65   :  { %v3991_v62 = vor.u32 %v5683_v54, %v3990_v53  ;;  %v5651_v40 = vld [vmem:[#allocation3 + $0xb4] sm:$0xf0] }
  0x66   :  { %989 = vmatpush.bf16.msra.mxu0 %v3887_v0  ;;  %1015 = vmatpush.bf16.msra.mxu2 %v3891_v4  ;;  %v3995_v0 = vor.u32 %v5679_v58, %v3992_v59  ;;  %v4214_v4 = vld [vmem:[#allocation3 + $0x358] sm:$0xf]  ;;  %v3863_v48 = vor.u32 %v5651_v40, %v3862_v39  ;;  %v5703_v58 = vld [vmem:[#allocation3 + $0x25c] sm:$0xf]  ;;  %v4478_v40 = vld [vmem:[#allocation5 + $0x180] sm:$0xf] }
  0x67   :  { %v4215_v13 = vor.u32 %v5739_v7, %v4214_v4  ;;  %v5715_v43 = vld [vmem:[#allocation3 + $0x2b4] sm:$0xf0]  ;;  %v4088_v59 = vld [vmem:[#allocation3 + $0x278] sm:$0xf0] }
  0x68   :  { %1002 = vmatpush.bf16.msra.mxu1 %v4143_v3  ;;  %1028 = vmatpush.bf16.msra.mxu3 %v4147_v9  ;;  %v5675_v3 = vld [vmem:[#allocation3 + $0x174] sm:$0xf0]  ;;  %v3960_v9 = vld [vmem:[#allocation3 + $0x178] sm:$0xf0]  ;;  %v4091_v4 = vor.u32 %v5703_v58, %v4088_v59  ;;  %v5842_v58 = vld [vmem:[#allocation5 + $0x2ac] sm:$0xf0] }
  0x69   :  { %v3959_v12 = vor.u32 %v5675_v3, %v3958_v1  ;;  %v4086_v53 = vld [vmem:[#allocation3 + $0x258] sm:$0xf]  ;;  %v3800_v7 = vld [vmem:[#allocation3 + $0x38] sm:$0xf0]  ;;  %v5762_v59 = vld [vmem:[#allocation5 + $0x2c] sm:$0xf0] }
  0x6a   :  { %990 = vmatpush.bf16.msra.mxu0 %v3855_v14  ;;  %1016 = vmatpush.bf16.msra.mxu2 %v3859_v16  ;;  %v3963_v14 = vor.u32 %v5671_v8, %v3960_v9  ;;  %v5667_v16 = vld [vmem:[#allocation3 + $0x134] sm:$0xf0]  ;;  %v5695_v8 = vld [vmem:[#allocation3 + $0x21c] sm:$0xf] }
  0x6b   :  { %v5707_v55 = vld [vmem:[#allocation3 + $0x274] sm:$0xf0]  ;;  %v4056_v9 = vld [vmem:[#allocation3 + $0x238] sm:$0xf0] }
  0x6c   :  { %1003 = vmatpush.bf16.msra.mxu1 %v4111_v15  ;;  %1029 = vmatpush.bf16.msra.mxu3 %v4115_v20  ;;  %v3926_v15 = vld [vmem:[#allocation3 + $0x118] sm:$0xf]  ;;  %v5663_v20 = vld [vmem:[#allocation3 + $0x11c] sm:$0xf]  ;;  %v4059_v17 = vor.u32 %v5695_v8, %v4056_v9  ;;  %v5758_v9 = vld [vmem:[#allocation5 + $0xc] sm:$0xf0] }
  0x6d   :  { %v3927_v24 = vor.u32 %v5667_v16, %v3926_v15  ;;  %v3798_v61 = vld [vmem:[#allocation3 + $0x18] sm:$0xf] }
  0x6e   :  { %991 = vmatpush.bf16.msra.mxu0 %v3823_v26  ;;  %1017 = vmatpush.bf16.msra.mxu2 %v3827_v30  ;;  %v3931_v26 = vor.u32 %v5663_v20, %v3928_v21  ;;  %v4187_v30 = vor.u32 %v5727_v22, %v4184_v23  ;;  %v4054_v1 = vld [vmem:[#allocation3 + $0x218] sm:$0xf]  ;;  %v5850_v20 = vld [vmem:[#allocation5 + $0x2ec] sm:$0xf0]  ;;  %v4382_v21 = vld [vmem:[#allocation5 + $0xc0] sm:$0xf] }
  0x6f   :  { %v5699_v3 = vld [vmem:[#allocation3 + $0x234] sm:$0xf0]  ;;  %v5782_v22 = vld [vmem:[#allocation5 + $0xcc] sm:$0xf0] }
  0x70   :  { %1004 = vmatpush.bf16.msra.mxu1 %v4079_v29  ;;  %1030 = vmatpush.bf16.msra.mxu3 %v4083_v34  ;;  %v4150_v29 = vld [vmem:[#allocation3 + $0x2d8] sm:$0xf]  ;;  %v5719_v34 = vld [vmem:[#allocation3 + $0x2dc] sm:$0xf]  ;;  %v4055_v15 = vor.u32 %v5699_v3, %v4054_v1  ;;  %v4383_v27 = vor.u32 %v5782_v22, %v4382_v21  ;;  %v5794_v1 = vld [vmem:[#allocation5 + $0x12c] sm:$0xf0] }
  0x71   :  { %v4151_v37 = vor.u32 %v5723_v31, %v4150_v29  ;;  %v4155_v42 = vor.u32 %v5719_v34, %v4152_v35  ;;  %v5846_v29 = vld [vmem:[#allocation5 + $0x2cc] sm:$0xf0]  ;;  %v5038_v21 = vld [vmem:[#allocation5 + $0x5e0] sm:$0xf] }
  0x72   :  { %992 = vmatpush.bf16.msra.mxu0 %v3791_v41  ;;  %1018 = vmatpush.bf16.msra.mxu2 %v3795_v46  ;;  %v4118_v41 = vld [vmem:[#allocation3 + $0x298] sm:$0xf]  ;;  %v5711_v46 = vld [vmem:[#allocation3 + $0x29c] sm:$0xf]  ;;  %v5778_v31 = vld [vmem:[#allocation5 + $0xac] sm:$0xf0]  ;;  %v4639_v35 = vor.u32 %v5846_v29, %v4638_v28 }
  0x73   :  { %v4123_v54 = vor.u32 %v5711_v46, %v4120_v47  ;;  %v5810_v34 = vld [vmem:[#allocation5 + $0x1ac] sm:$0xf0] }
  0x74   :  { %1005 = vmatpush.bf16.msra.mxu1 %v4047_v45  ;;  %1031 = vmatpush.bf16.msra.mxu3 %v4051_v49  ;;  %v3864_v45 = vld [vmem:[#allocation3 + $0xb8] sm:$0xf0]  ;;  %v4119_v49 = vor.u32 %v5715_v43, %v4118_v41  ;;  %v4495_v39 = vor.u32 %v5810_v34, %v4494_v33  ;;  %v5806_v41 = vld [vmem:[#allocation5 + $0x18c] sm:$0xf0]  ;;  %v4334_v43 = vld [vmem:[#allocation5 + $0x60] sm:$0xf] }
  0x75   :  { %993 = vmatmul.bf16.vlgmr.msra.gmra.mxu0 %v6269_v2  ;;  %1019 = vmatmul.bf16.vlgmr.msra.gmra.mxu2 %v6269_v2  ;;  %v5802_v46 = vld [vmem:[#allocation5 + $0x16c] sm:$0xf0] }
  0x76   :  { %1037 = vmatpush.bf16.msrb.mxu0 %v4023_v50  ;;  %1063 = vmatpush.bf16.msrb.mxu2 %v4027_v52  ;;  %v3867_v50 = vor.u32 %v5647_v44, %v3864_v45  ;;  %v5643_v52 = vld [vmem:[#allocation3 + $0x74] sm:$0xf0]  ;;  %v4479_v44 = vor.u32 %v5806_v41, %v4478_v40  ;;  %v4462_v45 = vld [vmem:[#allocation5 + $0x160] sm:$0xf]  ;;  %v5882_v47 = vld [vmem:[#allocation5 + $0x3ec] sm:$0xf0] }
  0x77   :  { %1006 = vmatmul.bf16.vlgmr.msra.gmra.mxu1 %v6271_v5  ;;  %1032 = vmatmul.bf16.vlgmr.msra.gmra.mxu3 %v6271_v5  ;;  %v5946_v22 = vld [vmem:[#allocation5 + $0x5ec] sm:$0xf0] }
  0x78   :  { %1050 = vmatpush.bf16.msrb.mxu1 %v4279_v51  ;;  %1076 = vmatpush.bf16.msrb.mxu3 %v4283_v56  ;;  %v3830_v51 = vld [vmem:[#allocation3 + $0x58] sm:$0xf]  ;;  %v5639_v56 = vld [vmem:[#allocation3 + $0x5c] sm:$0xf]  ;;  %v5910_v33 = vld [vmem:[#allocation5 + $0x4cc] sm:$0xf0]  ;;  %v5039_v34 = vor.u32 %v5946_v22, %v5038_v21 }
  0x79   :  { %v3831_v60 = vor.u32 %v5643_v52, %v3830_v51  ;;  %v5766_v51 = vld [vmem:[#allocation5 + $0x4c] sm:$0xf0]  ;;  %v4463_v52 = vor.u32 %v5802_v46, %v4462_v45  ;;  %v4862_v45 = vld [vmem:[#allocation5 + $0x480] sm:$0xf] }
  0x7a   :  { %1038 = vmatpush.bf16.msrb.mxu0 %v3991_v62  ;;  %1064 = vmatpush.bf16.msrb.mxu2 %v3995_v0  ;;  %v4087_v62 = vor.u32 %v5707_v55, %v4086_v53  ;;  %v5635_v0 = vld [vmem:[#allocation3 + $0x34] sm:$0xf0]  ;;  %v4446_v53 = vld [vmem:[#allocation5 + $0x140] sm:$0xf]  ;;  %v5906_v40 = vld [vmem:[#allocation5 + $0x4ac] sm:$0xf0] }
  0x7b   :  { %v5902_v46 = vld [vmem:[#allocation5 + $0x48c] sm:$0xf0] }
  0x7c   :  { %1051 = vmatpush.bf16.msrb.mxu1 %v4247_v63  ;;  %1077 = vmatpush.bf16.msrb.mxu3 %v4251_v6  ;;  %v3835_v63 = vor.u32 %v5639_v56, %v3832_v57  ;;  %v5631_v6 = vld [vmem:[#allocation3 + $0x1c] sm:$0xf]  ;;  %v4302_v56 = vld [vmem:[#allocation5 + $0x20] sm:$0xf]  ;;  %v5978_v21 = vld [vmem:[#allocation5 + $0x6ec] sm:$0xf0] }
  0x7d   :  { %v3803_v16 = vor.u32 %v5631_v6, %v3800_v7  ;;  %v4622_v57 = vld [vmem:[#allocation5 + $0x2a0] sm:$0xf]  ;;  %v5838_v7 = vld [vmem:[#allocation5 + $0x28c] sm:$0xf0]  ;;  %v4303_v8 = vor.u32 %v5762_v59, %v4302_v56 }
  0x7e   :  { %1039 = vmatpush.bf16.msrb.mxu0 %v3959_v12  ;;  %1065 = vmatpush.bf16.msrb.mxu2 %v3963_v14  ;;  %v3799_v12 = vor.u32 %v5635_v0, %v3798_v61  ;;  %v5818_v14 = vld [vmem:[#allocation5 + $0x1ec] sm:$0xf0]  ;;  %v4623_v61 = vor.u32 %v5842_v58, %v4622_v57  ;;  %v4430_v0 = vld [vmem:[#allocation5 + $0x120] sm:$0xf] }
  0x7f   :  { %v4606_v6 = vld [vmem:[#allocation5 + $0x280] sm:$0xf]  ;;  %v5898_v57 = vld [vmem:[#allocation5 + $0x46c] sm:$0xf0] }
  0x80   :  { %1052 = vmatpush.bf16.msrb.mxu1 %v4215_v13  ;;  %1078 = vmatpush.bf16.msrb.mxu3 %v4219_v18  ;;  %v4526_v13 = vld [vmem:[#allocation5 + $0x1e0] sm:$0xf]  ;;  %v4399_v18 = vor.u32 %v5786_v11, %v4398_v10  ;;  %v5914_v11 = vld [vmem:[#allocation5 + $0x4ec] sm:$0xf0] }
  0x81   :  { %v4527_v23 = vor.u32 %v5818_v14, %v4526_v13  ;;  %v4910_v10 = vld [vmem:[#allocation5 + $0x4e0] sm:$0xf]  ;;  %v4431_v13 = vor.u32 %v5794_v1, %v4430_v0 }
  0x82   :  { %1040 = vmatpush.bf16.msrb.mxu0 %v3927_v24  ;;  %1066 = vmatpush.bf16.msrb.mxu2 %v3931_v26  ;;  %v4510_v24 = vld [vmem:[#allocation5 + $0x1c0] sm:$0xf]  ;;  %v4655_v26 = vor.u32 %v5850_v20, %v4654_v19  ;;  %v5834_v20 = vld [vmem:[#allocation5 + $0x26c] sm:$0xf0] }
  0x83   :  { %v4414_v14 = vld [vmem:[#allocation5 + $0x100] sm:$0xf] }
  0x84   :  { %1053 = vmatpush.bf16.msrb.mxu1 %v4183_v25  ;;  %1079 = vmatpush.bf16.msrb.mxu3 %v4187_v30  ;;  %v5814_v25 = vld [vmem:[#allocation5 + $0x1cc] sm:$0xf0]  ;;  %v4366_v30 = vld [vmem:[#allocation5 + $0xa0] sm:$0xf] }
  0x85   :  { %v4511_v32 = vor.u32 %v5814_v25, %v4510_v24  ;;  %v4590_v19 = vld [vmem:[#allocation5 + $0x260] sm:$0xf] }
  0x86   :  { %1041 = vmatpush.bf16.msrb.mxu0 %v3895_v36  ;;  %1067 = vmatpush.bf16.msrb.mxu2 %v3899_v38  ;;  %v4367_v36 = vor.u32 %v5778_v31, %v4366_v30  ;;  %v5774_v38 = vld [vmem:[#allocation5 + $0x8c] sm:$0xf0]  ;;  %v4734_v24 = vld [vmem:[#allocation5 + $0x380] sm:$0xf] }
  0x87   :  { %v4574_v30 = vld [vmem:[#allocation5 + $0x240] sm:$0xf]  ;;  %v5830_v31 = vld [vmem:[#allocation5 + $0x24c] sm:$0xf0] }
  0x88   :  { %1054 = vmatpush.bf16.msrb.mxu1 %v4151_v37  ;;  %1080 = vmatpush.bf16.msrb.mxu3 %v4155_v42  ;;  %v4350_v37 = vld [vmem:[#allocation5 + $0x80] sm:$0xf] }
  0x89   :  { %v4351_v42 = vor.u32 %v5774_v38, %v4350_v37  ;;  %v4575_v37 = vor.u32 %v5830_v31, %v4574_v30  ;;  %v4846_v56 = vld [vmem:[#allocation5 + $0x460] sm:$0xf]  ;;  %v5922_v31 = vld [vmem:[#allocation5 + $0x52c] sm:$0xf0] }
  0x8a   :  { %1042 = vmatpush.bf16.msrb.mxu0 %v3863_v48  ;;  %1068 = vmatpush.bf16.msrb.mxu2 %v3867_v50  ;;  %v4318_v50 = vld [vmem:[#allocation5 + $0x40] sm:$0xf] }
  0x8b   :  { %v4319_v55 = vor.u32 %v5766_v51, %v4318_v50  ;;  %v5866_v50 = vld [vmem:[#allocation5 + $0x36c] sm:$0xf0]  ;;  %v4942_v30 = vld [vmem:[#allocation5 + $0x520] sm:$0xf] }
  0x8c   :  { %1055 = vmatpush.bf16.msrb.mxu1 %v4119_v49  ;;  %1081 = vmatpush.bf16.msrb.mxu3 %v4123_v54  ;;  %v5798_v54 = vld [vmem:[#allocation5 + $0x14c] sm:$0xf0] }
  0x8e   :  { %1043 = vmatpush.bf16.msrb.mxu0 %v3831_v60  ;;  %1069 = vmatpush.bf16.msrb.mxu2 %v3835_v63  ;;  %v4447_v60 = vor.u32 %v5798_v54, %v4446_v53  ;;  %v5878_v63 = vld [vmem:[#allocation5 + $0x3cc] sm:$0xf0]  ;;  %v4863_v53 = vor.u32 %v5902_v46, %v4862_v45  ;;  %v4558_v54 = vld [vmem:[#allocation5 + $0x220] sm:$0xf]  ;;  %v4400_v45 = vld [vmem:[#allocation5 + $0xf0] sm:$0xf0] }
  0x90   :  { %1056 = vmatpush.bf16.msrb.mxu1 %v4087_v62  ;;  %1082 = vmatpush.bf16.msrb.mxu3 %v4091_v4  ;;  %v4766_v62 = vld [vmem:[#allocation5 + $0x3c0] sm:$0xf] }
  0x91   :  { %v4767_v3 = vor.u32 %v5878_v63, %v4766_v62  ;;  %v4286_v4 = vld [vmem:[#allocation5] sm:$0xf]  ;;  %v5862_v63 = vld [vmem:[#allocation5 + $0x34c] sm:$0xf0] }
  0x92   :  { %1044 = vmatpush.bf16.msrb.mxu0 %v3799_v12  ;;  %1070 = vmatpush.bf16.msrb.mxu2 %v3803_v16  ;;  %v4607_v12 = vor.u32 %v5838_v7, %v4606_v6  ;;  %v5874_v16 = vld [vmem:[#allocation5 + $0x3ac] sm:$0xf0]  ;;  %v4287_v25 = vor.u32 %v5758_v9, %v4286_v4  ;;  %v4702_v62 = vld [vmem:[#allocation5 + $0x340] sm:$0xf]  ;;  %v4847_v4 = vor.u32 %v5898_v57, %v4846_v56  ;;  %v4528_v56 = vld [vmem:[#allocation5 + $0x1f0] sm:$0xf0] }
  0x93   :  { %v4703_v0 = vor.u32 %v5862_v63, %v4702_v62  ;;  %v4542_v6 = vld [vmem:[#allocation5 + $0x200] sm:$0xf]  ;;  %v5822_v7 = vld [vmem:[#allocation5 + $0x20c] sm:$0xf0] }
  0x94   :  { %1057 = vmatpush.bf16.msrb.mxu1 %v4055_v15  ;;  %1083 = vmatpush.bf16.msrb.mxu3 %v4059_v17  ;;  %v4750_v15 = vld [vmem:[#allocation5 + $0x3a0] sm:$0xf]  ;;  %v5790_v17 = vld [vmem:[#allocation5 + $0x10c] sm:$0xf0] }
  0x95   :  { %1045 = vmatmul.bf16.vlgmr.msrb.gmra.mxu0 %v6269_v2  ;;  %1071 = vmatmul.bf16.vlgmr.msrb.gmra.mxu2 %v6269_v2  ;;  %v5770_v2 = vld [vmem:[#allocation5 + $0x6c] sm:$0xf0]  ;;  %v4415_v28 = vor.u32 %v5790_v17, %v4414_v14  ;;  %v4958_v14 = vld [vmem:[#allocation5 + $0x540] sm:$0xf] }
  0x96   :  { %2651 = vmatpush.bf16.msra.mxu0 %v4399_v18  ;;  %2677 = vmatpush.bf16.msra.mxu2 %v4655_v26  ;;  %v4335_v49 = vor.u32 %v5770_v2, %v4334_v43  ;;  %v4751_v18 = vor.u32 %v5874_v16, %v4750_v15  ;;  %v5870_v26 = vld [vmem:[#allocation5 + $0x38c] sm:$0xf0]  ;;  %v6292_v2 = vld [vmem:[%s6466_s2] sm:$0xff] }
  0x97   :  { %1058 = vmatmul.bf16.vlgmr.msrb.gmra.mxu1 %v6271_v5  ;;  %1084 = vmatmul.bf16.vlgmr.msrb.gmra.mxu3 %v6271_v5  ;;  %v4782_v5 = vld [vmem:[#allocation5 + $0x3e0] sm:$0xf]  ;;  %v4735_v29 = vor.u32 %v5870_v26, %v4734_v24  ;;  %v5938_v43 = vld [vmem:[#allocation5 + $0x5ac] sm:$0xf0] }
  0x98   :  { %2664 = vmatpush.bf16.msra.mxu1 %v4527_v23  ;;  %v4783_v48 = vor.u32 %v5882_v47, %v4782_v5  ;;  %v4591_v23 = vor.u32 %v5834_v20, %v4590_v19  ;;  %v4990_v47 = vld [vmem:[#allocation5 + $0x580] sm:$0xf]  ;;  %v5926_v15 = vld [vmem:[#allocation5 + $0x54c] sm:$0xf0] }
  0x99   :  { %v4686_v16 = vld [vmem:[#allocation5 + $0x320] sm:$0xf]  ;;  %v5858_v17 = vld [vmem:[#allocation5 + $0x32c] sm:$0xf0] }
  0x9a   :  { %2652 = vmatpush.bf16.msra.mxu0 %v4383_v27  ;;  %2678 = vmatpush.bf16.msra.mxu2 %v4639_v35  ;;  %v4911_v27 = vor.u32 %v5914_v11, %v4910_v10  ;;  %v5022_v35 = vld [vmem:[#allocation5 + $0x5c0] sm:$0xf]  ;;  %v5894_v11 = vld [vmem:[#allocation5 + $0x44c] sm:$0xf0]  ;;  %v4687_v19 = vor.u32 %v5858_v17, %v4686_v16 }
  0x9b   :  { %2690 = vmatpush.bf16.msra.mxu3 %v4783_v48  ;;  %v5934_v48 = vld [vmem:[#allocation5 + $0x58c] sm:$0xf0]  ;;  %v4830_v10 = vld [vmem:[#allocation5 + $0x440] sm:$0xf] }
  0x9c   :  { %2665 = vmatpush.bf16.msra.mxu1 %v4511_v32  ;;  %v4894_v32 = vld [vmem:[#allocation5 + $0x4c0] sm:$0xf]  ;;  %v4991_v58 = vor.u32 %v5934_v48, %v4990_v47  ;;  %v4943_v47 = vor.u32 %v5922_v31, %v4942_v30  ;;  %v5970_v57 = vld [vmem:[#allocation5 + $0x6ac] sm:$0xf0]  ;;  %v5772_v31 = vld [vmem:[#allocation5 + $0x84] sm:$0xf] }
  0x9d   :  { %v4895_v38 = vor.u32 %v5910_v33, %v4894_v32  ;;  %v5166_v20 = vld [vmem:[#allocation5 + $0x6e0] sm:$0xf]  ;;  %v5854_v33 = vld [vmem:[#allocation5 + $0x30c] sm:$0xf0] }
  0x9e   :  { %2653 = vmatpush.bf16.msra.mxu0 %v4367_v36  ;;  %2679 = vmatpush.bf16.msra.mxu2 %v4623_v61  ;;  %v5942_v36 = vld [vmem:[#allocation5 + $0x5cc] sm:$0xf0]  ;;  %v4814_v24 = vld [vmem:[#allocation5 + $0x420] sm:$0xf] }
  0x9f   :  { %2691 = vmatpush.bf16.msra.mxu3 %v4767_v3  ;;  %v5023_v41 = vor.u32 %v5942_v36, %v5022_v35  ;;  %v5930_v61 = vld [vmem:[#allocation5 + $0x56c] sm:$0xf0]  ;;  %v219_v3 = vperm.slane %v6292_v2, 1  ;;  %v4670_v32 = vld [vmem:[#allocation5 + $0x300] sm:$0xf] }
  0xa0   :  { %2666 = vmatpush.bf16.msra.mxu1 %v4495_v39  ;;  %v4878_v39 = vld [vmem:[#allocation5 + $0x4a0] sm:$0xf]  ;;  %v6006_v63 = vld [vmem:[#allocation5 + $0x7cc] sm:$0xf0] }
  0xa1   :  { %v4798_v36 = vld [vmem:[#allocation5 + $0x400] sm:$0xf] }
  0xa2   :  { %2654 = vmatpush.bf16.msra.mxu0 %v4351_v42  ;;  %2680 = vmatpush.bf16.msra.mxu2 %v4607_v12  ;;  %v5006_v42 = vld [vmem:[#allocation5 + $0x5a0] sm:$0xf] }
  0xa3   :  { %2692 = vmatpush.bf16.msra.mxu3 %v4751_v18  ;;  %v5007_v5 = vor.u32 %v5938_v43, %v5006_v42  ;;  %v5886_v43 = vld [vmem:[#allocation5 + $0x40c] sm:$0xf0]  ;;  %v4926_v48 = vld [vmem:[#allocation5 + $0x500] sm:$0xf] }
  0xa4   :  { %2667 = vmatpush.bf16.msra.mxu1 %v4479_v44  ;;  %v4879_v44 = vor.u32 %v5906_v40, %v4878_v39  ;;  %v5974_v39 = vld [vmem:[#allocation5 + $0x6cc] sm:$0xf0]  ;;  %v5278_v62 = vld [vmem:[#allocation5 + $0x7c0] sm:$0xf] }
  0xa5   :  { %v5102_v17 = vld [vmem:[#allocation5 + $0x660] sm:$0xf] }
  0xa6   :  { %2655 = vmatpush.bf16.msra.mxu0 %v4335_v49  ;;  %2681 = vmatpush.bf16.msra.mxu2 %v4591_v23  ;;  %v4718_v49 = vld [vmem:[#allocation5 + $0x360] sm:$0xf]  ;;  %v4831_v23 = vor.u32 %v5894_v11, %v4830_v10 }
  0xa7   :  { %2693 = vmatpush.bf16.msra.mxu3 %v4735_v29  ;;  %v4719_v51 = vor.u32 %v5866_v50, %v4718_v49  ;;  %v4959_v29 = vor.u32 %v5926_v15, %v4958_v14  ;;  %v5294_v49 = vld [vmem:[#allocation5 + $0x7e0] sm:$0xf]  ;;  %v6010_v50 = vld [vmem:[#allocation5 + $0x7ec] sm:$0xf0]  ;;  %v4512_v14 = vld [vmem:[#allocation5 + $0x1d0] sm:$0xf0] }
  0xa8   :  { %2668 = vmatpush.bf16.msra.mxu1 %v4463_v52  ;;  %v218_v52 = vperm.slane %v6292_v2, 0  ;;  %v5262_v11 = vld [vmem:[#allocation5 + $0x7a0] sm:$0xf]  ;;  %v6002_v15 = vld [vmem:[#allocation5 + $0x7ac] sm:$0xf0] }
  0xa9   :  { %v5263_v16 = vor.u32 %v6002_v15, %v5262_v11 }
  0xaa   :  { %2656 = vmatpush.bf16.msra.mxu0 %v4319_v55  ;;  %2682 = vmatpush.bf16.msra.mxu2 %v4575_v37  ;;  %v5826_v55 = vld [vmem:[#allocation5 + $0x22c] sm:$0xf0]  ;;  %v4671_v37 = vor.u32 %v5854_v33, %v4670_v32  ;;  %v4352_v32 = vld [vmem:[#allocation5 + $0x90] sm:$0xf0] }
  0xab   :  { %2694 = vmatpush.bf16.msra.mxu3 %v4719_v51  ;;  %v4559_v59 = vor.u32 %v5826_v55, %v4558_v54  ;;  %v5134_v54 = vld [vmem:[#allocation5 + $0x6a0] sm:$0xf]  ;;  %v5816_v55 = vld [vmem:[#allocation5 + $0x1e4] sm:$0xf] }
  0xac   :  { %2669 = vmatpush.bf16.msra.mxu1 %v4447_v60  ;;  %v4974_v60 = vld [vmem:[#allocation5 + $0x560] sm:$0xf] }
  0xad   :  { %v4975_v12 = vor.u32 %v5930_v61, %v4974_v60  ;;  %v4799_v60 = vor.u32 %v5886_v43, %v4798_v36  ;;  %v5135_v61 = vor.u32 %v5970_v57, %v5134_v54  ;;  %v4480_v36 = vld [vmem:[#allocation5 + $0x190] sm:$0xf0]  ;;  %v5764_v57 = vld [vmem:[#allocation5 + $0x44] sm:$0xf] }
  0xae   :  { %2657 = vmatpush.bf16.msra.mxu0 %v4303_v8  ;;  %2683 = vmatpush.bf16.msra.mxu2 %v4559_v59 }
  0xaf   :  { %2695 = vmatpush.bf16.msra.mxu3 %v4703_v0 }
  0xb0   :  { %2670 = vmatpush.bf16.msra.mxu1 %v4431_v13  ;;  %v4543_v13 = vor.u32 %v5822_v7, %v4542_v6  ;;  %v5966_v6 = vld [vmem:[#allocation5 + $0x68c] sm:$0xf0]  ;;  %v5780_v7 = vld [vmem:[#allocation5 + $0xc4] sm:$0xf] }
  0xb2   :  { %2658 = vmatpush.bf16.msra.mxu0 %v4287_v25  ;;  %2684 = vmatpush.bf16.msra.mxu2 %v4543_v13  ;;  %v5167_v25 = vor.u32 %v5978_v21, %v5166_v20  ;;  %v5812_v13 = vld [vmem:[#allocation5 + $0x1c4] sm:$0xf]  ;;  %v5246_v20 = vld [vmem:[#allocation5 + $0x780] sm:$0xf]  ;;  %v5998_v21 = vld [vmem:[#allocation5 + $0x78c] sm:$0xf0] }
  0xb3   :  { %2696 = vmatpush.bf16.msra.mxu3 %v4687_v19 }
  0xb4   :  { %2671 = vmatpush.bf16.msra.mxu1 %v4415_v28  ;;  %v890_v1 = vpop.f32.mrf.mxu0  ;;  %v5890_v28 = vld [vmem:[#allocation5 + $0x42c] sm:$0xf0] }
  0xb5   :  { %v891_v8 = vadd.f32 %v890_v1, %v218_v52  ;;  %v4815_v42 = vor.u32 %v5890_v28, %v4814_v24  ;;  %v5918_v52 = vld [vmem:[#allocation5 + $0x50c] sm:$0xf0]  ;;  %v4515_v24 = vor.u32 %v5812_v13, %v4512_v14  ;;  %v5247_v28 = vor.u32 %v5998_v21, %v5246_v20  ;;  %v4656_v13 = vld [vmem:[#allocation5 + $0x2f0] sm:$0xf0]  ;;  %v5198_v20 = vld [vmem:[#allocation5 + $0x720] sm:$0xf] }
  0xb6   :  { %2703 = vmatpush.bf16.msrb.mxu0 %v4911_v27  ;;  %v903_v9 = vpop.f32.mrf.mxu1  ;;  %2729 = vmatpush.bf16.msrb.mxu2 %v5167_v25  ;;  %v4927_v1 = vor.u32 %v5918_v52, %v4926_v48  ;;  %v5954_v52 = vld [vmem:[#allocation5 + $0x62c] sm:$0xf0] }
  0xb7   :  { %v904_v18 = vadd.f32 %v903_v9, %v891_v8  ;;  %2697 = vmatpush.bf16.msra.mxu3 %v4671_v37  ;;  %v4384_v8 = vld [vmem:[#allocation5 + $0xd0] sm:$0xf0]  ;;  %v4531_v9 = vor.u32 %v5816_v55, %v4528_v56  ;;  %v5086_v37 = vld [vmem:[#allocation5 + $0x640] sm:$0xf]  ;;  %v5986_v21 = vld [vmem:[#allocation5 + $0x72c] sm:$0xf0] }
  0xb8   :  { %2716 = vmatpush.bf16.msrb.mxu1 %v5039_v34  ;;  %v4387_v19 = vor.u32 %v5780_v7, %v4384_v8  ;;  %v5848_v8 = vld [vmem:[#allocation5 + $0x2e4] sm:$0xf] }
  0xb9   :  { %v1089_v26 = vmax.f32 %v904_v18, 0.0  ;;  %v5962_v18 = vld [vmem:[#allocation5 + $0x66c] sm:$0xf0] }
  0xba   :  { %2704 = vmatpush.bf16.msrb.mxu0 %v4895_v38  ;;  %v916_v22 = vpop.f32.mrf.mxu2  ;;  %v5150_v38 = vld [vmem:[#allocation5 + $0x6c0] sm:$0xf]  ;;  %v5103_v25 = vor.u32 %v5962_v18, %v5102_v17  ;;  %v4304_v17 = vld [vmem:[#allocation5 + $0x30] sm:$0xf0] }
  0xbb   :  { %v917_v27 = vadd.f32 %v916_v22, %v219_v3  ;;  %v6296_v34 = vpack.c.bf16 %v1089_v26, %v1089_v26  ;;  %v5151_v46 = vor.u32 %v5974_v39, %v5150_v38  ;;  %v5279_v3 = vor.u32 %v6006_v63, %v5278_v62  ;;  %v5776_v22 = vld [vmem:[#allocation5 + $0xa4] sm:$0xf]  ;;  %v5958_v38 = vld [vmem:[#allocation5 + $0x64c] sm:$0xf0] }
  0xbc   :  { %2717 = vmatpush.bf16.msrb.mxu1 %v5023_v41  ;;  %v929_v35 = vpop.f32.mrf.mxu3  ;;  %v892_v40 = vpop.f32.mrf.mxu0  ;;  %v5808_v26 = vld [vmem:[#allocation5 + $0x1a4] sm:$0xf]  ;;  %v5087_v39 = vor.u32 %v5958_v38, %v5086_v37 }
  0xbd   :  { %v930_v41 = vadd.f32 %v929_v35, %v917_v27  ;;  %2659 = vmatmul.bf16.vlgmr.msra.gmra.mxu0 %v6296_v34  ;;  %2730 = vmatpush.bf16.msrb.mxu2 %v5151_v46  ;;  %v4496_v27 = vld [vmem:[#allocation5 + $0x1b0] sm:$0xf0]  ;;  %v5804_v35 = vld [vmem:[#allocation5 + $0x184] sm:$0xf]  ;;  %v4355_v40 = vor.u32 %v5772_v31, %v4352_v32  ;;  %v5182_v32 = vld [vmem:[#allocation5 + $0x700] sm:$0xf] }
  0xbe   :  { %2705 = vmatpush.bf16.msrb.mxu0 %v4879_v44  ;;  %v5784_v44 = vld [vmem:[#allocation5 + $0xe4] sm:$0xf]  ;;  %v4499_v33 = vor.u32 %v5808_v26, %v4496_v27  ;;  %v4483_v46 = vor.u32 %v5804_v35, %v4480_v36  ;;  %v4288_v36 = vld [vmem:[#allocation5 + $0x10] sm:$0xf0] }
  0xbf   :  { %v1090_v51 = vmax.f32 %v930_v41, 0.0  ;;  %v4403_v0 = vor.u32 %v5784_v44, %v4400_v45  ;;  %v5230_v41 = vld [vmem:[#allocation5 + $0x760] sm:$0xf]  ;;  %v5768_v44 = vld [vmem:[#allocation5 + $0x64] sm:$0xf] }
  0xc0   :  { %2718 = vmatpush.bf16.msrb.mxu1 %v5007_v5  ;;  %v905_v5 = vpop.f32.mrf.mxu1  ;;  %v4336_v45 = vld [vmem:[#allocation5 + $0x70] sm:$0xf0]  ;;  %v5844_v27 = vld [vmem:[#allocation5 + $0x2c4] sm:$0xf] }
  0xc1   :  { %2731 = vmatpush.bf16.msrb.mxu2 %v5135_v61  ;;  %v4339_v56 = vor.u32 %v5768_v44, %v4336_v45  ;;  %v4320_v61 = vld [vmem:[#allocation5 + $0x50] sm:$0xf0]  ;;  %v5840_v45 = vld [vmem:[#allocation5 + $0x2a4] sm:$0xf] }
  0xc2   :  { %2706 = vmatpush.bf16.msrb.mxu0 %v4863_v53  ;;  %v5295_v53 = vor.u32 %v6010_v50, %v5294_v49  ;;  %v918_v59 = vpop.f32.mrf.mxu2  ;;  %v4464_v50 = vld [vmem:[#allocation5 + $0x170] sm:$0xf0]  ;;  %v4323_v11 = vor.u32 %v5764_v57, %v4320_v61  ;;  %v5872_v57 = vld [vmem:[#allocation5 + $0x3a4] sm:$0xf] }
  0xc3   :  { %v5214_v59 = vld [vmem:[#allocation5 + $0x740] sm:$0xf]  ;;  %v5832_v61 = vld [vmem:[#allocation5 + $0x264] sm:$0xf] }
  0xc4   :  { %2719 = vmatpush.bf16.msrb.mxu1 %v4991_v58  ;;  %v6299_v58 = vpack.c.bf16 %v1090_v51, %v1090_v51  ;;  %2742 = vmatpush.bf16.msrb.mxu3 %v5295_v53  ;;  %v5070_v51 = vld [vmem:[#allocation5 + $0x620] sm:$0xf]  ;;  %v221_v53 = vperm.slane %v6292_v2, 3 }
  0xc5   :  { %v5071_v54 = vor.u32 %v5954_v52, %v5070_v51  ;;  %v5876_v51 = vld [vmem:[#allocation5 + $0x3c4] sm:$0xf]  ;;  %v4768_v52 = vld [vmem:[#allocation5 + $0x3d0] sm:$0xf0] }
  0xc6   :  { %2707 = vmatpush.bf16.msrb.mxu0 %v4847_v4  ;;  %v5118_v4 = vld [vmem:[#allocation5 + $0x680] sm:$0xf]  ;;  %2672 = vmatmul.bf16.vlgmr.msra.gmra.mxu1 %v6299_v58 }
  0xc7   :  { %v5119_v10 = vor.u32 %v5966_v6, %v5118_v4  ;;  %v5054_v4 = vld [vmem:[#allocation5 + $0x600] sm:$0xf]  ;;  %v5950_v6 = vld [vmem:[#allocation5 + $0x60c] sm:$0xf0] }
  0xc8   :  { %2720 = vmatpush.bf16.msrb.mxu1 %v4975_v12  ;;  %v931_v12 = vpop.f32.mrf.mxu3  ;;  %2743 = vmatpush.bf16.msrb.mxu3 %v5279_v3  ;;  %v5055_v7 = vor.u32 %v5950_v6, %v5054_v4  ;;  %v5828_v4 = vld [vmem:[#allocation5 + $0x244] sm:$0xf]  ;;  %v4576_v6 = vld [vmem:[#allocation5 + $0x250] sm:$0xf0] }
  0xc9   :  { %2732 = vmatpush.bf16.msrb.mxu2 %v5119_v10  ;;  %v5760_v12 = vld [vmem:[#allocation5 + $0x24] sm:$0xf] }
  0xca   :  { %2708 = vmatpush.bf16.msrb.mxu0 %v4831_v23  ;;  %v4368_v23 = vld [vmem:[#allocation5 + $0xb0] sm:$0xf0] }
  0xcb   :  { %v4371_v30 = vor.u32 %v5776_v22, %v4368_v23  ;;  %v5199_v23 = vor.u32 %v5986_v21, %v5198_v20  ;;  %v4704_v20 = vld [vmem:[#allocation5 + $0x350] sm:$0xf0] }
  0xcc   :  { %2721 = vmatpush.bf16.msrb.mxu1 %v4959_v29  ;;  %2744 = vmatpush.bf16.msrb.mxu3 %v5263_v16  ;;  %v220_v29 = vperm.slane %v6292_v2, 2 }
  0xcd   :  { %2733 = vmatpush.bf16.msrb.mxu2 %v5103_v25  ;;  %v4432_v25 = vld [vmem:[#allocation5 + $0x130] sm:$0xf0] }
  0xce   :  { %2709 = vmatpush.bf16.msrb.mxu0 %v4815_v42  ;;  %v5994_v42 = vld [vmem:[#allocation5 + $0x76c] sm:$0xf0] }
  0xcf   :  { %v5231_v5 = vor.u32 %v5994_v42, %v5230_v41  ;;  %v5880_v41 = vld [vmem:[#allocation5 + $0x3e4] sm:$0xf]  ;;  %v4784_v42 = vld [vmem:[#allocation5 + $0x3f0] sm:$0xf0] }
  0xd0   :  { %2722 = vmatpush.bf16.msrb.mxu1 %v4943_v47  ;;  %2745 = vmatpush.bf16.msrb.mxu3 %v5247_v28  ;;  %v5800_v47 = vld [vmem:[#allocation5 + $0x164] sm:$0xf]  ;;  %v4640_v28 = vld [vmem:[#allocation5 + $0x2d0] sm:$0xf0]  ;;  %v4787_v44 = vor.u32 %v5880_v41, %v4784_v42 }
  0xd1   :  { %2734 = vmatpush.bf16.msrb.mxu2 %v5087_v39  ;;  %v4467_v62 = vor.u32 %v5800_v47, %v4464_v50  ;;  %v4643_v31 = vor.u32 %v5844_v27, %v4640_v28  ;;  %v5788_v39 = vld [vmem:[#allocation5 + $0x104] sm:$0xf]  ;;  %v4544_v27 = vld [vmem:[#allocation5 + $0x210] sm:$0xf0] }
  0xd2   :  { %2710 = vmatpush.bf16.msrb.mxu0 %v4799_v60  ;;  %v942_v43 = vpop.f32.mrf.mxu0  ;;  %v5990_v60 = vld [vmem:[#allocation5 + $0x74c] sm:$0xf0]  ;;  %v5944_v42 = vld [vmem:[#allocation5 + $0x5e4] sm:$0xf] }
  0xd3   :  { %v943_v48 = vadd.f32 %v942_v43, %v220_v29  ;;  %v5215_v63 = vor.u32 %v5990_v60, %v5214_v59  ;;  %v4307_v29 = vor.u32 %v5760_v12, %v4304_v17  ;;  %v4752_v59 = vld [vmem:[#allocation5 + $0x3b0] sm:$0xf0] }
  0xd4   :  { %2723 = vmatpush.bf16.msrb.mxu1 %v4927_v1  ;;  %v955_v49 = vpop.f32.mrf.mxu1  ;;  %2746 = vmatpush.bf16.msrb.mxu3 %v5231_v5  ;;  %v4448_v1 = vld [vmem:[#allocation5 + $0x150] sm:$0xf0]  ;;  %v4755_v60 = vor.u32 %v5872_v57, %v4752_v59 }
  0xd5   :  { %v956_v55 = vadd.f32 %v955_v49, %v943_v48  ;;  %2735 = vmatpush.bf16.msrb.mxu2 %v5071_v54  ;;  %v5836_v54 = vld [vmem:[#allocation5 + $0x284] sm:$0xf]  ;;  %v5024_v57 = vld [vmem:[#allocation5 + $0x5d0] sm:$0xf0] }
  0xd6   :  { %2755 = vmatpush.bf16.msra.mxu0 %v4403_v0  ;;  %v5796_v0 = vld [vmem:[#allocation5 + $0x144] sm:$0xf] }
  0xd7   :  { %v1091_v3 = vmax.f32 %v956_v55, 0.0  ;;  %v4451_v18 = vor.u32 %v5796_v0, %v4448_v1  ;;  %v4608_v55 = vld [vmem:[#allocation5 + $0x290] sm:$0xf0]  ;;  %v5868_v0 = vld [vmem:[#allocation5 + $0x384] sm:$0xf] }
  0xd8   :  { %2768 = vmatpush.bf16.msra.mxu1 %v4531_v9  ;;  %2747 = vmatpush.bf16.msrb.mxu3 %v5215_v63  ;;  %v968_v10 = vpop.f32.mrf.mxu2  ;;  %v4736_v1 = vld [vmem:[#allocation5 + $0x390] sm:$0xf0] }
  0xd9   :  { %v6304_v9 = vpack.c.bf16 %v1091_v3, %v1091_v3  ;;  %v969_v14 = vadd.f32 %v968_v10, %v221_v53  ;;  %2736 = vmatpush.bf16.msrb.mxu2 %v5055_v7  ;;  %v4771_v53 = vor.u32 %v5876_v51, %v4768_v52  ;;  %v4739_v3 = vor.u32 %v5868_v0, %v4736_v1  ;;  %v5864_v10 = vld [vmem:[#allocation5 + $0x364] sm:$0xf] }
  0xda   :  { %2756 = vmatpush.bf16.msra.mxu0 %v4387_v19  ;;  %v981_v15 = vpop.f32.mrf.mxu3  ;;  %v944_v16 = vpop.f32.mrf.mxu0  ;;  %v4659_v19 = vor.u32 %v5848_v8, %v4656_v13  ;;  %v222_v7 = vperm.slane %v6292_v2, 4  ;;  %v4579_v8 = vor.u32 %v5828_v4, %v4576_v6  ;;  %v5936_v1 = vld [vmem:[#allocation5 + $0x5a4] sm:$0xf]  ;;  %v4848_v6 = vld [vmem:[#allocation5 + $0x470] sm:$0xf0] }
  0xdb   :  { %2685 = vmatmul.bf16.vlgmr.msra.gmra.mxu2 %v6304_v9  ;;  %v982_v26 = vadd.f32 %v981_v15, %v969_v14  ;;  %v5824_v14 = vld [vmem:[#allocation5 + $0x224] sm:$0xf]  ;;  %v4560_v15 = vld [vmem:[#allocation5 + $0x230] sm:$0xf0] }
  0xdc   :  { %2769 = vmatpush.bf16.msra.mxu1 %v4515_v24  ;;  %v957_v22 = vpop.f32.mrf.mxu1  ;;  %v5792_v24 = vld [vmem:[#allocation5 + $0x124] sm:$0xf]  ;;  %2748 = vmatpush.bf16.msrb.mxu3 %v5199_v23  ;;  %v4912_v23 = vld [vmem:[#allocation5 + $0x4f0] sm:$0xf0] }
  0xdd   :  { %2781 = vmatpush.bf16.msra.mxu2 %v4659_v19  ;;  %v1092_v35 = vmax.f32 %v982_v26, 0.0  ;;  %v4435_v37 = vor.u32 %v5792_v24, %v4432_v25  ;;  %v5860_v19 = vld [vmem:[#allocation5 + $0x344] sm:$0xf]  ;;  %v223_v25 = vperm.slane %v6292_v2, 5 }
  0xde   :  { %2757 = vmatpush.bf16.msra.mxu0 %v4371_v30  ;;  %v5756_v30 = vld [vmem:[#allocation5 + $0x4] sm:$0xf]  ;;  %v4707_v24 = vor.u32 %v5860_v19, %v4704_v20  ;;  %v4816_v20 = vld [vmem:[#allocation5 + $0x430] sm:$0xf0] }
  0xdf   :  { %v6307_v43 = vpack.c.bf16 %v1092_v35, %v1092_v35  ;;  %v4291_v47 = vor.u32 %v5756_v30, %v4288_v36  ;;  %v5912_v22 = vld [vmem:[#allocation5 + $0x4e4] sm:$0xf]  ;;  %v4896_v35 = vld [vmem:[#allocation5 + $0x4d0] sm:$0xf0] }
  0xe0   :  { %2770 = vmatpush.bf16.msra.mxu1 %v4499_v33  ;;  %v5982_v33 = vld [vmem:[#allocation5 + $0x70c] sm:$0xf0]  ;;  %v970_v5 = vpop.f32.mrf.mxu2  ;;  %v5820_v26 = vld [vmem:[#allocation5 + $0x204] sm:$0xf]  ;;  %v4915_v30 = vor.u32 %v5912_v22, %v4912_v23 }
  0xe1   :  { %v5183_v38 = vor.u32 %v5982_v33, %v5182_v32  ;;  %2782 = vmatpush.bf16.msra.mxu2 %v4643_v31  ;;  %2698 = vmatmul.bf16.vlgmr.msra.gmra.mxu3 %v6307_v43  ;;  %v5908_v31 = vld [vmem:[#allocation5 + $0x4c4] sm:$0xf]  ;;  %v5040_v5 = vld [vmem:[#allocation5 + $0x5f0] sm:$0xf0] }
  0xe2   :  { %2758 = vmatpush.bf16.msra.mxu0 %v4355_v40  ;;  %v4416_v40 = vld [vmem:[#allocation5 + $0x110] sm:$0xf0]  ;;  %v983_v49 = vpop.f32.mrf.mxu3  ;;  %v5856_v36 = vld [vmem:[#allocation5 + $0x324] sm:$0xf] }
  0xe3   :  { %2749 = vmatpush.bf16.msrb.mxu3 %v5183_v38  ;;  %v4419_v50 = vor.u32 %v5788_v39, %v4416_v40  ;;  %v5904_v49 = vld [vmem:[#allocation5 + $0x4a4] sm:$0xf] }
  0xe4   :  { %2771 = vmatpush.bf16.msra.mxu1 %v4483_v46  ;;  %v4624_v46 = vld [vmem:[#allocation5 + $0x2b0] sm:$0xf0]  ;;  %v5896_v4 = vld [vmem:[#allocation5 + $0x464] sm:$0xf] }
  0xe5   :  { %v4627_v48 = vor.u32 %v5840_v45, %v4624_v46  ;;  %v4899_v46 = vor.u32 %v5908_v31, %v4896_v35  ;;  %v5888_v19 = vld [vmem:[#allocation5 + $0x424] sm:$0xf]  ;;  %v4406_v35 = vld [vmem:[#allocation5 + $0xe8] sm:$0xf] }
  0xe6   :  { %2759 = vmatpush.bf16.msra.mxu0 %v4339_v56  ;;  %v4611_v56 = vor.u32 %v5836_v54, %v4608_v55 }
  0xe7   :  { %2794 = vmatpush.bf16.msra.mxu3 %v4787_v44  ;;  %2783 = vmatpush.bf16.msra.mxu2 %v4627_v48  ;;  %v4672_v48 = vld [vmem:[#allocation5 + $0x310] sm:$0xf0] }
  0xe8   :  { %2772 = vmatpush.bf16.msra.mxu1 %v4467_v62  ;;  %v4592_v62 = vld [vmem:[#allocation5 + $0x270] sm:$0xf0] }
  0xe9   :  { %v4595_v63 = vor.u32 %v5832_v61, %v4592_v62  ;;  %v4864_v61 = vld [vmem:[#allocation5 + $0x490] sm:$0xf0] }
  0xea   :  { %2760 = vmatpush.bf16.msra.mxu0 %v4323_v11  ;;  %v4720_v11 = vld [vmem:[#allocation5 + $0x370] sm:$0xf0] }
  0xeb   :  { %2795 = vmatpush.bf16.msra.mxu3 %v4771_v53  ;;  %2784 = vmatpush.bf16.msra.mxu2 %v4611_v56  ;;  %v4723_v12 = vor.u32 %v5864_v10, %v4720_v11  ;;  %v5043_v53 = vor.u32 %v5944_v42, %v5040_v5  ;;  %v5940_v56 = vld [vmem:[#allocation5 + $0x5c4] sm:$0xf]  ;;  %v4992_v11 = vld [vmem:[#allocation5 + $0x590] sm:$0xf0] }
  0xec   :  { %2773 = vmatpush.bf16.msra.mxu1 %v4451_v18  ;;  %v4563_v18 = vor.u32 %v5824_v14, %v4560_v15  ;;  %v5932_v10 = vld [vmem:[#allocation5 + $0x584] sm:$0xf]  ;;  %v224_v15 = vperm.slane %v6292_v2, 6  ;;  %v4944_v42 = vld [vmem:[#allocation5 + $0x530] sm:$0xf0] }
  0xed   :  { %v4995_v14 = vor.u32 %v5932_v10, %v4992_v11 }
  0xee   :  { %2761 = vmatpush.bf16.msra.mxu0 %v4307_v29  ;;  %v4547_v29 = vor.u32 %v5820_v26, %v4544_v27  ;;  %v5924_v26 = vld [vmem:[#allocation5 + $0x544] sm:$0xf]  ;;  %v4960_v27 = vld [vmem:[#allocation5 + $0x550] sm:$0xf0] }
  0xef   :  { %2796 = vmatpush.bf16.msra.mxu3 %v4755_v60  ;;  %2785 = vmatpush.bf16.msra.mxu2 %v4595_v63  ;;  %v5900_v60 = vld [vmem:[#allocation5 + $0x484] sm:$0xf]  ;;  %v5027_v63 = vor.u32 %v5940_v56, %v5024_v57  ;;  %v4928_v57 = vld [vmem:[#allocation5 + $0x510] sm:$0xf0] }
  0xf0   :  { %2774 = vmatpush.bf16.msra.mxu1 %v4435_v37  ;;  %v4688_v37 = vld [vmem:[#allocation5 + $0x330] sm:$0xf0]  ;;  %v4867_v0 = vor.u32 %v5900_v60, %v4864_v61 }
  0xf1   :  { %v4691_v41 = vor.u32 %v5856_v36, %v4688_v37  ;;  %v5787_v36 = vld [vmem:[#allocation5 + $0xf4] sm:$0xf0]  ;;  %v225_v37 = vperm.slane %v6292_v2, 7  ;;  %v5296_v60 = vld [vmem:[#allocation5 + $0x7f0] sm:$0xf0] }
  0xf2   :  { %2762 = vmatpush.bf16.msra.mxu0 %v4291_v47  ;;  %v994_v13 = vpop.f32.mrf.mxu0  ;;  %v5852_v47 = vld [vmem:[#allocation5 + $0x304] sm:$0xf] }
  0xf3   :  { %2797 = vmatpush.bf16.msra.mxu3 %v4739_v3  ;;  %2786 = vmatpush.bf16.msra.mxu2 %v4579_v8  ;;  %v995_v16 = vadd.f32 %v994_v13, %v222_v7  ;;  %v4675_v51 = vor.u32 %v5852_v47, %v4672_v48  ;;  %v5008_v3 = vld [vmem:[#allocation5 + $0x5b0] sm:$0xf0]  ;;  %v4851_v8 = vor.u32 %v5896_v4, %v4848_v6  ;;  %v4374_v6 = vld [vmem:[#allocation5 + $0xa8] sm:$0xf] }
  0xf4   :  { %2775 = vmatpush.bf16.msra.mxu1 %v4419_v50  ;;  %v1007_v17 = vpop.f32.mrf.mxu1  ;;  %v4880_v50 = vld [vmem:[#allocation5 + $0x4b0] sm:$0xf0]  ;;  %v5011_v7 = vor.u32 %v5936_v1, %v5008_v3  ;;  %v5819_v1 = vld [vmem:[#allocation5 + $0x1f4] sm:$0xf0]  ;;  %v5968_v3 = vld [vmem:[#allocation5 + $0x6a4] sm:$0xf] }
  0xf5   :  { %v1008_v21 = vadd.f32 %v1007_v17, %v995_v16  ;;  %v4883_v55 = vor.u32 %v5904_v49, %v4880_v50  ;;  %v4832_v13 = vld [vmem:[#allocation5 + $0x450] sm:$0xf0]  ;;  %v5928_v17 = vld [vmem:[#allocation5 + $0x564] sm:$0xf]  ;;  %v4390_v49 = vld [vmem:[#allocation5 + $0xc8] sm:$0xf] }
  0xf6   :  { %v5152_v48 = vld [vmem:[#allocation5 + $0x6d0] sm:$0xf0]  ;;  %v5783_v50 = vld [vmem:[#allocation5 + $0xd4] sm:$0xf0] }
  0xf7   :  { %2798 = vmatpush.bf16.msra.mxu3 %v4723_v12  ;;  %2787 = vmatpush.bf16.msra.mxu2 %v4563_v18  ;;  %v1093_v28 = vmax.f32 %v1008_v21, 0.0  ;;  %v5892_v12 = vld [vmem:[#allocation5 + $0x444] sm:$0xf]  ;;  %v4976_v18 = vld [vmem:[#allocation5 + $0x570] sm:$0xf0] }
  0xf8   :  { %v1020_v33 = vpop.f32.mrf.mxu2  ;;  %v4835_v16 = vor.u32 %v5892_v12, %v4832_v13  ;;  %v4979_v22 = vor.u32 %v5928_v17, %v4976_v18  ;;  %v5136_v4 = vld [vmem:[#allocation5 + $0x6b0] sm:$0xf0]  ;;  %v6004_v13 = vld [vmem:[#allocation5 + $0x7c4] sm:$0xf]  ;;  %v4518_v18 = vld [vmem:[#allocation5 + $0x1c8] sm:$0xf] }
  0xf9   :  { %v6312_v32 = vpack.c.bf16 %v1093_v28, %v1093_v28  ;;  %v1021_v38 = vadd.f32 %v1020_v33, %v223_v25  ;;  %v4819_v25 = vor.u32 %v5888_v19, %v4816_v20  ;;  %v5884_v28 = vld [vmem:[#allocation5 + $0x404] sm:$0xf]  ;;  %v5168_v33 = vld [vmem:[#allocation5 + $0x6f0] sm:$0xf0]  ;;  %v5815_v19 = vld [vmem:[#allocation5 + $0x1d4] sm:$0xf0] }
  0xfa   :  { %v1033_v39 = vpop.f32.mrf.mxu3  ;;  %v996_v40 = vpop.f32.mrf.mxu0  ;;  %v5964_v20 = vld [vmem:[#allocation5 + $0x684] sm:$0xf] }
  0xfb   :  { %2799 = vmatpush.bf16.msra.mxu3 %v4707_v24  ;;  %2788 = vmatpush.bf16.msra.mxu2 %v4547_v29  ;;  %v1034_v45 = vadd.f32 %v1033_v39, %v1021_v38  ;;  %v4800_v29 = vld [vmem:[#allocation5 + $0x410] sm:$0xf0]  ;;  %v4963_v38 = vor.u32 %v5924_v26, %v4960_v27  ;;  %v4519_v27 = vor.u32 %v5815_v19, %v4518_v18  ;;  %v4918_v18 = vld [vmem:[#allocation5 + $0x4e8] sm:$0xf]  ;;  %v5915_v19 = vld [vmem:[#allocation5 + $0x4f4] sm:$0xf0] }
  0xfc   :  { %2711 = vmatmul.bf16.vlgmr.msrb.gmra.mxu0 %v6312_v32  ;;  %v1009_v44 = vpop.f32.mrf.mxu1  ;;  %v4803_v40 = vor.u32 %v5884_v28, %v4800_v29  ;;  %v6000_v28 = vld [vmem:[#allocation5 + $0x7a4] sm:$0xf] }
  0xfd   :  { %2807 = vmatpush.bf16.msrb.mxu0 %v4915_v30  ;;  %v1094_v52 = vmax.f32 %v1034_v45, 0.0  ;;  %v5976_v30 = vld [vmem:[#allocation5 + $0x6e4] sm:$0xf]  ;;  %v4407_v45 = vor.u32 %v5787_v36, %v4406_v35  ;;  %v5811_v35 = vld [vmem:[#allocation5 + $0x1b4] sm:$0xf0] }
  0xfe   :  { %v5171_v44 = vor.u32 %v5976_v30, %v5168_v33  ;;  %v4502_v33 = vld [vmem:[#allocation5 + $0x1a8] sm:$0xf] }
  0xff   :  { %2800 = vmatpush.bf16.msra.mxu3 %v4691_v41  ;;  %v6315_v54 = vpack.c.bf16 %v1094_v52, %v1094_v52  ;;  %v5920_v41 = vld [vmem:[#allocation5 + $0x524] sm:$0xf]  ;;  %v4342_v36 = vld [vmem:[#allocation5 + $0x68] sm:$0xf] }
 0x100   :  { %v1022_v59 = vpop.f32.mrf.mxu2  ;;  %v4947_v2 = vor.u32 %v5920_v41, %v4944_v42  ;;  %v4503_v41 = vor.u32 %v5811_v35, %v4502_v33  ;;  %v5996_v42 = vld [vmem:[#allocation5 + $0x784] sm:$0xf]  ;;  %v4646_v33 = vld [vmem:[#allocation5 + $0x2c8] sm:$0xf] }
 0x101   :  { %2808 = vmatpush.bf16.msrb.mxu0 %v4899_v46  ;;  %2724 = vmatmul.bf16.vlgmr.msrb.gmra.mxu1 %v6315_v54  ;;  %v5972_v46 = vld [vmem:[#allocation5 + $0x6c4] sm:$0xf]  ;;  %v4902_v35 = vld [vmem:[#allocation5 + $0x4c8] sm:$0xf] }
 0x102   :  { %v1035_v62 = vpop.f32.mrf.mxu3  ;;  %2820 = vmatpush.bf16.msrb.mxu1 %v5043_v53  ;;  %v6008_v59 = vld [vmem:[#allocation5 + $0x7e4] sm:$0xf] }
 0x103   :  { %2801 = vmatpush.bf16.msra.mxu3 %v4675_v51  ;;  %v5155_v62 = vor.u32 %v5972_v46, %v5152_v48  ;;  %v5299_v11 = vor.u32 %v6008_v59, %v5296_v60  ;;  %v4486_v46 = vld [vmem:[#allocation5 + $0x188] sm:$0xf]  ;;  %v5803_v60 = vld [vmem:[#allocation5 + $0x174] sm:$0xf0] }
 0x104   :  { %v4470_v59 = vld [vmem:[#allocation5 + $0x168] sm:$0xf] }
 0x105   :  { %2809 = vmatpush.bf16.msrb.mxu0 %v4883_v55  ;;  %v5916_v55 = vld [vmem:[#allocation5 + $0x504] sm:$0xf] }
 0x106   :  { %2821 = vmatpush.bf16.msrb.mxu1 %v5027_v63  ;;  %v4391_v63 = vor.u32 %v5783_v50, %v4390_v49  ;;  %v4931_v10 = vor.u32 %v5916_v55, %v4928_v57  ;;  %v4326_v49 = vld [vmem:[#allocation5 + $0x48] sm:$0xf]  ;;  %v5767_v50 = vld [vmem:[#allocation5 + $0x54] sm:$0xf0]  ;;  %v5992_v55 = vld [vmem:[#allocation5 + $0x764] sm:$0xf] }
 0x107   :  { %v5232_v57 = vld [vmem:[#allocation5 + $0x770] sm:$0xf0] }
 0x109   :  { %2810 = vmatpush.bf16.msrb.mxu0 %v4867_v0  ;;  %v4534_v0 = vld [vmem:[#allocation5 + $0x1e8] sm:$0xf] }
 0x10a   :  { %2822 = vmatpush.bf16.msrb.mxu1 %v5011_v7  ;;  %v5779_v7 = vld [vmem:[#allocation5 + $0xb4] sm:$0xf0]  ;;  %v4535_v12 = vor.u32 %v5819_v1, %v4534_v0  ;;  %v5952_v0 = vld [vmem:[#allocation5 + $0x624] sm:$0xf]  ;;  %v5072_v1 = vld [vmem:[#allocation5 + $0x630] sm:$0xf0] }
 0x10b   :  { %v4375_v17 = vor.u32 %v5779_v7, %v4374_v6  ;;  %v5988_v6 = vld [vmem:[#allocation5 + $0x744] sm:$0xf] }
 0x10c   :  { %2763 = vmatmul.bf16.vlgmr.msra.gmra.mxu0 %v6296_v34 }
 0x10d   :  { %2811 = vmatpush.bf16.msrb.mxu0 %v4851_v8 }
 0x10e   :  { %2823 = vmatpush.bf16.msrb.mxu1 %v4995_v14  ;;  %v5280_v14 = vld [vmem:[#allocation5 + $0x7d0] sm:$0xf0] }
 0x10f   :  { %v5283_v26 = vor.u32 %v6004_v13, %v5280_v14  ;;  %v5948_v13 = vld [vmem:[#allocation5 + $0x604] sm:$0xf]  ;;  %v4294_v14 = vld [vmem:[#allocation5 + $0x8] sm:$0xf] }
 0x111   :  { %2812 = vmatpush.bf16.msrb.mxu0 %v4835_v16  ;;  %2776 = vmatmul.bf16.vlgmr.msra.gmra.mxu1 %v6299_v58  ;;  %v5139_v16 = vor.u32 %v5968_v3, %v5136_v4  ;;  %v5235_v3 = vor.u32 %v5992_v55, %v5232_v57  ;;  %v4471_v4 = vor.u32 %v5803_v60, %v4470_v59  ;;  %v4630_v55 = vld [vmem:[#allocation5 + $0x2a8] sm:$0xf] }
 0x112   :  { %v1046_v21 = vpop.f32.mrf.mxu0  ;;  %2824 = vmatpush.bf16.msrb.mxu1 %v4979_v22  ;;  %v5120_v22 = vld [vmem:[#allocation5 + $0x690] sm:$0xf0]  ;;  %v4774_v60 = vld [vmem:[#allocation5 + $0x3c8] sm:$0xf] }
 0x113   :  { %v1047_v23 = vadd.f32 %v1046_v21, %v224_v15  ;;  %v5123_v29 = vor.u32 %v5964_v20, %v5120_v22  ;;  %v4662_v22 = vld [vmem:[#allocation5 + $0x2e8] sm:$0xf] }
 0x114   :  { %v1059_v24 = vpop.f32.mrf.mxu1 }
 0x115   :  { %v1060_v31 = vadd.f32 %v1059_v24, %v1047_v23  ;;  %2813 = vmatpush.bf16.msrb.mxu0 %v4819_v25  ;;  %v4358_v23 = vld [vmem:[#allocation5 + $0x88] sm:$0xf]  ;;  %v5775_v24 = vld [vmem:[#allocation5 + $0x94] sm:$0xf0] }
 0x116   :  { %2825 = vmatpush.bf16.msrb.mxu1 %v4963_v38  ;;  %v4359_v30 = vor.u32 %v5775_v24, %v4358_v23  ;;  %v5960_v38 = vld [vmem:[#allocation5 + $0x664] sm:$0xf]  ;;  %v5851_v23 = vld [vmem:[#allocation5 + $0x2f4] sm:$0xf0] }
 0x117   :  { %v1095_v39 = vmax.f32 %v1060_v31, 0.0  ;;  %v5264_v31 = vld [vmem:[#allocation5 + $0x7b0] sm:$0xf0]  ;;  %v5984_v24 = vld [vmem:[#allocation5 + $0x724] sm:$0xf] }
 0x118   :  { %v1072_v47 = vpop.f32.mrf.mxu2 }
 0x119   :  { %v6322_v5 = vpack.c.bf16 %v1095_v39, %v1095_v39  ;;  %v1073_v51 = vadd.f32 %v1072_v47, %v225_v37  ;;  %2814 = vmatpush.bf16.msrb.mxu0 %v4803_v40  ;;  %v5771_v37 = vld [vmem:[#allocation5 + $0x74] sm:$0xf0]  ;;  %v5104_v39 = vld [vmem:[#allocation5 + $0x670] sm:$0xf0]  ;;  %v5267_v40 = vor.u32 %v6000_v28, %v5264_v31  ;;  %v4663_v31 = vor.u32 %v5851_v23, %v4662_v22  ;;  %v4598_v22 = vld [vmem:[#allocation5 + $0x268] sm:$0xf] }
 0x11a   :  { %v1085_v52 = vpop.f32.mrf.mxu3  ;;  %v1048_v53 = vpop.f32.mrf.mxu0  ;;  %2826 = vmatpush.bf16.msrb.mxu1 %v4947_v2  ;;  %v5807_v47 = vld [vmem:[#allocation5 + $0x194] sm:$0xf0]  ;;  %v5107_v48 = vor.u32 %v5960_v38, %v5104_v39 }
 0x11b   :  { %2737 = vmatmul.bf16.vlgmr.msrb.gmra.mxu2 %v6322_v5  ;;  %v1086_v61 = vadd.f32 %v1085_v52, %v1073_v51  ;;  %v5956_v51 = vld [vmem:[#allocation5 + $0x644] sm:$0xf]  ;;  %v5088_v52 = vld [vmem:[#allocation5 + $0x650] sm:$0xf0]  ;;  %v4487_v2 = vor.u32 %v5807_v47, %v4486_v46  ;;  %v5795_v28 = vld [vmem:[#allocation5 + $0x134] sm:$0xf0] }
 0x11c   :  { %v1061_v56 = vpop.f32.mrf.mxu1  ;;  %2833 = vmatpush.bf16.msrb.mxu2 %v5171_v44  ;;  %2815 = vmatmul.bf16.vlgmr.msrb.gmra.mxu0 %v6312_v32  ;;  %v4343_v44 = vor.u32 %v5771_v37, %v4342_v36  ;;  %v5911_v36 = vld [vmem:[#allocation5 + $0x4d4] sm:$0xf0] }
 0x11d   :  { %2859 = vmatpush.bf16.msra.mxu0 %v4407_v45  ;;  %v1096_v8 = vmax.f32 %v1086_v61, 0.0  ;;  %v5248_v45 = vld [vmem:[#allocation5 + $0x790] sm:$0xf0]  ;;  %v4327_v56 = vor.u32 %v5767_v50, %v4326_v49  ;;  %v5091_v61 = vor.u32 %v5956_v51, %v5088_v52  ;;  %v5847_v39 = vld [vmem:[#allocation5 + $0x2d4] sm:$0xf0]  ;;  %v4903_v46 = vor.u32 %v5911_v36, %v4902_v35 }
 0x11e   :  { %2827 = vmatpush.bf16.msrb.mxu1 %v4931_v10  ;;  %v5251_v53 = vor.u32 %v5996_v42, %v5248_v45  ;;  %v4454_v10 = vld [vmem:[#allocation5 + $0x148] sm:$0xf]  ;;  %v5883_v47 = vld [vmem:[#allocation5 + $0x3f4] sm:$0xf0]  ;;  %v4647_v50 = vor.u32 %v5847_v39, %v4646_v33 }
 0x11f   :  { %v6326_v15 = vpack.c.bf16 %v1096_v8, %v1096_v8  ;;  %v5216_v8 = vld [vmem:[#allocation5 + $0x750] sm:$0xf0]  ;;  %v4422_v42 = vld [vmem:[#allocation5 + $0x108] sm:$0xf]  ;;  %v5947_v49 = vld [vmem:[#allocation5 + $0x5f4] sm:$0xf0] }
 0x120   :  { %2834 = vmatpush.bf16.msrb.mxu2 %v5155_v62  ;;  %v1074_v21 = vpop.f32.mrf.mxu2  ;;  %v4310_v62 = vld [vmem:[#allocation5 + $0x28] sm:$0xf]  ;;  %v5219_v20 = vor.u32 %v5988_v6, %v5216_v8  ;;  %v5907_v52 = vld [vmem:[#allocation5 + $0x4b4] sm:$0xf0]  ;;  %v1361_v6 = vld [vmem:[%s6468_s4] sm:$0xf] }
 0x121   :  { %2860 = vmatpush.bf16.msra.mxu0 %v4391_v63  ;;  %2750 = vmatmul.bf16.vlgmr.msrb.gmra.mxu3 %v6326_v15  ;;  %v5763_v63 = vld [vmem:[#allocation5 + $0x34] sm:$0xf0]  ;;  %v4790_v45 = vld [vmem:[#allocation5 + $0x3e8] sm:$0xf] }
 0x122   :  { %v1087_v25 = vpop.f32.mrf.mxu3  ;;  %2846 = vmatpush.bf16.msrb.mxu3 %v5299_v11  ;;  %2872 = vmatpush.bf16.msra.mxu1 %v4535_v12  ;;  %v4311_v7 = vor.u32 %v5763_v63, %v4310_v62  ;;  %v5799_v11 = vld [vmem:[#allocation5 + $0x154] sm:$0xf0]  ;;  %v5075_v12 = vor.u32 %v5952_v0, %v5072_v1  ;;  %v4886_v51 = vld [vmem:[#allocation5 + $0x4a8] sm:$0xf]  ;;  %v4791_v57 = vor.u32 %v5883_v47, %v4790_v45 }
 0x123   :  { %2828 = vmatmul.bf16.vlgmr.msrb.gmra.mxu1 %v6315_v54  ;;  %v4455_v21 = vor.u32 %v5799_v11, %v4454_v10  ;;  %v5879_v62 = vld [vmem:[#allocation5 + $0x3d4] sm:$0xf0]  ;;  %v5030_v63 = vld [vmem:[#allocation5 + $0x5c8] sm:$0xf] }
 0x124   :  { %2835 = vmatpush.bf16.msrb.mxu2 %v5139_v16  ;;  %v5759_v16 = vld [vmem:[#allocation5 + $0x14] sm:$0xf0]  ;;  %v4775_v10 = vor.u32 %v5879_v62, %v4774_v60  ;;  %v4838_v36 = vld [vmem:[#allocation5 + $0x448] sm:$0xf] }
 0x125   :  { %2861 = vmatpush.bf16.msra.mxu0 %v4375_v17  ;;  %v5056_v17 = vld [vmem:[#allocation5 + $0x610] sm:$0xf0]  ;;  %v4295_v25 = vor.u32 %v5759_v16, %v4294_v14  ;;  %v5943_v0 = vld [vmem:[#allocation5 + $0x5d4] sm:$0xf0]  ;;  %v5014_v16 = vld [vmem:[#allocation5 + $0x5a8] sm:$0xf] }
 0x126   :  { %2847 = vmatpush.bf16.msrb.mxu3 %v5283_v26  ;;  %2873 = vmatpush.bf16.msra.mxu1 %v4519_v27  ;;  %v5200_v26 = vld [vmem:[#allocation5 + $0x730] sm:$0xf0]  ;;  %v4438_v27 = vld [vmem:[#allocation5 + $0x128] sm:$0xf]  ;;  %v5839_v8 = vld [vmem:[#allocation5 + $0x294] sm:$0xf0]  ;;  %v5031_v11 = vor.u32 %v5943_v0, %v5030_v63 }
 0x127   :  { %v5203_v37 = vor.u32 %v5984_v24, %v5200_v26  ;;  %v4439_v38 = vor.u32 %v5795_v28, %v4438_v27  ;;  %v5835_v23 = vld [vmem:[#allocation5 + $0x274] sm:$0xf0]  ;;  %v4742_v27 = vld [vmem:[#allocation5 + $0x388] sm:$0xf] }
 0x128   :  { %2836 = vmatpush.bf16.msrb.mxu2 %v5123_v29  ;;  %v5059_v29 = vor.u32 %v5948_v13, %v5056_v17  ;;  %v5875_v13 = vld [vmem:[#allocation5 + $0x3b4] sm:$0xf0]  ;;  %v4599_v35 = vor.u32 %v5835_v23, %v4598_v22  ;;  %v4982_v47 = vld [vmem:[#allocation5 + $0x568] sm:$0xf] }
 0x129   :  { %2862 = vmatpush.bf16.msra.mxu0 %v4359_v30  ;;  %v4919_v30 = vor.u32 %v5915_v19, %v4918_v18  ;;  %v5939_v17 = vld [vmem:[#allocation5 + $0x5b4] sm:$0xf0]  ;;  %v1363_v18 = vperm.slane %v1361_v6, 0  ;;  %v4966_v62 = vld [vmem:[#allocation5 + $0x548] sm:$0xf] }
 0x12a   :  { %2848 = vmatpush.bf16.msrb.mxu3 %v5267_v40  ;;  %2874 = vmatpush.bf16.msra.mxu1 %v4503_v41  ;;  %v5980_v40 = vld [vmem:[#allocation5 + $0x704] sm:$0xf]  ;;  %v5184_v41 = vld [vmem:[#allocation5 + $0x710] sm:$0xf0]  ;;  %v5015_v26 = vor.u32 %v5939_v17, %v5014_v16  ;;  %v5831_v39 = vld [vmem:[#allocation5 + $0x254] sm:$0xf0] }
 0x12b   :  { %2789 = vmatmul.bf16.vlgmr.msra.gmra.mxu2 %v6304_v9  ;;  %v5927_v63 = vld [vmem:[#allocation5 + $0x554] sm:$0xf0] }
 0x12c   :  { %2837 = vmatpush.bf16.msrb.mxu2 %v5107_v48  ;;  %v5046_v48 = vld [vmem:[#allocation5 + $0x5e8] sm:$0xf]  ;;  %v5823_v6 = vld [vmem:[#allocation5 + $0x214] sm:$0xf0] }
 0x12d   :  { %2863 = vmatpush.bf16.msra.mxu0 %v4343_v44  ;;  %v5791_v44 = vld [vmem:[#allocation5 + $0x114] sm:$0xf0]  ;;  %v5047_v59 = vor.u32 %v5947_v49, %v5046_v48 }
 0x12e   :  { %2849 = vmatpush.bf16.msrb.mxu3 %v5251_v53  ;;  %2875 = vmatpush.bf16.msra.mxu1 %v4487_v2  ;;  %v5187_v53 = vor.u32 %v5980_v40, %v5184_v41  ;;  %v4423_v2 = vor.u32 %v5791_v44, %v4422_v42  ;;  %v4726_v42 = vld [vmem:[#allocation5 + $0x368] sm:$0xf]  ;;  %v5931_v48 = vld [vmem:[#allocation5 + $0x574] sm:$0xf0] }
 0x130   :  { %2838 = vmatpush.bf16.msrb.mxu2 %v5091_v61  ;;  %v4887_v61 = vor.u32 %v5907_v52, %v4886_v51  ;;  %v4822_v51 = vld [vmem:[#allocation5 + $0x428] sm:$0xf]  ;;  %v5891_v52 = vld [vmem:[#allocation5 + $0x434] sm:$0xf0] }
 0x131   :  { %2864 = vmatpush.bf16.msra.mxu0 %v4327_v56  ;;  %2802 = vmatmul.bf16.vlgmr.msra.gmra.mxu3 %v6307_v43  ;;  %v5843_v56 = vld [vmem:[#allocation5 + $0x2b4] sm:$0xf0]  ;;  %v4823_v60 = vor.u32 %v5891_v52, %v4822_v51  ;;  %v5286_v52 = vld [vmem:[#allocation5 + $0x7c8] sm:$0xf] }
 0x132   :  { %2850 = vmatpush.bf16.msrb.mxu3 %v5235_v3  ;;  %2876 = vmatpush.bf16.msra.mxu1 %v4471_v4  ;;  %v4631_v1 = vor.u32 %v5843_v56, %v4630_v55  ;;  %v4870_v3 = vld [vmem:[#allocation5 + $0x488] sm:$0xf]  ;;  %v5903_v4 = vld [vmem:[#allocation5 + $0x494] sm:$0xf0] }
 0x133   :  { %v4871_v14 = vor.u32 %v5903_v4, %v4870_v3  ;;  %v4806_v3 = vld [vmem:[#allocation5 + $0x408] sm:$0xf]  ;;  %v5887_v4 = vld [vmem:[#allocation5 + $0x414] sm:$0xf0] }
 0x134   :  { %2839 = vmatpush.bf16.msrb.mxu2 %v5075_v12  ;;  %v4758_v12 = vld [vmem:[#allocation5 + $0x3a8] sm:$0xf]  ;;  %v4807_v17 = vor.u32 %v5887_v4, %v4806_v3  ;;  %v5971_v51 = vld [vmem:[#allocation5 + $0x6b4] sm:$0xf0] }
 0x135   :  { %2865 = vmatpush.bf16.msra.mxu0 %v4311_v7  ;;  %v4614_v7 = vld [vmem:[#allocation5 + $0x288] sm:$0xf]  ;;  %v6003_v4 = vld [vmem:[#allocation5 + $0x7b4] sm:$0xf0] }
 0x136   :  { %2851 = vmatpush.bf16.msrb.mxu3 %v5219_v20  ;;  %2877 = vmatpush.bf16.msra.mxu1 %v4455_v21  ;;  %v4615_v19 = vor.u32 %v5839_v8, %v4614_v7  ;;  %v4854_v20 = vld [vmem:[#allocation5 + $0x468] sm:$0xf]  ;;  %v5899_v21 = vld [vmem:[#allocation5 + $0x474] sm:$0xf0]  ;;  %v5785_v7 = vld [vmem:[#allocation5 + $0xec] sm:$0xf] }
 0x137   :  { %v4855_v28 = vor.u32 %v5899_v21, %v4854_v20  ;;  %v4408_v8 = vld [vmem:[#allocation5 + $0xf8] sm:$0xf0]  ;;  %v5923_v20 = vld [vmem:[#allocation5 + $0x534] sm:$0xf0] }
 0x138   :  { %2840 = vmatpush.bf16.msrb.mxu2 %v5059_v29  ;;  %v5871_v29 = vld [vmem:[#allocation5 + $0x394] sm:$0xf0]  ;;  %v4411_v22 = vor.u32 %v5785_v7, %v4408_v8  ;;  %v4504_v7 = vld [vmem:[#allocation5 + $0x1b8] sm:$0xf0]  ;;  %v5769_v8 = vld [vmem:[#allocation5 + $0x6c] sm:$0xf] }
 0x139   :  { %2866 = vmatpush.bf16.msra.mxu0 %v4295_v25  ;;  %v4759_v25 = vor.u32 %v5875_v13, %v4758_v12  ;;  %v4743_v40 = vor.u32 %v5871_v29, %v4742_v27  ;;  %v5174_v12 = vld [vmem:[#allocation5 + $0x6e8] sm:$0xf]  ;;  %v5979_v13 = vld [vmem:[#allocation5 + $0x6f4] sm:$0xf0] }
 0x13a   :  { %2852 = vmatpush.bf16.msrb.mxu3 %v5203_v37  ;;  %2878 = vmatpush.bf16.msra.mxu1 %v4439_v38  ;;  %v2660_v24 = vpop.f32.mrf.mxu0  ;;  %v5895_v37 = vld [vmem:[#allocation5 + $0x454] sm:$0xf0]  ;;  %v4582_v38 = vld [vmem:[#allocation5 + $0x248] sm:$0xf]  ;;  %v5175_v23 = vor.u32 %v5979_v13, %v5174_v12 }
 0x13b   :  { %2841 = vmatmul.bf16.vlgmr.msrb.gmra.mxu2 %v6322_v5  ;;  %v2661_v33 = vadd.f32 %v2660_v24, %v1363_v18  ;;  %v4839_v45 = vor.u32 %v5895_v37, %v4838_v36  ;;  %v5859_v18 = vld [vmem:[#allocation5 + $0x334] sm:$0xf0]  ;;  %v5158_v24 = vld [vmem:[#allocation5 + $0x6c8] sm:$0xf] }
 0x13c   :  { %2885 = vmatpush.bf16.msra.mxu2 %v4663_v31  ;;  %2867 = vmatmul.bf16.vlgmr.msra.gmra.mxu0 %v6296_v34  ;;  %v5935_v31 = vld [vmem:[#allocation5 + $0x594] sm:$0xf0]  ;;  %v5302_v36 = vld [vmem:[#allocation5 + $0x7e8] sm:$0xf] }
 0x13d   :  { %2911 = vmatpush.bf16.msrb.mxu0 %v4919_v30  ;;  %v4998_v30 = vld [vmem:[#allocation5 + $0x588] sm:$0xf]  ;;  %v5975_v29 = vld [vmem:[#allocation5 + $0x6d4] sm:$0xf0] }
 0x13e   :  { %2853 = vmatpush.bf16.msrb.mxu3 %v5187_v53  ;;  %2879 = vmatpush.bf16.msra.mxu1 %v4423_v2  ;;  %v4999_v41 = vor.u32 %v5935_v31, %v4998_v30  ;;  %v4566_v53 = vld [vmem:[#allocation5 + $0x228] sm:$0xf]  ;;  %v5827_v2 = vld [vmem:[#allocation5 + $0x234] sm:$0xf0] }
 0x13f   :  { %v4567_v0 = vor.u32 %v5827_v2, %v4566_v53  ;;  %v4678_v30 = vld [vmem:[#allocation5 + $0x308] sm:$0xf]  ;;  %v5855_v31 = vld [vmem:[#allocation5 + $0x314] sm:$0xf0] }
 0x140   :  { %2886 = vmatpush.bf16.msra.mxu2 %v4647_v50  ;;  %v4583_v50 = vor.u32 %v5831_v39, %v4582_v38  ;;  %v6011_v38 = vld [vmem:[#allocation5 + $0x7f4] sm:$0xf0]  ;;  %v5817_v39 = vld [vmem:[#allocation5 + $0x1ec] sm:$0xf] }
 0x141   :  { %2912 = vmatpush.bf16.msrb.mxu0 %v4903_v46  ;;  %2880 = vmatmul.bf16.vlgmr.msra.gmra.mxu1 %v6299_v58  ;;  %v5867_v46 = vld [vmem:[#allocation5 + $0x374] sm:$0xf0] }
 0x142   :  { %2898 = vmatpush.bf16.msra.mxu3 %v4791_v57  ;;  %2924 = vmatpush.bf16.msrb.mxu1 %v5047_v59  ;;  %v2662_v55 = vpop.f32.mrf.mxu0  ;;  %v4727_v56 = vor.u32 %v5867_v46, %v4726_v42  ;;  %v4983_v57 = vor.u32 %v5931_v48, %v4982_v47  ;;  %v4710_v59 = vld [vmem:[#allocation5 + $0x348] sm:$0xf]  ;;  %v5777_v42 = vld [vmem:[#allocation5 + $0xac] sm:$0xf]  ;;  %v5303_v47 = vor.u32 %v6011_v38, %v5302_v36  ;;  %v6007_v2 = vld [vmem:[#allocation5 + $0x7d4] sm:$0xf0] }
 0x143   :  { %2854 = vmatmul.bf16.vlgmr.msrb.gmra.mxu3 %v6326_v15  ;;  %v2673_v44 = vpop.f32.mrf.mxu1  ;;  %v5813_v55 = vld [vmem:[#allocation5 + $0x1cc] sm:$0xf]  ;;  %v4472_v36 = vld [vmem:[#allocation5 + $0x178] sm:$0xf0] }
 0x144   :  { %2887 = vmatpush.bf16.msra.mxu2 %v4631_v1  ;;  %v6339_v49 = vadd.f32 %v2673_v44, %v2661_v33  ;;  %v4550_v1 = vld [vmem:[#allocation5 + $0x208] sm:$0xf]  ;;  %v4376_v44 = vld [vmem:[#allocation5 + $0xb8] sm:$0xf0] }
 0x145   :  { %2913 = vmatpush.bf16.msrb.mxu0 %v4887_v61  ;;  %v5863_v61 = vld [vmem:[#allocation5 + $0x354] sm:$0xf0]  ;;  %v4551_v21 = vor.u32 %v5823_v6, %v4550_v1  ;;  %v4934_v33 = vld [vmem:[#allocation5 + $0x508] sm:$0xf]  ;;  %v4379_v53 = vor.u32 %v5777_v42, %v4376_v44  ;;  %v5809_v6 = vld [vmem:[#allocation5 + $0x1ac] sm:$0xf] }
 0x146   :  { %2899 = vmatpush.bf16.msra.mxu3 %v4775_v10  ;;  %2925 = vmatpush.bf16.msrb.mxu1 %v5031_v11  ;;  %v4711_v10 = vor.u32 %v5863_v61, %v4710_v59  ;;  %v4967_v11 = vor.u32 %v5927_v63, %v4966_v62  ;;  %v4360_v59 = vld [vmem:[#allocation5 + $0x98] sm:$0xf0]  ;;  %v5287_v61 = vor.u32 %v6007_v2, %v5286_v52  ;;  %v5126_v63 = vld [vmem:[#allocation5 + $0x688] sm:$0xf]  ;;  %v5955_v44 = vld [vmem:[#allocation5 + $0x634] sm:$0xf0] }
 0x147   :  { %v5270_v1 = vld [vmem:[#allocation5 + $0x7a8] sm:$0xf]  ;;  %v4507_v13 = vor.u32 %v5809_v6, %v4504_v7  ;;  %v4312_v38 = vld [vmem:[#allocation5 + $0x38] sm:$0xf0]  ;;  %v5757_v52 = vld [vmem:[#allocation5 + $0xc] sm:$0xf] }
 0x148   :  { %2888 = vmatpush.bf16.msra.mxu2 %v4615_v19  ;;  %v4950_v19 = vld [vmem:[#allocation5 + $0x528] sm:$0xf]  ;;  %v5271_v12 = vor.u32 %v6003_v4, %v5270_v1  ;;  %v4664_v1 = vld [vmem:[#allocation5 + $0x2f8] sm:$0xf0]  ;;  %v5987_v4 = vld [vmem:[#allocation5 + $0x734] sm:$0xf0] }
 0x149   :  { %2914 = vmatpush.bf16.msrb.mxu0 %v4871_v14  ;;  %v4694_v14 = vld [vmem:[#allocation5 + $0x328] sm:$0xf]  ;;  %v5793_v7 = vld [vmem:[#allocation5 + $0x12c] sm:$0xf] }
 0x14a   :  { %2900 = vmatpush.bf16.msra.mxu3 %v4759_v25  ;;  %2926 = vmatpush.bf16.msrb.mxu1 %v5015_v26  ;;  %v5781_v25 = vld [vmem:[#allocation5 + $0xcc] sm:$0xf]  ;;  %v4392_v26 = vld [vmem:[#allocation5 + $0xd8] sm:$0xf0]  ;;  %v4695_v27 = vor.u32 %v5859_v18, %v4694_v14  ;;  %v5110_v14 = vld [vmem:[#allocation5 + $0x668] sm:$0xf] }
 0x14b   :  { %v2675_v16 = vpop.f32.mrf.mxu1  ;;  %v4395_v37 = vor.u32 %v5781_v25, %v4392_v26  ;;  %v5078_v42 = vld [vmem:[#allocation5 + $0x628] sm:$0xf] }
 0x14c   :  { %2889 = vmatpush.bf16.msra.mxu2 %v4599_v35  ;;  %v5919_v35 = vld [vmem:[#allocation5 + $0x514] sm:$0xf0] }
 0x14d   :  { %2915 = vmatpush.bf16.msrb.mxu0 %v4855_v28  ;;  %v4951_v28 = vor.u32 %v5923_v20, %v4950_v19  ;;  %v4935_v46 = vor.u32 %v5919_v35, %v4934_v33  ;;  %v5963_v16 = vld [vmem:[#allocation5 + $0x674] sm:$0xf0]  ;;  %v5805_v20 = vld [vmem:[#allocation5 + $0x18c] sm:$0xf] }
 0x14e   :  { %2901 = vmatpush.bf16.msra.mxu3 %v4743_v40  ;;  %2927 = vmatpush.bf16.msrb.mxu1 %v4999_v41  ;;  %v4536_v40 = vld [vmem:[#allocation5 + $0x1f8] sm:$0xf0]  ;;  %v5159_v41 = vor.u32 %v5975_v29, %v5158_v24  ;;  %v5999_v19 = vld [vmem:[#allocation5 + $0x794] sm:$0xf0]  ;;  %v5111_v25 = vor.u32 %v5963_v16, %v5110_v14  ;;  %v5801_v35 = vld [vmem:[#allocation5 + $0x16c] sm:$0xf] }
 0x14f   :  { %v4539_v48 = vor.u32 %v5817_v39, %v4536_v40  ;;  %v4328_v24 = vld [vmem:[#allocation5 + $0x58] sm:$0xf0]  ;;  %v5959_v29 = vld [vmem:[#allocation5 + $0x654] sm:$0xf0]  ;;  %v5845_v16 = vld [vmem:[#allocation5 + $0x2cc] sm:$0xf] }
 0x150   :  { %2890 = vmatpush.bf16.msra.mxu2 %v4583_v50  ;;  %v5142_v50 = vld [vmem:[#allocation5 + $0x6a8] sm:$0xf]  ;;  %v5995_v33 = vld [vmem:[#allocation5 + $0x774] sm:$0xf0] }
 0x151   :  { %2916 = vmatpush.bf16.msrb.mxu0 %v4839_v45  ;;  %v4679_v45 = vor.u32 %v5855_v31, %v4678_v30  ;;  %v5238_v30 = vld [vmem:[#allocation5 + $0x768] sm:$0xf] }
 0x152   :  { %2902 = vmatpush.bf16.msra.mxu3 %v4727_v56  ;;  %2928 = vmatpush.bf16.msrb.mxu1 %v4983_v57  ;;  %v4520_v56 = vld [vmem:[#allocation5 + $0x1d8] sm:$0xf0]  ;;  %v5773_v57 = vld [vmem:[#allocation5 + $0x8c] sm:$0xf]  ;;  %v5239_v40 = vor.u32 %v5995_v33, %v5238_v30 }
 0x153   :  { %v4523_v62 = vor.u32 %v5813_v55, %v4520_v56  ;;  %v4363_v3 = vor.u32 %v5773_v57, %v4360_v59  ;;  %v5079_v55 = vor.u32 %v5955_v44, %v5078_v42  ;;  %v5913_v56 = vld [vmem:[#allocation5 + $0x4ec] sm:$0xf]  ;;  %v4920_v57 = vld [vmem:[#allocation5 + $0x4f8] sm:$0xf0] }
 0x154   :  { %2891 = vmatpush.bf16.msra.mxu2 %v4567_v0  ;;  %v5967_v0 = vld [vmem:[#allocation5 + $0x694] sm:$0xf0]  ;;  %v4923_v6 = vor.u32 %v5913_v56, %v4920_v57  ;;  %v5905_v30 = vld [vmem:[#allocation5 + $0x4ac] sm:$0xf]  ;;  %v4776_v44 = vld [vmem:[#allocation5 + $0x3d8] sm:$0xf0] }
 0x155   :  { %2917 = vmatpush.bf16.msrb.mxu0 %v4823_v60  ;;  %v5143_v60 = vor.u32 %v5971_v51, %v5142_v50  ;;  %v5797_v50 = vld [vmem:[#allocation5 + $0x14c] sm:$0xf]  ;;  %v4456_v51 = vld [vmem:[#allocation5 + $0x158] sm:$0xf0] }
 0x156   :  { %2903 = vmatpush.bf16.msra.mxu3 %v4711_v10  ;;  %2929 = vmatpush.bf16.msrb.mxu1 %v4967_v11  ;;  %v4344_v10 = vld [vmem:[#allocation5 + $0x78] sm:$0xf0]  ;;  %v5127_v11 = vor.u32 %v5967_v0, %v5126_v63  ;;  %v5849_v63 = vld [vmem:[#allocation5 + $0x2ec] sm:$0xf] }
 0x157   :  { %v4347_v18 = vor.u32 %v5769_v8, %v4344_v10  ;;  %v4440_v8 = vld [vmem:[#allocation5 + $0x138] sm:$0xf0]  ;;  %v5877_v42 = vld [vmem:[#allocation5 + $0x3cc] sm:$0xf] }
 0x158   :  { %2892 = vmatpush.bf16.msra.mxu2 %v4551_v21  ;;  %v4488_v21 = vld [vmem:[#allocation5 + $0x198] sm:$0xf0]  ;;  %v5873_v57 = vld [vmem:[#allocation5 + $0x3ac] sm:$0xf] }
 0x159   :  { %2918 = vmatpush.bf16.msrb.mxu0 %v4807_v17  ;;  %v5254_v17 = vld [vmem:[#allocation5 + $0x788] sm:$0xf] }
 0x15a   :  { %2904 = vmatpush.bf16.msra.mxu3 %v4695_v27  ;;  %2930 = vmatpush.bf16.msrb.mxu1 %v4951_v28  ;;  %v5255_v26 = vor.u32 %v5999_v19, %v5254_v17  ;;  %v4491_v27 = vor.u32 %v5805_v20, %v4488_v21  ;;  %v5094_v28 = vld [vmem:[#allocation5 + $0x648] sm:$0xf]  ;;  %v4648_v17 = vld [vmem:[#allocation5 + $0x2d8] sm:$0xf0]  ;;  %v4443_v19 = vor.u32 %v5793_v7, %v4440_v8  ;;  %v5983_v20 = vld [vmem:[#allocation5 + $0x714] sm:$0xf0] }
 0x15b   :  { %2893 = vmatmul.bf16.vlgmr.msra.gmra.mxu2 %v6304_v9  ;;  %v5095_v39 = vor.u32 %v5959_v29, %v5094_v28  ;;  %v5789_v21 = vld [vmem:[#allocation5 + $0x10c] sm:$0xf]  ;;  %v5048_v29 = vld [vmem:[#allocation5 + $0x5f8] sm:$0xf0]  ;;  %v4651_v33 = vor.u32 %v5845_v16, %v4648_v17 }
 0x15c   :  { %2937 = vmatpush.bf16.msrb.mxu2 %v5175_v23  ;;  %2919 = vmatmul.bf16.vlgmr.msrb.gmra.mxu0 %v6312_v32  ;;  %v5765_v23 = vld [vmem:[#allocation5 + $0x4c] sm:$0xf] }
 0x15d   :  { %2963 = vmatpush.bf16.msra.mxu0 %v4411_v22  ;;  %v4331_v31 = vor.u32 %v5765_v23, %v4328_v24  ;;  %v4424_v23 = vld [vmem:[#allocation5 + $0x118] sm:$0xf0]  ;;  %v5945_v28 = vld [vmem:[#allocation5 + $0x5ec] sm:$0xf] }
 0x15e   :  { %2905 = vmatpush.bf16.msra.mxu3 %v4679_v45  ;;  %2931 = vmatpush.bf16.msrb.mxu1 %v4935_v46  ;;  %v6345_v22 = vpop.f32.mrf.mxu2  ;;  %v5222_v45 = vld [vmem:[#allocation5 + $0x748] sm:$0xf]  ;;  %v5869_v8 = vld [vmem:[#allocation5 + $0x38c] sm:$0xf] }
 0x160   :  { %2938 = vmatpush.bf16.msrb.mxu2 %v5159_v41  ;;  %v4475_v41 = vor.u32 %v5801_v35, %v4472_v36  ;;  %v4427_v36 = vor.u32 %v5789_v21, %v4424_v23 }
 0x161   :  { %2964 = vmatpush.bf16.msra.mxu0 %v4395_v37  ;;  %2906 = vmatmul.bf16.vlgmr.msra.gmra.mxu3 %v6307_v43  ;;  %v5761_v37 = vld [vmem:[#allocation5 + $0x2c] sm:$0xf] }
 0x162   :  { %2950 = vmatpush.bf16.msrb.mxu3 %v5303_v47  ;;  %2976 = vmatpush.bf16.msra.mxu1 %v4539_v48  ;;  %v4315_v47 = vor.u32 %v5761_v37, %v4312_v38  ;;  %v5991_v48 = vld [vmem:[#allocation5 + $0x754] sm:$0xf0]  ;;  %v5841_v38 = vld [vmem:[#allocation5 + $0x2ac] sm:$0xf] }
 0x163   :  { %2932 = vmatmul.bf16.vlgmr.msrb.gmra.mxu1 %v6315_v54  ;;  %v5223_v59 = vor.u32 %v5991_v48, %v5222_v45  ;;  %v5941_v45 = vld [vmem:[#allocation5 + $0x5cc] sm:$0xf] }
 0x164   :  { %2939 = vmatpush.bf16.msrb.mxu2 %v5143_v60  ;;  %v6347_v46 = vpop.f32.mrf.mxu3  ;;  %v4459_v60 = vor.u32 %v5797_v50, %v4456_v51  ;;  %v5901_v48 = vld [vmem:[#allocation5 + $0x48c] sm:$0xf]  ;;  %v4872_v50 = vld [vmem:[#allocation5 + $0x498] sm:$0xf0] }
 0x165   :  { %2965 = vmatpush.bf16.msra.mxu0 %v4379_v53  ;;  %v4296_v53 = vld [vmem:[#allocation5 + $0x18] sm:$0xf0]  ;;  %v4875_v56 = vor.u32 %v5901_v48, %v4872_v50  ;;  %v6027_v48 = vld [vmem:[#allocation7 + $0x74] sm:$0xf0] }
 0x166   :  { %2951 = vmatpush.bf16.msrb.mxu3 %v5287_v61  ;;  %2977 = vmatpush.bf16.msra.mxu1 %v4523_v62  ;;  %v2688_v2 = vpop.f32.mrf.mxu2  ;;  %v5062_v61 = vld [vmem:[#allocation5 + $0x608] sm:$0xf]  ;;  %v5951_v62 = vld [vmem:[#allocation5 + $0x614] sm:$0xf0]  ;;  %v4299_v0 = vor.u32 %v5757_v52, %v4296_v53  ;;  %v5837_v52 = vld [vmem:[#allocation5 + $0x28c] sm:$0xf] }
 0x167   :  { %v5063_v10 = vor.u32 %v5951_v62, %v5062_v61  ;;  %v4616_v53 = vld [vmem:[#allocation5 + $0x298] sm:$0xf0]  ;;  %v5897_v62 = vld [vmem:[#allocation5 + $0x46c] sm:$0xf] }
 0x168   :  { %2940 = vmatpush.bf16.msrb.mxu2 %v5127_v11  ;;  %v5909_v11 = vld [vmem:[#allocation5 + $0x4cc] sm:$0xf]  ;;  %v5016_v61 = vld [vmem:[#allocation5 + $0x5b8] sm:$0xf0] }
 0x169   :  { %2966 = vmatpush.bf16.msra.mxu0 %v4363_v3  ;;  %v5206_v3 = vld [vmem:[#allocation5 + $0x728] sm:$0xf] }
 0x16a   :  { %2952 = vmatpush.bf16.msrb.mxu3 %v5271_v12  ;;  %2978 = vmatpush.bf16.msra.mxu1 %v4507_v13  ;;  %v4904_v12 = vld [vmem:[#allocation5 + $0x4d8] sm:$0xf0]  ;;  %v4667_v13 = vor.u32 %v5849_v63, %v4664_v1  ;;  %v5207_v14 = vor.u32 %v5987_v4, %v5206_v3  ;;  %v5833_v3 = vld [vmem:[#allocation5 + $0x26c] sm:$0xf] }
 0x16b   :  { %v4856_v63 = vld [vmem:[#allocation5 + $0x478] sm:$0xf0] }
 0x16c   :  { %2941 = vmatpush.bf16.msrb.mxu2 %v5111_v25  ;;  %v2701_v24 = vpop.f32.mrf.mxu3  ;;  %v4907_v25 = vor.u32 %v5909_v11, %v4904_v12  ;;  %v4600_v4 = vld [vmem:[#allocation5 + $0x278] sm:$0xf0]  ;;  %v4859_v7 = vor.u32 %v5897_v62, %v4856_v63  ;;  %v5933_v11 = vld [vmem:[#allocation5 + $0x58c] sm:$0xf] }
 0x16d   :  { %2967 = vmatpush.bf16.msra.mxu0 %v4347_v18  ;;  %v5190_v18 = vld [vmem:[#allocation5 + $0x708] sm:$0xf]  ;;  %v5000_v12 = vld [vmem:[#allocation5 + $0x598] sm:$0xf0]  ;;  %v4603_v16 = vor.u32 %v5833_v3, %v4600_v4  ;;  %v5865_v24 = vld [vmem:[#allocation5 + $0x36c] sm:$0xf] }
 0x16e   :  { %2953 = vmatpush.bf16.msrb.mxu3 %v5255_v26  ;;  %2979 = vmatpush.bf16.msra.mxu1 %v4491_v27  ;;  %v5881_v26 = vld [vmem:[#allocation5 + $0x3ec] sm:$0xf]  ;;  %v4792_v27 = vld [vmem:[#allocation5 + $0x3f8] sm:$0xf0]  ;;  %v5191_v35 = vor.u32 %v5983_v20, %v5190_v18  ;;  %v5003_v21 = vor.u32 %v5933_v11, %v5000_v12  ;;  %v5358_v3 = vld [vmem:[#allocation7 + $0x60] sm:$0xf] }
 0x16f   :  { %v4795_v37 = vor.u32 %v5881_v26, %v4792_v27  ;;  %v5829_v18 = vld [vmem:[#allocation5 + $0x24c] sm:$0xf]  ;;  %v4984_v27 = vld [vmem:[#allocation5 + $0x578] sm:$0xf0]  ;;  %v6025_v4 = vld [vmem:[#allocation7 + $0x64] sm:$0xf0] }
 0x170   :  { %2942 = vmatpush.bf16.msrb.mxu2 %v5095_v39  ;;  %v4632_v39 = vld [vmem:[#allocation5 + $0x2b8] sm:$0xf0]  ;;  %v5929_v26 = vld [vmem:[#allocation5 + $0x56c] sm:$0xf] }
 0x171   :  { %2968 = vmatpush.bf16.msra.mxu0 %v4331_v31  ;;  %v4888_v31 = vld [vmem:[#allocation5 + $0x4b8] sm:$0xf0]  ;;  %v4635_v51 = vor.u32 %v5841_v38, %v4632_v39  ;;  %v5861_v38 = vld [vmem:[#allocation5 + $0x34c] sm:$0xf] }
 0x172   :  { %2954 = vmatpush.bf16.msrb.mxu3 %v5239_v40  ;;  %2980 = vmatpush.bf16.msra.mxu1 %v4475_v41  ;;  %v5051_v40 = vor.u32 %v5945_v28, %v5048_v29  ;;  %v4891_v41 = vor.u32 %v5905_v30, %v4888_v31  ;;  %v5889_v28 = vld [vmem:[#allocation5 + $0x42c] sm:$0xf]  ;;  %v4824_v29 = vld [vmem:[#allocation5 + $0x438] sm:$0xf0] }
 0x173   :  { %v4712_v39 = vld [vmem:[#allocation5 + $0x358] sm:$0xf0]  ;;  %v5921_v63 = vld [vmem:[#allocation5 + $0x52c] sm:$0xf] }
 0x174   :  { %2943 = vmatpush.bf16.msrb.mxu2 %v5079_v55  ;;  %v5853_v11 = vld [vmem:[#allocation5 + $0x30c] sm:$0xf] }
 0x175   :  { %2969 = vmatpush.bf16.msra.mxu0 %v4315_v47  ;;  %v5032_v47 = vld [vmem:[#allocation5 + $0x5d8] sm:$0xf0] }
 0x176   :  { %2955 = vmatpush.bf16.msrb.mxu3 %v5223_v59  ;;  %2981 = vmatpush.bf16.msra.mxu1 %v4459_v60  ;;  %v5035_v55 = vor.u32 %v5941_v45, %v5032_v47  ;;  %v4760_v59 = vld [vmem:[#allocation5 + $0x3b8] sm:$0xf0]  ;;  %v5937_v60 = vld [vmem:[#allocation5 + $0x5ac] sm:$0xf]  ;;  %v5366_v47 = vld [vmem:[#allocation7 + $0x70] sm:$0xf] }
 0x177   :  { %v4763_v1 = vor.u32 %v5873_v57, %v4760_v59  ;;  %v5176_v59 = vld [vmem:[#allocation5 + $0x6f8] sm:$0xf0]  ;;  %v5367_v62 = vor.u32 %v6027_v48, %v5366_v47 }
 0x178   :  { %2944 = vmatpush.bf16.msrb.mxu2 %v5063_v10  ;;  %v4744_v10 = vld [vmem:[#allocation5 + $0x398] sm:$0xf0] }
 0x179   :  { %2970 = vmatpush.bf16.msra.mxu0 %v4299_v0  ;;  %v6351_v2 = vpop.f32.mrf.mxu0  ;;  %v4619_v0 = vor.u32 %v5837_v52, %v4616_v53  ;;  %v4747_v17 = vor.u32 %v5869_v8, %v4744_v10  ;;  %v4552_v52 = vld [vmem:[#allocation5 + $0x218] sm:$0xf0]  ;;  %v5977_v53 = vld [vmem:[#allocation5 + $0x6ec] sm:$0xf] }
 0x17a   :  { %2956 = vmatpush.bf16.msrb.mxu3 %v5207_v14  ;;  %2982 = vmatpush.bf16.msra.mxu1 %v4443_v19  ;;  %v4840_v14 = vld [vmem:[#allocation5 + $0x458] sm:$0xf0]  ;;  %v5973_v8 = vld [vmem:[#allocation5 + $0x6cc] sm:$0xf] }
 0x17b   :  { %2945 = vmatmul.bf16.vlgmr.msrb.gmra.mxu2 %v6322_v5  ;;  %v4584_v19 = vld [vmem:[#allocation5 + $0x258] sm:$0xf0] }
 0x17c   :  { %2989 = vmatpush.bf16.msra.mxu2 %v4667_v13  ;;  %2971 = vmatmul.bf16.vlgmr.msra.gmra.mxu0 %v6296_v34  ;;  %v4779_v34 = vor.u32 %v5877_v42, %v4776_v44  ;;  %v5893_v13 = vld [vmem:[#allocation5 + $0x44c] sm:$0xf]  ;;  %v4587_v30 = vor.u32 %v5829_v18, %v4584_v19  ;;  %v4808_v44 = vld [vmem:[#allocation5 + $0x418] sm:$0xf0] }
 0x17d   :  { %3015 = vmatpush.bf16.msrb.mxu0 %v4923_v6  ;;  %v5019_v6 = vor.u32 %v5937_v60, %v5016_v61  ;;  %v4843_v23 = vor.u32 %v5893_v13, %v4840_v14  ;;  %v5885_v42 = vld [vmem:[#allocation5 + $0x40c] sm:$0xf]  ;;  %v4696_v61 = vld [vmem:[#allocation5 + $0x338] sm:$0xf0] }
 0x17e   :  { %2957 = vmatpush.bf16.msrb.mxu3 %v5191_v35  ;;  %2983 = vmatpush.bf16.msra.mxu1 %v4427_v36  ;;  %v4568_v35 = vld [vmem:[#allocation5 + $0x238] sm:$0xf0]  ;;  %v4987_v36 = vor.u32 %v5929_v26, %v4984_v27  ;;  %v4811_v57 = vor.u32 %v5885_v42, %v4808_v44  ;;  %v5857_v60 = vld [vmem:[#allocation5 + $0x32c] sm:$0xf]  ;;  %v6041_v42 = vld [vmem:[#allocation7 + $0xe4] sm:$0xf0] }
 0x17f   :  { %v5160_v10 = vld [vmem:[#allocation5 + $0x6d8] sm:$0xf0]  ;;  %v5917_v14 = vld [vmem:[#allocation5 + $0x50c] sm:$0xf] }
 0x180   :  { %2990 = vmatpush.bf16.msra.mxu2 %v4651_v33  ;;  %v5825_v33 = vld [vmem:[#allocation5 + $0x22c] sm:$0xf]  ;;  %v4680_v13 = vld [vmem:[#allocation5 + $0x318] sm:$0xf0]  ;;  %v5163_v26 = vor.u32 %v5973_v8, %v5160_v10  ;;  %v6037_v8 = vld [vmem:[#allocation7 + $0xc4] sm:$0xf0] }
 0x181   :  { %3016 = vmatpush.bf16.msrb.mxu0 %v4907_v25  ;;  %2958 = vmatmul.bf16.vlgmr.msrb.gmra.mxu3 %v6326_v15  ;;  %v2714_v20 = vpop.f32.mrf.mxu0  ;;  %v4728_v25 = vld [vmem:[#allocation5 + $0x378] sm:$0xf0]  ;;  %v4571_v45 = vor.u32 %v5825_v33, %v4568_v35  ;;  %v6009_v18 = vld [vmem:[#allocation5 + $0x7ec] sm:$0xf]  ;;  %v4683_v27 = vor.u32 %v5853_v11, %v4680_v13 }
 0x182   :  { %3002 = vmatpush.bf16.msra.mxu3 %v4795_v37  ;;  %3028 = vmatpush.bf16.msrb.mxu1 %v5051_v40  ;;  %v4731_v31 = vor.u32 %v5865_v24, %v4728_v25  ;;  %v4827_v37 = vor.u32 %v5889_v28, %v4824_v29  ;;  %v5925_v40 = vld [vmem:[#allocation5 + $0x54c] sm:$0xf]  ;;  %v5304_v19 = vld [vmem:[#allocation5 + $0x7f8] sm:$0xf0]  ;;  %v5350_v20 = vld [vmem:[#allocation7 + $0x50] sm:$0xf] }
 0x183   :  { %2984 = vmatmul.bf16.vlgmr.msra.gmra.mxu1 %v6299_v58  ;;  %v6355_v58 = vpop.f32.mrf.mxu1  ;;  %v6043_v24 = vld [vmem:[#allocation7 + $0xf4] sm:$0xf0]  ;;  %v5144_v33 = vld [vmem:[#allocation5 + $0x6b8] sm:$0xf0] }
 0x184   :  { %2991 = vmatpush.bf16.msra.mxu2 %v4635_v51  ;;  %v4715_v51 = vor.u32 %v5861_v38, %v4712_v39  ;;  %v5342_v38 = vld [vmem:[#allocation7 + $0x40] sm:$0xf]  ;;  %v5128_v47 = vld [vmem:[#allocation5 + $0x698] sm:$0xf0] }
 0x185   :  { %3017 = vmatpush.bf16.msrb.mxu0 %v4891_v41  ;;  %v4968_v41 = vld [vmem:[#allocation5 + $0x558] sm:$0xf0] }
 0x186   :  { %3003 = vmatpush.bf16.msra.mxu3 %v4779_v34  ;;  %3029 = vmatpush.bf16.msrb.mxu1 %v5035_v55  ;;  %v5821_v34 = vld [vmem:[#allocation5 + $0x20c] sm:$0xf] }
 0x188   :  { %2992 = vmatpush.bf16.msra.mxu2 %v4619_v0  ;;  %v4952_v0 = vld [vmem:[#allocation5 + $0x538] sm:$0xf0] }
 0x189   :  { %3018 = vmatpush.bf16.msrb.mxu0 %v4875_v56  ;;  %v6357_v55 = vpop.f32.mrf.mxu0  ;;  %v4971_v56 = vor.u32 %v5925_v40, %v4968_v41  ;;  %v4955_v12 = vor.u32 %v5921_v63, %v4952_v0  ;;  %v6021_v40 = vld [vmem:[#allocation7 + $0x44] sm:$0xf0]  ;;  %v5422_v41 = vld [vmem:[#allocation7 + $0xe0] sm:$0xf]  ;;  %v5112_v63 = vld [vmem:[#allocation5 + $0x678] sm:$0xf0]  ;;  %v2687_v0 = vadd.f32 %v6345_v22, %v6339_v49 }
 0x18a   :  { %3004 = vmatpush.bf16.msra.mxu3 %v4763_v1  ;;  %3030 = vmatpush.bf16.msrb.mxu1 %v5019_v6  ;;  %v4555_v1 = vor.u32 %v5821_v34, %v4552_v52  ;;  %v5179_v6 = vor.u32 %v5977_v53, %v5176_v59  ;;  %v5343_v48 = vor.u32 %v6021_v40, %v5342_v38  ;;  %v6019_v52 = vld [vmem:[#allocation7 + $0x34] sm:$0xf0]  ;;  %v5414_v53 = vld [vmem:[#allocation7 + $0xd0] sm:$0xf]  ;;  %v6013_v40 = vld [vmem:[#allocation7 + $0x4] sm:$0xf0] }
 0x18b   :  { %v2727_v50 = vpop.f32.mrf.mxu1  ;;  %v5423_v34 = vor.u32 %v6041_v42, %v5422_v41  ;;  %v2700_v10 = vadd.f32 %v6347_v46, %v2687_v0  ;;  %v6033_v41 = vld [vmem:[#allocation7 + $0xa4] sm:$0xf0]  ;;  %v6024_v0 = vld [vmem:[#allocation7 + $0x64] sm:$0xf] }
 0x18c   :  { %2993 = vmatpush.bf16.msra.mxu2 %v4603_v16  ;;  %v4936_v16 = vld [vmem:[#allocation5 + $0x518] sm:$0xf0] }
 0x18d   :  { %3019 = vmatpush.bf16.msrb.mxu0 %v4859_v7  ;;  %v4699_v7 = vor.u32 %v5857_v60, %v4696_v61  ;;  %v4939_v29 = vor.u32 %v5917_v14, %v4936_v16  ;;  %v5272_v50 = vld [vmem:[#allocation5 + $0x7b8] sm:$0xf0]  ;;  %v5957_v14 = vld [vmem:[#allocation5 + $0x64c] sm:$0xf]  ;;  %v2713_v49 = vadd.f32 %v6351_v2, %v2700_v10  ;;  %v6022_v10 = vld [vmem:[#allocation7 + $0x54] sm:$0xf] }
 0x18e   :  { %3005 = vmatpush.bf16.msra.mxu3 %v4747_v17  ;;  %3031 = vmatpush.bf16.msrb.mxu1 %v5003_v21  ;;  %v5359_v17 = vor.u32 %v6025_v4, %v5358_v3  ;;  %v6023_v21 = vld [vmem:[#allocation7 + $0x54] sm:$0xf0]  ;;  %v5256_v3 = vld [vmem:[#allocation5 + $0x798] sm:$0xf0]  ;;  %v5326_v4 = vld [vmem:[#allocation7 + $0x20] sm:$0xf] }
 0x18f   :  { %v5351_v35 = vor.u32 %v6023_v21, %v5350_v20  ;;  %v5096_v16 = vld [vmem:[#allocation5 + $0x658] sm:$0xf0]  ;;  %v6015_v21 = vld [vmem:[#allocation7 + $0x14] sm:$0xf0]  ;;  %v2726_v46 = vadd.f32 %v6355_v58, %v2713_v49  ;;  %v5953_v2 = vld [vmem:[#allocation5 + $0x62c] sm:$0xf] }
 0x190   :  { %2994 = vmatpush.bf16.msra.mxu2 %v4587_v30  ;;  %v5307_v30 = vor.u32 %v6009_v18, %v5304_v19  ;;  %v5240_v18 = vld [vmem:[#allocation5 + $0x778] sm:$0xf0]  ;;  %v5318_v19 = vld [vmem:[#allocation7 + $0x10] sm:$0xf]  ;;  %v5390_v58 = vld [vmem:[#allocation7 + $0xa0] sm:$0xf] }
 0x191   :  { %3020 = vmatpush.bf16.msrb.mxu0 %v4843_v23  ;;  %v5430_v23 = vld [vmem:[#allocation7 + $0xf0] sm:$0xf]  ;;  %v2766_v28 = vpop.f32.mrf.mxu0 }
 0x192   :  { %3006 = vmatpush.bf16.msra.mxu3 %v4731_v31  ;;  %3032 = vmatpush.bf16.msrb.mxu1 %v4987_v36  ;;  %v5969_v31 = vld [vmem:[#allocation5 + $0x6ac] sm:$0xf]  ;;  %v5431_v39 = vor.u32 %v6043_v24, %v5430_v23  ;;  %v5398_v23 = vld [vmem:[#allocation7 + $0xb0] sm:$0xf]  ;;  %v6035_v24 = vld [vmem:[#allocation7 + $0xb4] sm:$0xf0] }
 0x193   :  { %v6359_v25 = vpop.f32.mrf.mxu1  ;;  %v6005_v36 = vld [vmem:[#allocation5 + $0x7cc] sm:$0xf]  ;;  %v5147_v44 = vor.u32 %v5969_v31, %v5144_v33  ;;  %v5319_v33 = vor.u32 %v6015_v21, %v5318_v19  ;;  %v5399_v38 = vor.u32 %v6035_v24, %v5398_v23  ;;  %v6020_v21 = vld [vmem:[#allocation7 + $0x44] sm:$0xf] }
 0x194   :  { %2995 = vmatpush.bf16.msra.mxu2 %v4571_v45  ;;  %v5965_v45 = vld [vmem:[#allocation5 + $0x68c] sm:$0xf] }
 0x195   :  { %3021 = vmatpush.bf16.msrb.mxu0 %v4827_v37  ;;  %v5288_v37 = vld [vmem:[#allocation5 + $0x7d8] sm:$0xf0]  ;;  %v5131_v59 = vor.u32 %v5965_v45, %v5128_v47  ;;  %v6026_v45 = vld [vmem:[#allocation7 + $0x74] sm:$0xf]  ;;  %v5344_v24 = vld [vmem:[#allocation7 + $0x48] sm:$0xf0] }
 0x196   :  { %3007 = vmatpush.bf16.msra.mxu3 %v4715_v51  ;;  %3033 = vmatpush.bf16.msrb.mxu1 %v4971_v56  ;;  %v5334_v51 = vld [vmem:[#allocation7 + $0x30] sm:$0xf]  ;;  %v6039_v56 = vld [vmem:[#allocation7 + $0xd4] sm:$0xf0]  ;;  %v5368_v47 = vld [vmem:[#allocation7 + $0x78] sm:$0xf0] }
 0x198   :  { %2996 = vmatpush.bf16.msra.mxu2 %v4555_v1  ;;  %v5335_v1 = vor.u32 %v6019_v52, %v5334_v51  ;;  %v5208_v52 = vld [vmem:[#allocation5 + $0x738] sm:$0xf0] }
 0x199   :  { %3022 = vmatpush.bf16.msrb.mxu0 %v4811_v57  ;;  %v6365_v60 = vpop.f32.mrf.mxu0 }
 0x19a   :  { %3008 = vmatpush.bf16.msra.mxu3 %v4699_v7  ;;  %3034 = vmatpush.bf16.msrb.mxu1 %v4955_v12  ;;  %v5406_v7 = vld [vmem:[#allocation7 + $0xc0] sm:$0xf] }
 0x19b   :  { %2997 = vmatmul.bf16.vlgmr.msra.gmra.mxu2 %v6304_v9  ;;  %v6001_v9 = vld [vmem:[#allocation5 + $0x7ac] sm:$0xf]  ;;  %v2779_v57 = vpop.f32.mrf.mxu1  ;;  %v5407_v20 = vor.u32 %v6037_v8, %v5406_v7 }
 0x19c   :  { %3041 = vmatpush.bf16.msrb.mxu2 %v5179_v6  ;;  %3023 = vmatmul.bf16.vlgmr.msrb.gmra.mxu0 %v6312_v32  ;;  %v5291_v32 = vor.u32 %v6005_v36, %v5288_v37  ;;  %v5275_v61 = vor.u32 %v6001_v9, %v5272_v50  ;;  %v5415_v6 = vor.u32 %v6039_v56, %v5414_v53  ;;  %v5224_v36 = vld [vmem:[#allocation5 + $0x758] sm:$0xf0]  ;;  %v5310_v37 = vld [vmem:[#allocation7] sm:$0xf]  ;;  %v5949_v9 = vld [vmem:[#allocation5 + $0x60c] sm:$0xf] }
 0x19d   :  { %3465 = vmatpush.bf16.msra.mxu0 %v5367_v62  ;;  %v5961_v62 = vld [vmem:[#allocation5 + $0x66c] sm:$0xf]  ;;  %v5064_v50 = vld [vmem:[#allocation5 + $0x618] sm:$0xf0]  ;;  %v5311_v51 = vor.u32 %v6013_v40, %v5310_v37  ;;  %v5391_v53 = vor.u32 %v6033_v41, %v5390_v58  ;;  %v5371_v57 = vor.u32 %v6026_v45, %v5368_v47  ;;  %v6059_v37 = vld [vmem:[#allocation7 + $0x174] sm:$0xf0] }
 0x19e   :  { %3009 = vmatpush.bf16.msra.mxu3 %v4683_v27  ;;  %3035 = vmatpush.bf16.msrb.mxu1 %v4939_v29  ;;  %v2738_v11 = vpop.f32.mrf.mxu2  ;;  %v5115_v12 = vor.u32 %v5961_v62, %v5112_v63  ;;  %v5099_v27 = vor.u32 %v5957_v14, %v5096_v16  ;;  %v5067_v63 = vor.u32 %v5949_v9, %v5064_v50  ;;  %v6042_v14 = vld [vmem:[#allocation7 + $0xf4] sm:$0xf]  ;;  %v5432_v16 = vld [vmem:[#allocation7 + $0xf8] sm:$0xf0]  ;;  %v6036_v45 = vld [vmem:[#allocation7 + $0xc4] sm:$0xf] }
 0x19f   :  { %v2739_v31 = vadd.f32 %v2738_v11, %v2726_v46  ;;  %v5374_v11 = vld [vmem:[#allocation7 + $0x80] sm:$0xf]  ;;  %v5435_v23 = vor.u32 %v6042_v14, %v5432_v16  ;;  %v6040_v46 = vld [vmem:[#allocation7 + $0xe4] sm:$0xf]  ;;  %v5408_v47 = vld [vmem:[#allocation7 + $0xc8] sm:$0xf0] }
 0x1a0   :  { %3042 = vmatpush.bf16.msrb.mxu2 %v5163_v26  ;;  %v6057_v9 = vld [vmem:[#allocation7 + $0x164] sm:$0xf0] }
 0x1a1   :  { %3466 = vmatpush.bf16.msra.mxu0 %v5359_v17  ;;  %3010 = vmatmul.bf16.vlgmr.msra.gmra.mxu3 %v6307_v43  ;;  %v5997_v43 = vld [vmem:[#allocation5 + $0x78c] sm:$0xf]  ;;  %v2818_v28 = vpop.f32.mrf.mxu0 }
 0x1a2   :  { %3054 = vmatpush.bf16.msrb.mxu3 %v5307_v30  ;;  %3478 = vmatpush.bf16.msra.mxu1 %v5431_v39  ;;  %v5259_v13 = vor.u32 %v5997_v43, %v5256_v3  ;;  %v5993_v17 = vld [vmem:[#allocation5 + $0x76c] sm:$0xf]  ;;  %v5080_v30 = vld [vmem:[#allocation5 + $0x638] sm:$0xf0] }
 0x1a3   :  { %3036 = vmatmul.bf16.vlgmr.msrb.gmra.mxu1 %v6315_v54  ;;  %v6017_v54 = vld [vmem:[#allocation7 + $0x24] sm:$0xf0]  ;;  %v6372_v26 = vpop.f32.mrf.mxu1  ;;  %v5243_v29 = vor.u32 %v5993_v17, %v5240_v18  ;;  %v5981_v3 = vld [vmem:[#allocation5 + $0x70c] sm:$0xf]  ;;  %v6380_v18 = vld [vmem:[%s6468_s4] sm:$0xf] }
 0x1a4   :  { %3043 = vmatpush.bf16.msrb.mxu2 %v5147_v44  ;;  %v5327_v22 = vor.u32 %v6017_v54, %v5326_v4  ;;  %v2751_v39 = vpop.f32.mrf.mxu3  ;;  %v5192_v4 = vld [vmem:[#allocation5 + $0x718] sm:$0xf0]  ;;  %v1364_v19 = vperm.slane %v6380_v18, 1 }
 0x1a5   :  { %3467 = vmatpush.bf16.msra.mxu0 %v5351_v35  ;;  %v5989_v35 = vld [vmem:[#allocation5 + $0x74c] sm:$0xf]  ;;  %v2752_v42 = vadd.f32 %v2751_v39, %v2739_v31  ;;  %v5336_v31 = vld [vmem:[#allocation7 + $0x38] sm:$0xf0] }
 0x1a6   :  { %3055 = vmatpush.bf16.msrb.mxu3 %v5291_v32  ;;  %3479 = vmatpush.bf16.msra.mxu1 %v5423_v34  ;;  %v2740_v44 = vpop.f32.mrf.mxu2  ;;  %v5083_v32 = vor.u32 %v5953_v2, %v5080_v30  ;;  %v5985_v34 = vld [vmem:[#allocation5 + $0x72c] sm:$0xf]  ;;  %v2765_v28 = vadd.f32 %v6357_v55, %v1364_v19  ;;  %v5347_v2 = vor.u32 %v6020_v21, %v5344_v24  ;;  %v6018_v30 = vld [vmem:[#allocation7 + $0x34] sm:$0xf]  ;;  %v5462_v24 = vld [vmem:[#allocation7 + $0x130] sm:$0xf] }
 0x1a7   :  { %v3067_v56 = vmax.f32 %v2752_v42, 0.0  ;;  %v5211_v43 = vor.u32 %v5985_v34, %v5208_v52  ;;  %v5339_v55 = vor.u32 %v6018_v30, %v5336_v31  ;;  %v6016_v42 = vld [vmem:[#allocation7 + $0x24] sm:$0xf]  ;;  %v5411_v34 = vor.u32 %v6036_v45, %v5408_v47  ;;  %v6030_v21 = vld [vmem:[#allocation7 + $0x94] sm:$0xf] }
 0x1a8   :  { %3044 = vmatpush.bf16.msrb.mxu2 %v5131_v59  ;;  %v5382_v59 = vld [vmem:[#allocation7 + $0x90] sm:$0xf]  ;;  %v6028_v31 = vld [vmem:[#allocation7 + $0x84] sm:$0xf]  ;;  %v5488_v47 = vld [vmem:[#allocation7 + $0x168] sm:$0xf0] }
 0x1a9   :  { %3468 = vmatpush.bf16.msra.mxu0 %v5343_v48  ;;  %v5227_v48 = vor.u32 %v5989_v35, %v5224_v36  ;;  %v6374_v54 = vpack.c.bf16 %v3067_v56, %v3067_v56  ;;  %v6038_v35 = vld [vmem:[#allocation7 + $0xd4] sm:$0xf]  ;;  %v5494_v36 = vld [vmem:[#allocation7 + $0x170] sm:$0xf] }
 0x1aa   :  { %3056 = vmatpush.bf16.msrb.mxu3 %v5275_v61  ;;  %3480 = vmatpush.bf16.msra.mxu1 %v5415_v6  ;;  %v6031_v61 = vld [vmem:[#allocation7 + $0x94] sm:$0xf0]  ;;  %v5495_v40 = vor.u32 %v6059_v37, %v5494_v36  ;;  %v6034_v56 = vld [vmem:[#allocation7 + $0xb4] sm:$0xf] }
 0x1ab   :  { %v2831_v62 = vpop.f32.mrf.mxu1  ;;  %v5383_v6 = vor.u32 %v6031_v61, %v5382_v59  ;;  %v6047_v36 = vld [vmem:[#allocation7 + $0x114] sm:$0xf0] }
 0x1ac   :  { %3045 = vmatpush.bf16.msrb.mxu2 %v5115_v12  ;;  %v2753_v7 = vpop.f32.mrf.mxu3  ;;  %v6029_v12 = vld [vmem:[#allocation7 + $0x84] sm:$0xf0] }
 0x1ad   :  { %3469 = vmatpush.bf16.msra.mxu0 %v5335_v1  ;;  %v5360_v1 = vld [vmem:[#allocation7 + $0x68] sm:$0xf0]  ;;  %v5375_v17 = vor.u32 %v6029_v12, %v5374_v11  ;;  %v5470_v12 = vld [vmem:[#allocation7 + $0x140] sm:$0xf] }
 0x1ae   :  { %3057 = vmatpush.bf16.msrb.mxu3 %v5259_v13  ;;  %3481 = vmatpush.bf16.msra.mxu1 %v5407_v20  ;;  %v5363_v8 = vor.u32 %v6024_v0, %v5360_v1  ;;  %v5352_v13 = vld [vmem:[#allocation7 + $0x58] sm:$0xf0]  ;;  %v2790_v49 = vpop.f32.mrf.mxu2  ;;  %v6055_v0 = vld [vmem:[#allocation7 + $0x154] sm:$0xf0] }
 0x1af   :  { %v5355_v20 = vor.u32 %v6022_v10, %v5352_v13  ;;  %v5392_v10 = vld [vmem:[#allocation7 + $0xa8] sm:$0xf0]  ;;  %v6053_v13 = vld [vmem:[#allocation7 + $0x144] sm:$0xf0] }
 0x1b0   :  { %3046 = vmatpush.bf16.msrb.mxu2 %v5099_v27  ;;  %v5424_v27 = vld [vmem:[#allocation7 + $0xe8] sm:$0xf0] }
 0x1b1   :  { %3470 = vmatpush.bf16.msra.mxu0 %v5327_v22  ;;  %v5195_v22 = vor.u32 %v5981_v3, %v5192_v4  ;;  %v6012_v3 = vld [vmem:[#allocation7 + $0x4] sm:$0xf]  ;;  %v5312_v4 = vld [vmem:[#allocation7 + $0x8] sm:$0xf0] }
 0x1b2   :  { %3058 = vmatpush.bf16.msrb.mxu3 %v5243_v29  ;;  %3482 = vmatpush.bf16.msra.mxu1 %v5399_v38  ;;  %v2778_v38 = vadd.f32 %v6359_v25, %v2765_v28 }
 0x1b4   :  { %3047 = vmatpush.bf16.msrb.mxu2 %v5083_v32  ;;  %v2803_v29 = vpop.f32.mrf.mxu3  ;;  %v2791_v58 = vadd.f32 %v2790_v49, %v2778_v38  ;;  %v5328_v32 = vld [vmem:[#allocation7 + $0x28] sm:$0xf0]  ;;  %v5471_v49 = vor.u32 %v6053_v13, %v5470_v12  ;;  %v6044_v13 = vld [vmem:[#allocation7 + $0x104] sm:$0xf] }
 0x1b5   :  { %3471 = vmatpush.bf16.msra.mxu0 %v5319_v33  ;;  %v5427_v33 = vor.u32 %v6040_v46, %v5424_v27  ;;  %v5331_v25 = vor.u32 %v6016_v42, %v5328_v32  ;;  %v6051_v46 = vld [vmem:[#allocation7 + $0x134] sm:$0xf0] }
 0x1b6   :  { %3059 = vmatpush.bf16.msrb.mxu3 %v5227_v48  ;;  %3483 = vmatpush.bf16.msra.mxu1 %v5391_v53  ;;  %v2792_v39 = vpop.f32.mrf.mxu2  ;;  %v5486_v48 = vld [vmem:[#allocation7 + $0x160] sm:$0xf]  ;;  %v5320_v53 = vld [vmem:[#allocation7 + $0x18] sm:$0xf0] }
 0x1b7   :  { %v5487_v52 = vor.u32 %v6057_v9, %v5486_v48 }
 0x1b8   :  { %3048 = vmatpush.bf16.msrb.mxu2 %v5067_v63  ;;  %v5478_v63 = vld [vmem:[#allocation7 + $0x150] sm:$0xf] }
 0x1b9   :  { %3472 = vmatpush.bf16.msra.mxu0 %v5311_v51  ;;  %v6387_v41 = vpop.f32.mrf.mxu0  ;;  %v6014_v51 = vld [vmem:[#allocation7 + $0x14] sm:$0xf]  ;;  %v5479_v7 = vor.u32 %v6055_v0, %v5478_v63  ;;  %v5464_v0 = vld [vmem:[#allocation7 + $0x138] sm:$0xf0] }
 0x1ba   :  { %3060 = vmatpush.bf16.msrb.mxu3 %v5211_v43  ;;  %3484 = vmatpush.bf16.msra.mxu1 %v5383_v6  ;;  %v5323_v43 = vor.u32 %v6014_v51, %v5320_v53  ;;  %v5472_v53 = vld [vmem:[#allocation7 + $0x148] sm:$0xf0]  ;;  %v6050_v63 = vld [vmem:[#allocation7 + $0x134] sm:$0xf] }
 0x1bb   :  { %3049 = vmatmul.bf16.vlgmr.msrb.gmra.mxu2 %v6322_v5  ;;  %v5416_v5 = vld [vmem:[#allocation7 + $0xd8] sm:$0xf0] }
 0x1bc   :  { %3473 = vmatmul.bf16.vlgmr.msra.gmra.mxu0 %v6374_v54  ;;  %v5419_v44 = vor.u32 %v6038_v35, %v5416_v5  ;;  %3491 = vmatpush.bf16.msra.mxu2 %v5495_v40  ;;  %v2805_v50 = vpop.f32.mrf.mxu3  ;;  %v5446_v5 = vld [vmem:[#allocation7 + $0x110] sm:$0xf]  ;;  %v5438_v40 = vld [vmem:[#allocation7 + $0x100] sm:$0xf] }
 0x1bd   :  { %3517 = vmatpush.bf16.msrb.mxu0 %v5371_v57  ;;  %v5400_v57 = vld [vmem:[#allocation7 + $0xb8] sm:$0xf0]  ;;  %v5447_v39 = vor.u32 %v6047_v36, %v5446_v5  ;;  %v6054_v50 = vld [vmem:[#allocation7 + $0x154] sm:$0xf] }
 0x1be   :  { %3061 = vmatpush.bf16.msrb.mxu3 %v5195_v22  ;;  %3485 = vmatpush.bf16.msra.mxu1 %v5375_v17  ;;  %v6390_v61 = vpop.f32.mrf.mxu1  ;;  %v2842_v62 = vpop.f32.mrf.mxu2  ;;  %v5403_v6 = vor.u32 %v6034_v56, %v5400_v57 }
 0x1c0   :  { %3492 = vmatpush.bf16.msra.mxu2 %v5487_v52  ;;  %v6052_v52 = vld [vmem:[#allocation7 + $0x144] sm:$0xf] }
 0x1c1   :  { %3518 = vmatpush.bf16.msrb.mxu0 %v5363_v8  ;;  %3062 = vmatmul.bf16.vlgmr.msrb.gmra.mxu3 %v6326_v15  ;;  %v2804_v15 = vadd.f32 %v2803_v29, %v2791_v58  ;;  %v2870_v1 = vpop.f32.mrf.mxu0  ;;  %v6032_v8 = vld [vmem:[#allocation7 + $0xa4] sm:$0xf]  ;;  %v5454_v29 = vld [vmem:[#allocation7 + $0x120] sm:$0xf]  ;;  %v6045_v58 = vld [vmem:[#allocation7 + $0x104] sm:$0xf0]  ;;  %v5475_v57 = vor.u32 %v6052_v52, %v5472_v53 }
 0x1c2   :  { %3530 = vmatpush.bf16.msrb.mxu1 %v5435_v23  ;;  %v5395_v16 = vor.u32 %v6032_v8, %v5392_v10  ;;  %v5384_v23 = vld [vmem:[#allocation7 + $0x98] sm:$0xf0]  ;;  %v5439_v42 = vor.u32 %v6045_v58, %v5438_v40  ;;  %v5467_v1 = vor.u32 %v6050_v63, %v5464_v0  ;;  %v1365_v8 = vperm.slane %v6380_v18, 2  ;;  %v5526_v58 = vld [vmem:[#allocation7 + $0x1b0] sm:$0xf] }
 0x1c3   :  { %v2817_v59 = vadd.f32 %v6365_v60, %v2804_v15  ;;  %v5315_v60 = vor.u32 %v6012_v3, %v5312_v4  ;;  %v5387_v28 = vor.u32 %v6030_v21, %v5384_v23  ;;  %v5456_v3 = vld [vmem:[#allocation7 + $0x128] sm:$0xf0]  ;;  %v5550_v23 = vld [vmem:[#allocation7 + $0x1e0] sm:$0xf]  ;;  %v5560_v52 = vld [vmem:[#allocation7 + $0x1f8] sm:$0xf0] }
 0x1c4   :  { %3493 = vmatpush.bf16.msra.mxu2 %v5479_v7  ;;  %v5448_v7 = vld [vmem:[#allocation7 + $0x118] sm:$0xf0] }
 0x1c5   :  { %3519 = vmatpush.bf16.msrb.mxu0 %v5355_v20  ;;  %v2830_v11 = vadd.f32 %v6372_v26, %v2817_v59  ;;  %v5463_v26 = vor.u32 %v6051_v46, %v5462_v24  ;;  %v6073_v24 = vld [vmem:[#allocation7 + $0x1e4] sm:$0xf0] }
 0x1c6   :  { %3531 = vmatpush.bf16.msrb.mxu1 %v5427_v33  ;;  %v2855_v22 = vpop.f32.mrf.mxu3  ;;  %v2883_v19 = vpop.f32.mrf.mxu1  ;;  %v5376_v33 = vld [vmem:[#allocation7 + $0x88] sm:$0xf0]  ;;  %v5551_v46 = vor.u32 %v6073_v24, %v5550_v23 }
 0x1c7   :  { %v2843_v14 = vadd.f32 %v2842_v62, %v2830_v11  ;;  %v2844_v20 = vpop.f32.mrf.mxu2  ;;  %v5379_v38 = vor.u32 %v6028_v31, %v5376_v33  ;;  %v5534_v33 = vld [vmem:[#allocation7 + $0x1c0] sm:$0xf] }
 0x1c8   :  { %3494 = vmatpush.bf16.msra.mxu2 %v5471_v49 }
 0x1c9   :  { %3520 = vmatpush.bf16.msrb.mxu0 %v5347_v2  ;;  %v2856_v17 = vadd.f32 %v2855_v22, %v2843_v14  ;;  %v6049_v2 = vld [vmem:[#allocation7 + $0x124] sm:$0xf0]  ;;  %v5440_v14 = vld [vmem:[#allocation7 + $0x108] sm:$0xf0]  ;;  %v6075_v22 = vld [vmem:[#allocation7 + $0x1f4] sm:$0xf0] }
 0x1ca   :  { %3532 = vmatpush.bf16.msrb.mxu1 %v5419_v44  ;;  %v5455_v35 = vor.u32 %v6049_v2, %v5454_v29  ;;  %v5496_v44 = vld [vmem:[#allocation7 + $0x178] sm:$0xf0]  ;;  %v5443_v49 = vor.u32 %v6044_v13, %v5440_v14 }
 0x1cb   :  { %v3068_v27 = vmax.f32 %v2856_v17, 0.0  ;;  %v5528_v13 = vld [vmem:[#allocation7 + $0x1b8] sm:$0xf0] }
 0x1cc   :  { %3495 = vmatpush.bf16.msra.mxu2 %v5463_v26  ;;  %v5542_v26 = vld [vmem:[#allocation7 + $0x1d0] sm:$0xf] }
 0x1cd   :  { %3521 = vmatpush.bf16.msrb.mxu0 %v5339_v55  ;;  %v3072_v30 = vpack.c.bf16 %v3068_v27, %v3068_v27  ;;  %v6058_v55 = vld [vmem:[#allocation7 + $0x174] sm:$0xf] }
 0x1ce   :  { %3533 = vmatpush.bf16.msrb.mxu1 %v5411_v34  ;;  %v2857_v37 = vpop.f32.mrf.mxu3  ;;  %v5499_v45 = vor.u32 %v6058_v55, %v5496_v44  ;;  %v6067_v55 = vld [vmem:[#allocation7 + $0x1b4] sm:$0xf0] }
 0x1cf   :  { %3486 = vmatmul.bf16.vlgmr.msra.gmra.mxu1 %v3072_v30 }
 0x1d0   :  { %3496 = vmatpush.bf16.msra.mxu2 %v5455_v35  ;;  %v6069_v35 = vld [vmem:[#allocation7 + $0x1c4] sm:$0xf0] }
 0x1d1   :  { %3522 = vmatpush.bf16.msrb.mxu0 %v5331_v25  ;;  %v5480_v25 = vld [vmem:[#allocation7 + $0x158] sm:$0xf0]  ;;  %v5535_v36 = vor.u32 %v6069_v35, %v5534_v33 }
 0x1d2   :  { %3534 = vmatpush.bf16.msrb.mxu1 %v5403_v6  ;;  %v5483_v34 = vor.u32 %v6054_v50, %v5480_v25  ;;  %v6046_v6 = vld [vmem:[#allocation7 + $0x114] sm:$0xf]  ;;  %v5502_v50 = vld [vmem:[#allocation7 + $0x180] sm:$0xf]  ;;  %v6061_v25 = vld [vmem:[#allocation7 + $0x184] sm:$0xf0] }
 0x1d3   :  { %v5451_v11 = vor.u32 %v6046_v6, %v5448_v7  ;;  %v6068_v6 = vld [vmem:[#allocation7 + $0x1c4] sm:$0xf]  ;;  %v5536_v7 = vld [vmem:[#allocation7 + $0x1c8] sm:$0xf0] }
 0x1d4   :  { %3497 = vmatpush.bf16.msra.mxu2 %v5447_v39 }
 0x1d5   :  { %3523 = vmatpush.bf16.msrb.mxu0 %v5323_v43  ;;  %v6048_v43 = vld [vmem:[#allocation7 + $0x124] sm:$0xf] }
 0x1d6   :  { %3535 = vmatpush.bf16.msrb.mxu1 %v5395_v16  ;;  %v5459_v4 = vor.u32 %v6048_v43, %v5456_v3  ;;  %v5558_v16 = vld [vmem:[#allocation7 + $0x1f0] sm:$0xf]  ;;  %v5544_v43 = vld [vmem:[#allocation7 + $0x1d8] sm:$0xf0] }
 0x1d7   :  { %v5559_v19 = vor.u32 %v6075_v22, %v5558_v16  ;;  %v6064_v16 = vld [vmem:[#allocation7 + $0x1a4] sm:$0xf] }
 0x1d8   :  { %3498 = vmatpush.bf16.msra.mxu2 %v5439_v42  ;;  %v5527_v42 = vor.u32 %v6067_v55, %v5526_v58 }
 0x1d9   :  { %3524 = vmatpush.bf16.msrb.mxu0 %v5315_v60  ;;  %v2920_v32 = vpop.f32.mrf.mxu0  ;;  %v2869_v60 = vadd.f32 %v6387_v41, %v1365_v8  ;;  %3504 = vmatpush.bf16.msra.mxu3 %v5559_v19  ;;  %v5512_v19 = vld [vmem:[#allocation7 + $0x198] sm:$0xf0] }
 0x1da   :  { %3536 = vmatpush.bf16.msrb.mxu1 %v5387_v28  ;;  %v6071_v28 = vld [vmem:[#allocation7 + $0x1d4] sm:$0xf0] }
 0x1db   :  { %v2882_v12 = vadd.f32 %v6390_v61, %v2869_v60  ;;  %v5543_v2 = vor.u32 %v6071_v28, %v5542_v26  ;;  %v5504_v26 = vld [vmem:[#allocation7 + $0x188] sm:$0xf0] }
 0x1dc   :  { %3525 = vmatmul.bf16.vlgmr.msrb.gmra.mxu0 %v6374_v54  ;;  %3543 = vmatpush.bf16.msrb.mxu2 %v5499_v45  ;;  %v6056_v54 = vld [vmem:[#allocation7 + $0x164] sm:$0xf]  ;;  %v6065_v45 = vld [vmem:[#allocation7 + $0x1a4] sm:$0xf0] }
 0x1dd   :  { %v5491_v15 = vor.u32 %v6056_v54, %v5488_v47  ;;  %3505 = vmatpush.bf16.msra.mxu3 %v5551_v46  ;;  %v5510_v47 = vld [vmem:[#allocation7 + $0x190] sm:$0xf] }
 0x1de   :  { %3537 = vmatpush.bf16.msrb.mxu1 %v5379_v38  ;;  %v2894_v48 = vpop.f32.mrf.mxu2 }
 0x1df   :  { %v2895_v17 = vadd.f32 %v2894_v48, %v2882_v12  ;;  %v6066_v12 = vld [vmem:[#allocation7 + $0x1b4] sm:$0xf] }
 0x1e0   :  { %v2933_v9 = vpop.f32.mrf.mxu1  ;;  %3544 = vmatpush.bf16.msrb.mxu2 %v5491_v15  ;;  %v6063_v15 = vld [vmem:[#allocation7 + $0x194] sm:$0xf0]  ;;  %v5531_v14 = vor.u32 %v6066_v12, %v5528_v13 }
 0x1e1   :  { %3538 = vmatmul.bf16.vlgmr.msrb.gmra.mxu1 %v3072_v30  ;;  %v2922_v51 = vpop.f32.mrf.mxu0  ;;  %3506 = vmatpush.bf16.msra.mxu3 %v5543_v2 }
 0x1e2   :  { %v6074_v51 = vld [vmem:[#allocation7 + $0x1f4] sm:$0xf] }
 0x1e3   :  { %v5563_v53 = vor.u32 %v6074_v51, %v5560_v52  ;;  %v6091_v51 = vld [vmem:[%s6471_s7 + $0x78] sm:$0xff]  ;;  %v6090_v52 = vld [vmem:[%s6471_s7 + $0x70] sm:$0xff] }
 0x1e4   :  { %3545 = vmatpush.bf16.msrb.mxu2 %v5483_v34  ;;  %v2907_v56 = vpop.f32.mrf.mxu3  ;;  %v5503_v34 = vor.u32 %v6061_v25, %v5502_v50  ;;  %v6083_v25 = vld [vmem:[%s6471_s7 + $0x38] sm:$0xff]  ;;  %3718 = vmatpush.bf16.msra.mxu1 %v6091_v51 }
 0x1e5   :  { %v2908_v21 = vadd.f32 %v2907_v56, %v2895_v17  ;;  %3507 = vmatpush.bf16.msra.mxu3 %v5535_v36  ;;  %v6062_v17 = vld [vmem:[#allocation7 + $0x194] sm:$0xf]  ;;  %3705 = vmatpush.bf16.msra.mxu0 %v6083_v25 }
 0x1e6   :  { %v2896_v59 = vpop.f32.mrf.mxu2  ;;  %v5515_v24 = vor.u32 %v6062_v17, %v5512_v19 }
 0x1e7   :  { %v2921_v27 = vadd.f32 %v2920_v32, %v2908_v21  ;;  %v5518_v32 = vld [vmem:[#allocation7 + $0x1a0] sm:$0xf]  ;;  %v5552_v59 = vld [vmem:[#allocation7 + $0x1e8] sm:$0xf0]  ;;  %v1366_v21 = vperm.slane %v6380_v18, 3 }
 0x1e8   :  { %v2935_v62 = vpop.f32.mrf.mxu1  ;;  %3546 = vmatpush.bf16.msrb.mxu2 %v5475_v57  ;;  %v5519_v54 = vor.u32 %v6065_v45, %v5518_v32  ;;  %v6072_v57 = vld [vmem:[#allocation7 + $0x1e4] sm:$0xf]  ;;  %3719 = vmatpush.bf16.msra.mxu1 %v6090_v52 }
 0x1e9   :  { %v2934_v30 = vadd.f32 %v2933_v9, %v2921_v27  ;;  %3508 = vmatpush.bf16.msra.mxu3 %v5527_v42  ;;  %v5511_v9 = vor.u32 %v6063_v15, %v5510_v47  ;;  %v5555_v62 = vor.u32 %v6072_v57, %v5552_v59  ;;  %v6080_v57 = vld [vmem:[%s6471_s7 + $0x20] sm:$0xff]  ;;  %v6079_v59 = vld [vmem:[%s6471_s7 + $0x18] sm:$0xff] }
 0x1ec   :  { %3547 = vmatpush.bf16.msrb.mxu2 %v5467_v1  ;;  %v2909_v10 = vpop.f32.mrf.mxu3  ;;  %v6070_v1 = vld [vmem:[#allocation7 + $0x1d4] sm:$0xf] }
 0x1ed   :  { %3509 = vmatpush.bf16.msra.mxu3 %v5519_v54  ;;  %v5539_v10 = vor.u32 %v6068_v6, %v5536_v7  ;;  %v6088_v6 = vld [vmem:[%s6471_s7 + $0x60] sm:$0xff]  ;;  %v6087_v7 = vld [vmem:[%s6471_s7 + $0x58] sm:$0xff] }
 0x1f0   :  { %3548 = vmatpush.bf16.msrb.mxu2 %v5459_v4  ;;  %v5547_v4 = vor.u32 %v6070_v1, %v5544_v43  ;;  %v6077_v43 = vld [vmem:[%s6471_s7 + $0x8] sm:$0xff] }
 0x1f1   :  { %3510 = vmatpush.bf16.msra.mxu3 %v5511_v9 }
 0x1f4   :  { %3549 = vmatpush.bf16.msrb.mxu2 %v5451_v11 }
 0x1f5   :  { %3511 = vmatpush.bf16.msra.mxu3 %v5503_v34  ;;  %v6082_v34 = vld [vmem:[%s6471_s7 + $0x30] sm:$0xff] }
 0x1f6   :  { %3706 = vmatpush.bf16.msra.mxu0 %v6082_v34 }
 0x1f8   :  { %3550 = vmatpush.bf16.msrb.mxu2 %v5443_v49  ;;  %v5520_v49 = vld [vmem:[#allocation7 + $0x1a8] sm:$0xf0] }
 0x1f9   :  { %v6397_v20 = vpop.f32.mrf.mxu0  ;;  %3556 = vmatpush.bf16.msrb.mxu3 %v5563_v53  ;;  %v5523_v22 = vor.u32 %v6064_v16, %v5520_v49  ;;  %v6081_v53 = vld [vmem:[%s6471_s7 + $0x28] sm:$0xff] }
 0x1fa   :  { %v2973_v46 = vadd.f32 %v6397_v20, %v1366_v21  ;;  %3707 = vmatpush.bf16.msra.mxu0 %v6081_v53 }
 0x1fd   :  { %3557 = vmatpush.bf16.msrb.mxu3 %v5555_v62 }
 0x1fe   :  { %v2946_v41 = vpop.f32.mrf.mxu2  ;;  %3708 = vmatpush.bf16.msra.mxu0 %v6080_v57 }
 0x1ff   :  { %v2947_v31 = vadd.f32 %v2946_v41, %v2934_v30  ;;  %v6060_v41 = vld [vmem:[#allocation7 + $0x184] sm:$0xf] }
 0x200   :  { %v6399_v61 = vpop.f32.mrf.mxu1  ;;  %v5507_v2 = vor.u32 %v6060_v41, %v5504_v26  ;;  %v6101_v41 = vld [vmem:[%s6472_s8] ss:$0 sm:$0xff] }
 0x201   :  { %v2974_v29 = vpop.f32.mrf.mxu0  ;;  %3558 = vmatpush.bf16.msrb.mxu3 %v5547_v4  ;;  %v2986_v27 = vadd.f32 %v6399_v61, %v2973_v46  ;;  %v6076_v4 = vld [vmem:[%s6471_s7] sm:$0xff] }
 0x202   :  { %3709 = vmatpush.bf16.msra.mxu0 %v6079_v59 }
 0x204   :  { %v2959_v5 = vpop.f32.mrf.mxu3 }
 0x205   :  { %v2960_v37 = vadd.f32 %v2959_v5, %v2947_v31  ;;  %3559 = vmatpush.bf16.msrb.mxu3 %v5539_v10  ;;  %v6085_v10 = vld [vmem:[%s6471_s7 + $0x48] sm:$0xff] }
 0x206   :  { %v2948_v39 = vpop.f32.mrf.mxu2 }
 0x207   :  { %v3069_v38 = vmax.f32 %v2960_v37, 0.0 }
 0x208   :  { %v2987_v40 = vpop.f32.mrf.mxu1 }
 0x209   :  { %v3073_v44 = vpack.c.bf16 %v3069_v38, %v3069_v38  ;;  %3560 = vmatpush.bf16.msrb.mxu3 %v5531_v14  ;;  %v3139_v40 = vld [vmem:[%s6470_s6] sm:$0x3] }
 0x20a   :  { %v3141_v58 = vperm.slane %v3139_v40, 0  ;;  %v3142_v47 = vperm.slane %v3139_v40, 1 }
 0x20b   :  { %3499 = vmatmul.bf16.vlgmr.msra.gmra.mxu2 %v3073_v44 }
 0x20c   :  { %v2961_v48 = vpop.f32.mrf.mxu3 }
 0x20d   :  { %3561 = vmatpush.bf16.msrb.mxu3 %v5523_v22 }
 0x211   :  { %3562 = vmatpush.bf16.msrb.mxu3 %v5515_v24 }
 0x215   :  { %3563 = vmatpush.bf16.msrb.mxu3 %v5507_v2  ;;  %v6102_v2 = vld [vmem:[%s6473_s9] ss:$0 sm:$0xff] }
 0x219   :  { %v3024_v56 = vpop.f32.mrf.mxu0 }
 0x21b   :  { %3551 = vmatmul.bf16.vlgmr.msrb.gmra.mxu2 %v3073_v44 }
 0x21e   :  { %v2998_v63 = vpop.f32.mrf.mxu2 }
 0x21f   :  { %v2999_v28 = vadd.f32 %v2998_v63, %v2986_v27  ;;  %v6078_v63 = vld [vmem:[%s6471_s7 + $0x10] sm:$0xff] }
 0x220   :  { %v3037_v0 = vpop.f32.mrf.mxu1  ;;  %3710 = vmatpush.bf16.msra.mxu0 %v6078_v63 }
 0x221   :  { %v3026_v3 = vpop.f32.mrf.mxu0 }
 0x222   :  { %v6089_v3 = vld [vmem:[%s6471_s7 + $0x68] sm:$0xff] }
 0x223   :  { %3720 = vmatpush.bf16.msra.mxu1 %v6089_v3 }
 0x224   :  { %v3011_v8 = vpop.f32.mrf.mxu3  ;;  %3711 = vmatpush.bf16.msra.mxu0 %v6077_v43 }
 0x225   :  { %v3012_v30 = vadd.f32 %v3011_v8, %v2999_v28  ;;  %v6086_v8 = vld [vmem:[%s6471_s7 + $0x50] sm:$0xff] }
 0x226   :  { %v3000_v11 = vpop.f32.mrf.mxu2 }
 0x227   :  { %v3025_v31 = vadd.f32 %v3024_v56, %v3012_v30  ;;  %3721 = vmatpush.bf16.msra.mxu1 %v6088_v6  ;;  %v6084_v11 = vld [vmem:[%s6471_s7 + $0x40] sm:$0xff] }
 0x228   :  { %v3039_v60 = vpop.f32.mrf.mxu1  ;;  %3712 = vmatpush.bf16.msra.mxu0 %v6076_v4 }
 0x229   :  { %v3038_v5 = vadd.f32 %v3037_v0, %v3025_v31 }
 0x22b   :  { %3722 = vmatpush.bf16.msra.mxu1 %v6087_v7 }
 0x22c   :  { %v3013_v23 = vpop.f32.mrf.mxu3 }
 0x22f   :  { %3723 = vmatpush.bf16.msra.mxu1 %v6086_v8 }
 0x233   :  { %3724 = vmatpush.bf16.msra.mxu1 %v6085_v10 }
 0x237   :  { %3725 = vmatpush.bf16.msra.mxu1 %v6084_v11 }
 0x239   :  { %v3474_v29 = vpop.f32.mrf.mxu0 }
 0x23a   :  { %v3475_v55 = vadd.f32 %v3474_v29, %v3141_v58 }
 0x23e   :  { %v3050_v33 = vpop.f32.mrf.mxu2 }
 0x23f   :  { %v3051_v18 = vadd.f32 %v3050_v33, %v3038_v5  ;;  %v6103_v5 = vld [vmem:[#allocation2] ss:$0 sm:$0xff] }
 0x241   :  { %v3476_v35 = vpop.f32.mrf.mxu0 }
 0x244   :  { %v3063_v36 = vpop.f32.mrf.mxu3 }
 0x245   :  { %v3064_v37 = vadd.f32 %v3063_v36, %v3051_v18 }
 0x246   :  { %v3052_v39 = vpop.f32.mrf.mxu2 }
 0x247   :  { %v3070_v38 = vmax.f32 %v3064_v37, 0.0 }
 0x249   :  { %v3074_v20 = vpack.c.bf16 %v3070_v38, %v3070_v38 }
 0x24b   :  { %3512 = vmatmul.bf16.vlgmr.msra.gmra.mxu3 %v3074_v20 }
 0x24c   :  { %v3065_v61 = vpop.f32.mrf.mxu3  ;;  %v3487_v44 = vpop.f32.mrf.mxu1 }
 0x24d   :  { %v3488_v32 = vadd.f32 %v3487_v44, %v3475_v55 }
 0x254   :  { %v3489_v54 = vpop.f32.mrf.mxu1 }
 0x259   :  { %v3526_v42 = vpop.f32.mrf.mxu0 }
 0x25a   :  { %v3527_v15 = vadd.f32 %v3526_v42, %v3142_v47 }
 0x25b   :  { %3564 = vmatmul.bf16.vlgmr.msrb.gmra.mxu3 %v3074_v20 }
 0x25e   :  { %v3539_v48 = vpop.f32.mrf.mxu1 }
 0x25f   :  { %v3540_v9 = vadd.f32 %v3539_v48, %v3527_v15 }
 0x261   :  { %v3528_v45 = vpop.f32.mrf.mxu0 }
 0x266   :  { %v3541_v50 = vpop.f32.mrf.mxu1 }
 0x28e   :  { %v3500_v56 = vpop.f32.mrf.mxu2 }
 0x28f   :  { %v3501_v60 = vadd.f32 %v3500_v56, %v3488_v32 }
 0x296   :  { %v3502_v62 = vpop.f32.mrf.mxu2 }
 0x29e   :  { %v3552_v0 = vpop.f32.mrf.mxu2 }
 0x29f   :  { %v3553_v22 = vadd.f32 %v3552_v0, %v3540_v9 }
 0x2a6   :  { %v3554_v1 = vpop.f32.mrf.mxu2 }
 0x2ce   :  { %v3513_v12 = vpop.f32.mrf.mxu3 }
 0x2cf   :  { %v3514_v13 = vadd.f32 %v3513_v12, %v3501_v60 }
 0x2d1   :  { %v3569_v14 = vmax.f32 %v3514_v13, 0.0 }
 0x2d3   :  { %v3571_v16 = vpack.c.bf16 %v3569_v14, %v3569_v14 }
 0x2d5   :  { %3713 = vmatmul.bf16.vlgmr.msra.gmra.mxu0 %v3571_v16 }
 0x2d6   :  { %v3515_v49 = vpop.f32.mrf.mxu3 }
 0x2de   :  { %v3565_v17 = vpop.f32.mrf.mxu3 }
 0x2df   :  { %v3566_v19 = vadd.f32 %v3565_v17, %v3553_v22 }
 0x2e1   :  { %v3570_v21 = vmax.f32 %v3566_v19, 0.0 }
 0x2e3   :  { %v3572_v23 = vpack.c.bf16 %v3570_v21, %v3570_v21 }
 0x2e5   :  { %3726 = vmatmul.bf16.vlgmr.msra.gmra.mxu1 %v3572_v23 }
 0x2e6   :  { %v3567_v24 = vpop.f32.mrf.mxu3 }
 0x352   :  { %v3714_v46 = vpop.f32.mrf.mxu0 }
 0x353   :  { %v3715_v26 = vadd.f32 %v6101_v41, %v3714_v46 }
 0x35a   :  { %v3716_v27 = vpop.f32.mrf.mxu0 }
 0x362   :  { %v3727_v28 = vpop.f32.mrf.mxu1 }
 0x363   :  { %v3728_v29 = vadd.f32 %v3727_v28, %v3715_v26 }
 0x365   :  { %v3731_v30 = vmax.f32 %v3728_v29, 0.0 }
 0x367   :  { %v3736_v31 = vmul.f32 %v6102_v2, %v3731_v30 }
 0x369   :  { %v3738_v33 = vsel %vm3737_vm0, %v3736_v31, 0.0 }
 0x36a   :  { %v3729_v35 = vpop.f32.mrf.mxu1  ;;  %3739 = vadd.xlane.f32.xlu0 %v3738_v33 }
 0x3dd   :  { %v3740_v18 = vpop.xlane.xlu0 %3739 }
 0x3de   :  { %v3745_v36 = vadd.f32 %v6103_v5, %v3740_v18 }
 0x3e0   :  { %v3746_v37 = vsub.f32 0.0, %v3745_v36 }
 0x3e2   :  { %v3747_v38 = vmul.f32 1.442695, %v3746_v37 }
 0x3e4   :  { %6104 = vpow2.f32 %v3747_v38 }
 0x3ea   :  { %v6105_v39 = vpop.eup %6104 }
 0x3eb   :  { %v3749_v20 = vadd.f32 1.0, %v6105_v39 }
 0x3ed   :  { %6106 = vrcp.f32 %v3749_v20  ;;  %v3761_v55 = vand.u32 2147483648, %v3749_v20  ;;  %v3759_v44 = vand.u32 2147483647, %v3749_v20  ;;  %vm3755_vm2 = vweird.f32 %v3749_v20 }
 0x3ef   :  { %v3762_v45 = vor.u32 1.1754944e-38, %v3761_v55  ;;  %vm3760_vm5 = vcmp.eq.f32.partialorder %v3759_v44, 8.507059e+37 }
 0x3f3   :  { %v6107_v61 = vpop.eup %6106 }
 0x3f4   :  { %v3751_v40 = vmul.f32 %v6107_v61, %v3749_v20  ;;  %vm3756_vm1 = vweird.f32 %v6107_v61 }
 0x3f5   :  { %vm3757_vm3 = vmor %vm3755_vm2, %vm3756_vm1 }
 0x3f6   :  { %v3752_v58 = vsub.f32 1.0, %v3751_v40 }
 0x3f8   :  { %v3753_v42 = vmul.f32 %v6107_v61, %v3752_v58 }
 0x3fa   :  { %v3754_v32 = vadd.f32 %v6107_v61, %v3753_v42 }
 0x3fc   :  { %v3758_v54 = vsel %vm3757_vm3, %v6107_v61, %v3754_v32 }
 0x3fd   :  { %v3763_v47 = vsel %vm3760_vm5, %v3762_v45, %v3758_v54 }
 0x3fe   :  { %3765 = vst.msk [vmem:[%s6475_s11] sm:$0xff] %vm3764_vm4, %v3763_v47 }
 0x3ff   :  { %3770 = vsyncpa [#allocation4], 1 }
 0x400   :  { %3771 = vsyncpa [#allocation6], 1 }

</bundles_post_ra>
